<compile_context>
chip_gen: v6e
topology: v6e:2x2x1
jax: 0.10.0
libtpu: 0.0.40
codegen_flags: <defaults>
</compile_context>

<pallas_src>
import jax
import jax.numpy as jnp
from jax import lax
from jax.experimental import pallas as pl
from jax.experimental.pallas import tpu as pltpu


# ---------------------------------------------------------------------------
# Fused kernel (BLK images per grid step)
# ---------------------------------------------------------------------------

def _make_shadow_kernel(BLK, H1, W1, Cin, C1, C2, n_cls):
    H2, W2 = H1 // 2, W1 // 2          # feature map after pool 1
    H3, W3 = H2 // 2, W2 // 2          # after pool 2

    def conv_block(x4d, pad_ref, tap_ref, zbuf_ref, w9_ref, s_ref, t_ref,
                   h, w, cin, cout):
        # --- zero ONLY the 1-wide border of the padded scratch (interior is overwritten below) ---
        zrow = jnp.zeros((BLK, 1, w + 2, cin), jnp.float32)
        pad_ref[:, 0:1, :, :] = zrow
        pad_ref[:, h + 1:h + 2, :, :] = zrow
        zcol = jnp.zeros((BLK, h + 2, 1, cin), jnp.float32)
        pad_ref[:, :, 0:1, :] = zcol
        pad_ref[:, :, w + 1:w + 2, :] = zcol
        pad_ref[:, 1:h + 1, 1:w + 1, :] = x4d

        # --- im2col tap matrix (BLK*h*w, 9*cin): 9 lane-block stores, then ONE matmul (K=9*cin) ---
        for k in range(9):                               # static unroll
            dy, dx = k // 3, k % 3
            tap_ref[:, k * cin:(k + 1) * cin] = (
                pad_ref[:, dy:dy + h, dx:dx + w, :].reshape(BLK * h * w, cin))
        z = jnp.dot(tap_ref[...], w9_ref[...], preferred_element_type=jnp.float32)

        # folded BatchNorm (running stats) + ReLU
        z = jnp.maximum(z * s_ref[...] + t_ref[...], 0.0)

        # --- 2x2 max-pool: 4 strided taps + 3 elementwise maxes (no matmuls) ---
        zbuf_ref[...] = z.reshape(BLK * h, w, cout)      # rows = (b, y), sublane = x, lane = c
        t00 = zbuf_ref[pl.ds(0, BLK * h // 2, stride=2), pl.ds(0, w // 2, stride=2), :]
        t01 = zbuf_ref[pl.ds(0, BLK * h // 2, stride=2), pl.ds(1, w // 2, stride=2), :]
        t10 = zbuf_ref[pl.ds(1, BLK * h // 2, stride=2), pl.ds(0, w // 2, stride=2), :]
        t11 = zbuf_ref[pl.ds(1, BLK * h // 2, stride=2), pl.ds(1, w // 2, stride=2), :]
        return jnp.maximum(jnp.maximum(t00, t01),
                           jnp.maximum(t10, t11))        # (BLK*h/2, w/2, cout)

    def kernel(x_ref, w9a_ref, s1_ref, t1_ref, w9b_ref, s2_ref, t2_ref,
               wl1_ref, bl1_ref, wl2_ref, bl2_ref,
               o_ref,
               pad1_ref, pad2_ref, tap1_ref, tap2_ref, zbuf1_ref, zbuf2_ref):
        # conv block 1
        p1 = conv_block(x_ref[...], pad1_ref, tap1_ref, zbuf1_ref,
                        w9a_ref, s1_ref, t1_ref, H1, W1, Cin, C1)     # (BLK*H2, W2, C1)
        # conv block 2
        p2 = conv_block(p1.reshape(BLK, H2, W2, C1), pad2_ref, tap2_ref, zbuf2_ref,
                        w9b_ref, s2_ref, t2_ref, H2, W2, C1, C2)      # (BLK*H3, W3, C2)
        p2_4d = p2.reshape(BLK, H3, W3, C2)

        # Flatten (position-major: column = p*C2 + c, p = y*W3 + x).  Linear-1 rows were permuted
        # host-side to match this order, so no masks / extra matmuls are needed.
        flat = jnp.concatenate(
            [p2_4d[:, y, x, :] for y in range(H3) for x in range(W3)], axis=-1)  # (BLK, P2*C2)

        # classifier: Linear -> ReLU -> Linear, softplus(beta=1, threshold=20) on variance half
        hact = jnp.maximum(
            jnp.dot(flat, wl1_ref[...], preferred_element_type=jnp.float32) + bl1_ref[...], 0.0)
        out = jnp.dot(hact, wl2_ref[...], preferred_element_type=jnp.float32) + bl2_ref[...]

        mean = out[:, :n_cls]
        v = out[:, n_cls:]
        var = jnp.where(v > 20.0, v, jnp.log1p(jnp.exp(jnp.minimum(v, 20.0))))
        o_ref[0] = jnp.concatenate([mean, var], axis=-1)   # one lane-dense (BLK, 2*n_cls) store

    return kernel


# ---------------------------------------------------------------------------
# Wrapper: batch-tiled pallas_call; all layout plumbing is host-side & tiny
# ---------------------------------------------------------------------------

def shadow_net_forward(x_nchw, params, block_batch=None):
    B, Cin, H1, W1 = x_nchw.shape
    assert H1 % 4 == 0 and W1 % 4 == 0, "kernel assumes H % 4 == 0 and W % 4 == 0"
    blk1, blk2, cls = params["conv1"], params["conv2"], params["classifier"]
    C1 = blk1["w9"].shape[-1]
    C2 = blk2["w9"].shape[-1]
    H2, W2 = H1 // 2, W1 // 2
    H3, W3 = H2 // 2, W2 // 2
    P2 = H3 * W3
    hidden = cls["w1"].shape[1]
    n_cls = cls["w2"].shape[1] // 2

    # batch tile: keep >=2 grid steps when B >= 2 (v7x has 2 TCs); cap at 8 for VMEM headroom
    if block_batch is None:
        block_batch = max(1, min(8, B // 2))
    BLK = block_batch
    G = -(-B // BLK)
    B_pad = G * BLK

    # layout plumbing only: NHWC, pad batch to a multiple of BLK
    x = jnp.transpose(x_nchw, (0, 2, 3, 1)).astype(jnp.float32)
    if B_pad != B:
        x = jnp.concatenate([x, jnp.zeros((B_pad - B, H1, W1, Cin), jnp.float32)], axis=0)

    # conv weights reshaped so each conv is ONE matmul over K = 9*Cin taps (row order dy, dx, ci)
    w9r1 = blk1["w9"].reshape(9 * Cin, C1)
    w9r2 = blk2["w9"].reshape(9 * C1, C2)

    # permute Linear-1 rows from torch's NCHW-flatten order (c*P2 + p) to the kernel's
    # position-major order n = p*C2 + c
    n_idx = jnp.arange(P2 * C2)
    w1_perm = cls["w1"][(n_idx % C2) * P2 + (n_idx // C2), :]

    kernel = _make_shadow_kernel(BLK, H1, W1, Cin, C1, C2, n_cls)

    def const_spec(shape):
        return pl.BlockSpec(shape, lambda b: (0,) * len(shape))

    out = pl.pallas_call(
        kernel,
        out_shape=jax.ShapeDtypeStruct((G, BLK, 2 * n_cls), jnp.float32),
        grid=(G,),
        in_specs=[
            pl.BlockSpec((BLK, H1, W1, Cin), lambda b: (b, 0, 0, 0)),
            const_spec((9 * Cin, C1)),
            const_spec((1, C1)),
            const_spec((1, C1)),
            const_spec((9 * C1, C2)),
            const_spec((1, C2)),
            const_spec((1, C2)),
            const_spec((P2 * C2, hidden)),
            const_spec((1, hidden)),
            const_spec((hidden, 2 * n_cls)),
            const_spec((1, 2 * n_cls)),
        ],
        out_specs=pl.BlockSpec((1, BLK, 2 * n_cls), lambda b: (b, 0, 0)),
        scratch_shapes=[
            pltpu.VMEM((BLK, H1 + 2, W1 + 2, Cin), jnp.float32),   # padded input, conv 1
            pltpu.VMEM((BLK, H2 + 2, W2 + 2, C1), jnp.float32),    # padded input, conv 2
            pltpu.VMEM((BLK * H1 * W1, 9 * Cin), jnp.float32),     # im2col taps, conv 1
            pltpu.VMEM((BLK * H2 * W2, 9 * C1), jnp.float32),      # im2col taps, conv 2
            pltpu.VMEM((BLK * H1, W1, C1), jnp.float32),           # pre-pool activations, conv 1
            pltpu.VMEM((BLK * H2, W2, C2), jnp.float32),           # pre-pool activations, conv 2
        ],
        compiler_params=pltpu.CompilerParams(
            dimension_semantics=("parallel",),       # batch-tile grid -> shard across v7x TCs
            vmem_limit_bytes=32 * 1024 * 1024,
        ),
    )(x, w9r1, blk1["scale"], blk1["shift"],
      w9r2, blk2["scale"], blk2["shift"],
      w1_perm, cls["b1"], cls["w2"], cls["b2"])

    out = out.reshape(B_pad, 2 * n_cls)[:B]
    return out[:, :n_cls], out[:, n_cls:]


# ---------------------------------------------------------------------------
# Deterministic parameter construction (synthetic weights, PyTorch shapes)
# ---------------------------------------------------------------------------

def _calc_feat_linear_cifar(size):
    feat = (size - 3 + 2) // 1 + 1     # conv 3x3 pad 1
    feat = (feat - 2) // 2 + 1         # maxpool 2
    feat = (feat - 3 + 2) // 1 + 1
    feat = (feat - 2) // 2 + 1
    return feat


def init_params(key, input_dim, hidden_layers, size, out_classes):
    eps = 1e-5
    keys = iter(jax.random.split(key, 16))

    def conv_block_params(cin, cout):
        w = 0.1 * jax.random.normal(next(keys), (cout, cin, 3, 3), jnp.float32)  # torch OIHW
        b = 0.1 * jax.random.normal(next(keys), (cout,), jnp.float32)
        gamma = 1.0 + 0.1 * jax.random.normal(next(keys), (cout,), jnp.float32)
        beta = 0.1 * jax.random.normal(next(keys), (cout,), jnp.float32)
        rmean = 0.1 * jax.random.normal(next(keys), (cout,), jnp.float32)
        rvar = jnp.abs(jax.random.normal(next(keys), (cout,), jnp.float32)) + 0.5
        scale = gamma / jnp.sqrt(rvar + eps)
        shift = beta + (b - rmean) * scale
        w_hwio = jnp.transpose(w, (2, 3, 1, 0))                      # (3,3,Cin,Cout)
        return {"w9": w_hwio.reshape(9, cin, cout),                  # k = dy*3 + dx
                "w_hwio": w_hwio,
                "scale": scale.reshape(1, cout), "shift": shift.reshape(1, cout)}

    conv1 = conv_block_params(input_dim, hidden_layers[0])
    conv2 = conv_block_params(hidden_layers[0], hidden_layers[1])

    feat = _calc_feat_linear_cifar(size)
    feat_dim = feat * feat * hidden_layers[1]
    w1 = 0.1 * jax.random.normal(next(keys), (feat_dim, hidden_layers[2]), jnp.float32)
    b1 = 0.1 * jax.random.normal(next(keys), (1, hidden_layers[2]), jnp.float32)
    w2 = 0.1 * jax.random.normal(next(keys), (hidden_layers[2], 2 * out_classes), jnp.float32)
    b2 = 0.1 * jax.random.normal(next(keys), (1, 2 * out_classes), jnp.float32)

    return {"conv1": conv1, "conv2": conv2,
            "classifier": {"w1": w1, "b1": b1, "w2": w2, "b2": b2}}


# ---------------------------------------------------------------------------
# Pure-JAX reference for correctness checking
# ---------------------------------------------------------------------------

def ref_forward(x_nchw, params):
    x = jnp.transpose(x_nchw, (0, 2, 3, 1)).astype(jnp.float32)
    for blk in (params["conv1"], params["conv2"]):
        y = lax.conv_general_dilated(
            x, blk["w_hwio"], window_strides=(1, 1), padding="SAME",
            dimension_numbers=("NHWC", "HWIO", "NHWC"),
            precision=lax.Precision.HIGHEST)
        y = jnp.maximum(y * blk["scale"].reshape(1, 1, 1, -1)
                        + blk["shift"].reshape(1, 1, 1, -1), 0.0)
        y = lax.reduce_window(y, -jnp.inf, lax.max, (1, 2, 2, 1), (1, 2, 2, 1), "VALID")
        x = y
    n = x.shape[0]
    flat = jnp.transpose(x, (0, 3, 1, 2)).reshape(n, -1)             # NCHW flatten
    cls = params["classifier"]
    h = jnp.maximum(jnp.dot(flat, cls["w1"], precision=lax.Precision.HIGHEST) + cls["b1"], 0.0)
    out = jnp.dot(h, cls["w2"], precision=lax.Precision.HIGHEST) + cls["b2"]
    c = cls["w2"].shape[1] // 2
    mean, raw_var = out[:, :c], out[:, c:]
    var = jnp.where(raw_var > 20.0, raw_var,
                    jnp.log1p(jnp.exp(jnp.minimum(raw_var, 20.0))))
    return mean, var


# ---------------------------------------------------------------------------

if __name__ == "__main__":
    input_dim, size = 4, 16
    hidden_layers = [8, 16, 32]
    out_classes = 5

    key = jax.random.PRNGKey(0)
    k_x, k_x2, k_p = jax.random.split(key, 3)
    params = init_params(k_p, input_dim, hidden_layers, size, out_classes)

    fwd = jax.jit(shadow_net_forward)

    # case 1: batch=2 -> BLK=1, 2 grid steps
    batch = 2
    x = jax.random.normal(k_x, (batch, input_dim, size, size), jnp.float32)     # NCHW input
    mean, var = jax.block_until_ready(fwd(x, params))
    mean_ref, var_ref = jax.block_until_ready(ref_forward(x, params))
    assert mean.shape == (batch, out_classes) and var.shape == (batch, out_classes)
    assert bool(jnp.all(var >= 0.0))
    assert jnp.allclose(mean, mean_ref, rtol=1e-3, atol=1e-3), \
        f"mean mismatch: {jnp.max(jnp.abs(mean - mean_ref))}"
    assert jnp.allclose(var, var_ref, rtol=1e-3, atol=1e-3), \
        f"var mismatch: {jnp.max(jnp.abs(var - var_ref))}"

    # case 2: batch=5 -> BLK=2, 3 grid steps (exercises the batch tile + padding path)
    batch2 = 5
    x2 = jax.random.normal(k_x2, (batch2, input_dim, size, size), jnp.float32)
    mean2, var2 = jax.block_until_ready(fwd(x2, params))
    mean2_ref, var2_ref = jax.block_until_ready(ref_forward(x2, params))
    assert mean2.shape == (batch2, out_classes) and var2.shape == (batch2, out_classes)
    assert jnp.allclose(mean2, mean2_ref, rtol=1e-3, atol=1e-3), \
        f"mean mismatch (batched): {jnp.max(jnp.abs(mean2 - mean2_ref))}"
    assert jnp.allclose(var2, var2_ref, rtol=1e-3, atol=1e-3), \
        f"var mismatch (batched): {jnp.max(jnp.abs(var2 - var2_ref))}"

    print("KERNEL_OK")
</pallas_src>

<mosaic_0001>
module attributes {stable_mosaic.version = 11 : i64} {
  func.func @kernel(%arg0: i32, %arg1: memref<1x16x16x4xf32, #tpu.memory_space<vmem>>, %arg2: memref<36x8xf32, #tpu.memory_space<vmem>>, %arg3: memref<1x8xf32, #tpu.memory_space<vmem>>, %arg4: memref<1x8xf32, #tpu.memory_space<vmem>>, %arg5: memref<72x16xf32, #tpu.memory_space<vmem>>, %arg6: memref<1x16xf32, #tpu.memory_space<vmem>>, %arg7: memref<1x16xf32, #tpu.memory_space<vmem>>, %arg8: memref<256x32xf32, #tpu.memory_space<vmem>>, %arg9: memref<1x32xf32, #tpu.memory_space<vmem>>, %arg10: memref<32x10xf32, #tpu.memory_space<vmem>>, %arg11: memref<1x10xf32, #tpu.memory_space<vmem>>, %arg12: memref<1x1x10xf32, #tpu.memory_space<vmem>>, %arg13: memref<1x18x18x4xf32, #tpu.memory_space<vmem>>, %arg14: memref<1x10x10x8xf32, #tpu.memory_space<vmem>>, %arg15: memref<256x36xf32, #tpu.memory_space<vmem>>, %arg16: memref<64x72xf32, #tpu.memory_space<vmem>>, %arg17: memref<16x16x8xf32, #tpu.memory_space<vmem>>, %arg18: memref<8x8x16xf32, #tpu.memory_space<vmem>>) attributes {dimension_semantics = [#tpu.dimension_semantics<parallel>], iteration_bounds = array<i64: 2>, scalar_prefetch = 0 : i64, scratch_operands = 6 : i64, tpu.core_type = #tpu.core_type<tc>, window_params = [{transform_indices = @transform_0, window_bounds = array<i64: 1, 16, 16, 4>}, {pipeline_mode = #tpu.pipeline_mode<synchronous>, transform_indices = @transform_1, window_bounds = array<i64: 36, 8>}, {pipeline_mode = #tpu.pipeline_mode<synchronous>, transform_indices = @transform_2, window_bounds = array<i64: 1, 8>}, {pipeline_mode = #tpu.pipeline_mode<synchronous>, transform_indices = @transform_3, window_bounds = array<i64: 1, 8>}, {pipeline_mode = #tpu.pipeline_mode<synchronous>, transform_indices = @transform_4, window_bounds = array<i64: 72, 16>}, {pipeline_mode = #tpu.pipeline_mode<synchronous>, transform_indices = @transform_5, window_bounds = array<i64: 1, 16>}, {pipeline_mode = #tpu.pipeline_mode<synchronous>, transform_indices = @transform_6, window_bounds = array<i64: 1, 16>}, {pipeline_mode = #tpu.pipeline_mode<synchronous>, transform_indices = @transform_7, window_bounds = array<i64: 256, 32>}, {pipeline_mode = #tpu.pipeline_mode<synchronous>, transform_indices = @transform_8, window_bounds = array<i64: 1, 32>}, {pipeline_mode = #tpu.pipeline_mode<synchronous>, transform_indices = @transform_9, window_bounds = array<i64: 32, 10>}, {pipeline_mode = #tpu.pipeline_mode<synchronous>, transform_indices = @transform_10, window_bounds = array<i64: 1, 10>}, {transform_indices = @transform_11, window_bounds = array<i64: 1, 1, 10>}]} {
    %c0 = arith.constant 0 : index
    %c0_0 = arith.constant 0 : index
    %c0_1 = arith.constant 0 : index
    %c0_2 = arith.constant 0 : index
    %0 = vector.load %arg1[%c0, %c0_0, %c0_1, %c0_2] : memref<1x16x16x4xf32, #tpu.memory_space<vmem>>, vector<1x16x16x4xf32>
    %cst = arith.constant 0.000000e+00 : f32
    %1 = vector.broadcast %cst : f32 to vector<1x1x18x4xf32>
    %c0_3 = arith.constant 0 : index
    %c0_4 = arith.constant 0 : index
    %c0_5 = arith.constant 0 : index
    %c0_6 = arith.constant 0 : index
    %2 = vector.load %arg13[%c0_3, %c0_4, %c0_5, %c0_6] : memref<1x18x18x4xf32, #tpu.memory_space<vmem>>, vector<1x1x18x4xf32>
    tpu.vector_store %arg13[%c0_3, %c0_4, %c0_5, %c0_6], %1 {strides = array<i32>} : memref<1x18x18x4xf32, #tpu.memory_space<vmem>>, vector<1x1x18x4xf32>,
    %c0_7 = arith.constant 0 : index
    %c17 = arith.constant 17 : index
    %c0_8 = arith.constant 0 : index
    %c0_9 = arith.constant 0 : index
    %3 = vector.load %arg13[%c0_7, %c17, %c0_8, %c0_9] : memref<1x18x18x4xf32, #tpu.memory_space<vmem>>, vector<1x1x18x4xf32>
    tpu.vector_store %arg13[%c0_7, %c17, %c0_8, %c0_9], %1 {strides = array<i32>} : memref<1x18x18x4xf32, #tpu.memory_space<vmem>>, vector<1x1x18x4xf32>,
    %cst_10 = arith.constant 0.000000e+00 : f32
    %4 = vector.broadcast %cst_10 : f32 to vector<1x18x1x4xf32>
    %c0_11 = arith.constant 0 : index
    %c0_12 = arith.constant 0 : index
    %c0_13 = arith.constant 0 : index
    %c0_14 = arith.constant 0 : index
    %5 = vector.load %arg13[%c0_11, %c0_12, %c0_13, %c0_14] : memref<1x18x18x4xf32, #tpu.memory_space<vmem>>, vector<1x18x1x4xf32>
    tpu.vector_store %arg13[%c0_11, %c0_12, %c0_13, %c0_14], %4 {strides = array<i32>} : memref<1x18x18x4xf32, #tpu.memory_space<vmem>>, vector<1x18x1x4xf32>,
    %c0_15 = arith.constant 0 : index
    %c0_16 = arith.constant 0 : index
    %c17_17 = arith.constant 17 : index
    %c0_18 = arith.constant 0 : index
    %6 = vector.load %arg13[%c0_15, %c0_16, %c17_17, %c0_18] : memref<1x18x18x4xf32, #tpu.memory_space<vmem>>, vector<1x18x1x4xf32>
    tpu.vector_store %arg13[%c0_15, %c0_16, %c17_17, %c0_18], %4 {strides = array<i32>} : memref<1x18x18x4xf32, #tpu.memory_space<vmem>>, vector<1x18x1x4xf32>,
    %c0_19 = arith.constant 0 : index
    %c1 = arith.constant 1 : index
    %c1_20 = arith.constant 1 : index
    %c0_21 = arith.constant 0 : index
    %7 = vector.load %arg13[%c0_19, %c1, %c1_20, %c0_21] : memref<1x18x18x4xf32, #tpu.memory_space<vmem>>, vector<1x16x16x4xf32>
    tpu.vector_store %arg13[%c0_19, %c1, %c1_20, %c0_21], %0 {strides = array<i32>} : memref<1x18x18x4xf32, #tpu.memory_space<vmem>>, vector<1x16x16x4xf32>,
    %c0_22 = arith.constant 0 : index
    %c0_23 = arith.constant 0 : index
    %c0_24 = arith.constant 0 : index
    %c0_25 = arith.constant 0 : index
    %8 = vector.load %arg13[%c0_22, %c0_23, %c0_24, %c0_25] : memref<1x18x18x4xf32, #tpu.memory_space<vmem>>, vector<1x16x16x4xf32>
    %9 = vector.shape_cast %8 : vector<1x16x16x4xf32> to vector<256x4xf32>
    %c0_26 = arith.constant 0 : index
    %c0_27 = arith.constant 0 : index
    %10 = vector.load %arg15[%c0_26, %c0_27] : memref<256x36xf32, #tpu.memory_space<vmem>>, vector<256x4xf32>
    tpu.vector_store %arg15[%c0_26, %c0_27], %9 {strides = array<i32>} : memref<256x36xf32, #tpu.memory_space<vmem>>, vector<256x4xf32>,
    %c0_28 = arith.constant 0 : index
    %c0_29 = arith.constant 0 : index
    %c1_30 = arith.constant 1 : index
    %c0_31 = arith.constant 0 : index
    %11 = vector.load %arg13[%c0_28, %c0_29, %c1_30, %c0_31] : memref<1x18x18x4xf32, #tpu.memory_space<vmem>>, vector<1x16x16x4xf32>
    %12 = vector.shape_cast %11 : vector<1x16x16x4xf32> to vector<256x4xf32>
    %c0_32 = arith.constant 0 : index
    %c4 = arith.constant 4 : index
    %13 = vector.load %arg15[%c0_32, %c4] : memref<256x36xf32, #tpu.memory_space<vmem>>, vector<256x4xf32>
    tpu.vector_store %arg15[%c0_32, %c4], %12 {strides = array<i32>} : memref<256x36xf32, #tpu.memory_space<vmem>>, vector<256x4xf32>,
    %c0_33 = arith.constant 0 : index
    %c0_34 = arith.constant 0 : index
    %c2 = arith.constant 2 : index
    %c0_35 = arith.constant 0 : index
    %14 = vector.load %arg13[%c0_33, %c0_34, %c2, %c0_35] : memref<1x18x18x4xf32, #tpu.memory_space<vmem>>, vector<1x16x16x4xf32>
    %15 = vector.shape_cast %14 : vector<1x16x16x4xf32> to vector<256x4xf32>
    %c0_36 = arith.constant 0 : index
    %c8 = arith.constant 8 : index
    %16 = vector.load %arg15[%c0_36, %c8] : memref<256x36xf32, #tpu.memory_space<vmem>>, vector<256x4xf32>
    tpu.vector_store %arg15[%c0_36, %c8], %15 {strides = array<i32>} : memref<256x36xf32, #tpu.memory_space<vmem>>, vector<256x4xf32>,
    %c0_37 = arith.constant 0 : index
    %c1_38 = arith.constant 1 : index
    %c0_39 = arith.constant 0 : index
    %c0_40 = arith.constant 0 : index
    %17 = vector.load %arg13[%c0_37, %c1_38, %c0_39, %c0_40] : memref<1x18x18x4xf32, #tpu.memory_space<vmem>>, vector<1x16x16x4xf32>
    %18 = vector.shape_cast %17 : vector<1x16x16x4xf32> to vector<256x4xf32>
    %c0_41 = arith.constant 0 : index
    %c12 = arith.constant 12 : index
    %19 = vector.load %arg15[%c0_41, %c12] : memref<256x36xf32, #tpu.memory_space<vmem>>, vector<256x4xf32>
    tpu.vector_store %arg15[%c0_41, %c12], %18 {strides = array<i32>} : memref<256x36xf32, #tpu.memory_space<vmem>>, vector<256x4xf32>,
    %c0_42 = arith.constant 0 : index
    %c1_43 = arith.constant 1 : index
    %c1_44 = arith.constant 1 : index
    %c0_45 = arith.constant 0 : index
    %20 = vector.load %arg13[%c0_42, %c1_43, %c1_44, %c0_45] : memref<1x18x18x4xf32, #tpu.memory_space<vmem>>, vector<1x16x16x4xf32>
    %21 = vector.shape_cast %20 : vector<1x16x16x4xf32> to vector<256x4xf32>
    %c0_46 = arith.constant 0 : index
    %c16 = arith.constant 16 : index
    %22 = vector.load %arg15[%c0_46, %c16] : memref<256x36xf32, #tpu.memory_space<vmem>>, vector<256x4xf32>
    tpu.vector_store %arg15[%c0_46, %c16], %21 {strides = array<i32>} : memref<256x36xf32, #tpu.memory_space<vmem>>, vector<256x4xf32>,
    %c0_47 = arith.constant 0 : index
    %c1_48 = arith.constant 1 : index
    %c2_49 = arith.constant 2 : index
    %c0_50 = arith.constant 0 : index
    %23 = vector.load %arg13[%c0_47, %c1_48, %c2_49, %c0_50] : memref<1x18x18x4xf32, #tpu.memory_space<vmem>>, vector<1x16x16x4xf32>
    %24 = vector.shape_cast %23 : vector<1x16x16x4xf32> to vector<256x4xf32>
    %c0_51 = arith.constant 0 : index
    %c20 = arith.constant 20 : index
    %25 = vector.load %arg15[%c0_51, %c20] : memref<256x36xf32, #tpu.memory_space<vmem>>, vector<256x4xf32>
    tpu.vector_store %arg15[%c0_51, %c20], %24 {strides = array<i32>} : memref<256x36xf32, #tpu.memory_space<vmem>>, vector<256x4xf32>,
    %c0_52 = arith.constant 0 : index
    %c2_53 = arith.constant 2 : index
    %c0_54 = arith.constant 0 : index
    %c0_55 = arith.constant 0 : index
    %26 = vector.load %arg13[%c0_52, %c2_53, %c0_54, %c0_55] : memref<1x18x18x4xf32, #tpu.memory_space<vmem>>, vector<1x16x16x4xf32>
    %27 = vector.shape_cast %26 : vector<1x16x16x4xf32> to vector<256x4xf32>
    %c0_56 = arith.constant 0 : index
    %c24 = arith.constant 24 : index
    %28 = vector.load %arg15[%c0_56, %c24] : memref<256x36xf32, #tpu.memory_space<vmem>>, vector<256x4xf32>
    tpu.vector_store %arg15[%c0_56, %c24], %27 {strides = array<i32>} : memref<256x36xf32, #tpu.memory_space<vmem>>, vector<256x4xf32>,
    %c0_57 = arith.constant 0 : index
    %c2_58 = arith.constant 2 : index
    %c1_59 = arith.constant 1 : index
    %c0_60 = arith.constant 0 : index
    %29 = vector.load %arg13[%c0_57, %c2_58, %c1_59, %c0_60] : memref<1x18x18x4xf32, #tpu.memory_space<vmem>>, vector<1x16x16x4xf32>
    %30 = vector.shape_cast %29 : vector<1x16x16x4xf32> to vector<256x4xf32>
    %c0_61 = arith.constant 0 : index
    %c28 = arith.constant 28 : index
    %31 = vector.load %arg15[%c0_61, %c28] : memref<256x36xf32, #tpu.memory_space<vmem>>, vector<256x4xf32>
    tpu.vector_store %arg15[%c0_61, %c28], %30 {strides = array<i32>} : memref<256x36xf32, #tpu.memory_space<vmem>>, vector<256x4xf32>,
    %c0_62 = arith.constant 0 : index
    %c2_63 = arith.constant 2 : index
    %c2_64 = arith.constant 2 : index
    %c0_65 = arith.constant 0 : index
    %32 = vector.load %arg13[%c0_62, %c2_63, %c2_64, %c0_65] : memref<1x18x18x4xf32, #tpu.memory_space<vmem>>, vector<1x16x16x4xf32>
    %33 = vector.shape_cast %32 : vector<1x16x16x4xf32> to vector<256x4xf32>
    %c0_66 = arith.constant 0 : index
    %c32 = arith.constant 32 : index
    %34 = vector.load %arg15[%c0_66, %c32] : memref<256x36xf32, #tpu.memory_space<vmem>>, vector<256x4xf32>
    tpu.vector_store %arg15[%c0_66, %c32], %33 {strides = array<i32>} : memref<256x36xf32, #tpu.memory_space<vmem>>, vector<256x4xf32>,
    %c0_67 = arith.constant 0 : index
    %c0_68 = arith.constant 0 : index
    %35 = vector.load %arg15[%c0_67, %c0_68] : memref<256x36xf32, #tpu.memory_space<vmem>>, vector<256x36xf32>
    %c0_69 = arith.constant 0 : index
    %c0_70 = arith.constant 0 : index
    %36 = vector.load %arg2[%c0_69, %c0_70] : memref<36x8xf32, #tpu.memory_space<vmem>>, vector<36x8xf32>
    %cst_71 = arith.constant dense<0.000000e+00> : vector<256x8xf32>
    %37 = tpu.matmul %35, %36, %cst_71 {dimension_numbers = #tpu.dot_dimension_numbers<[1], [0], [0], [1], [0, 0, 1, 1], [], []>} : vector<256x36xf32>, vector<36x8xf32>, vector<256x8xf32> -> vector<256x8xf32>
    %c0_72 = arith.constant 0 : index
    %c0_73 = arith.constant 0 : index
    %38 = vector.load %arg3[%c0_72, %c0_73] : memref<1x8xf32, #tpu.memory_space<vmem>>, vector<1x8xf32>
    %39 = vector.broadcast %38 : vector<1x8xf32> to vector<256x8xf32>
    %40 = arith.mulf %37, %39 : vector<256x8xf32>
    %c0_74 = arith.constant 0 : index
    %c0_75 = arith.constant 0 : index
    %41 = vector.load %arg4[%c0_74, %c0_75] : memref<1x8xf32, #tpu.memory_space<vmem>>, vector<1x8xf32>
    %42 = vector.broadcast %41 : vector<1x8xf32> to vector<256x8xf32>
    %43 = arith.addf %40, %42 : vector<256x8xf32>
    %cst_76 = arith.constant 0.000000e+00 : f32
    %44 = vector.broadcast %cst_76 : f32 to vector<256x8xf32>
    %45 = arith.maximumf %43, %44 : vector<256x8xf32>
    %46 = vector.shape_cast %45 : vector<256x8xf32> to vector<16x16x8xf32>
    %c0_77 = arith.constant 0 : index
    %c0_78 = arith.constant 0 : index
    %c0_79 = arith.constant 0 : index
    %47 = vector.load %arg17[%c0_77, %c0_78, %c0_79] : memref<16x16x8xf32, #tpu.memory_space<vmem>>, vector<16x16x8xf32>
    tpu.vector_store %arg17[%c0_77, %c0_78, %c0_79], %46 {strides = array<i32>} : memref<16x16x8xf32, #tpu.memory_space<vmem>>, vector<16x16x8xf32>,
    %c0_80 = arith.constant 0 : index
    %c0_81 = arith.constant 0 : index
    %c0_82 = arith.constant 0 : index
    %48 = tpu.strided_load %arg17[%c0_80, %c0_81, %c0_82] {strides = array<i32: 2, 2, 1>} : memref<16x16x8xf32, #tpu.memory_space<vmem>>, vector<8x8x8xf32>
    %c0_83 = arith.constant 0 : index
    %c1_84 = arith.constant 1 : index
    %c0_85 = arith.constant 0 : index
    %49 = tpu.strided_load %arg17[%c0_83, %c1_84, %c0_85] {strides = array<i32: 2, 2, 1>} : memref<16x16x8xf32, #tpu.memory_space<vmem>>, vector<8x8x8xf32>
    %c1_86 = arith.constant 1 : index
    %c0_87 = arith.constant 0 : index
    %c0_88 = arith.constant 0 : index
    %50 = tpu.strided_load %arg17[%c1_86, %c0_87, %c0_88] {strides = array<i32: 2, 2, 1>} : memref<16x16x8xf32, #tpu.memory_space<vmem>>, vector<8x8x8xf32>
    %c1_89 = arith.constant 1 : index
    %c1_90 = arith.constant 1 : index
    %c0_91 = arith.constant 0 : index
    %51 = tpu.strided_load %arg17[%c1_89, %c1_90, %c0_91] {strides = array<i32: 2, 2, 1>} : memref<16x16x8xf32, #tpu.memory_space<vmem>>, vector<8x8x8xf32>
    %52 = arith.maximumf %48, %49 : vector<8x8x8xf32>
    %53 = arith.maximumf %50, %51 : vector<8x8x8xf32>
    %54 = arith.maximumf %52, %53 : vector<8x8x8xf32>
    %55 = vector.shape_cast %54 : vector<8x8x8xf32> to vector<1x8x8x8xf32>
    %cst_92 = arith.constant 0.000000e+00 : f32
    %56 = vector.broadcast %cst_92 : f32 to vector<1x1x10x8xf32>
    %c0_93 = arith.constant 0 : index
    %c0_94 = arith.constant 0 : index
    %c0_95 = arith.constant 0 : index
    %c0_96 = arith.constant 0 : index
    %57 = vector.load %arg14[%c0_93, %c0_94, %c0_95, %c0_96] : memref<1x10x10x8xf32, #tpu.memory_space<vmem>>, vector<1x1x10x8xf32>
    tpu.vector_store %arg14[%c0_93, %c0_94, %c0_95, %c0_96], %56 {strides = array<i32>} : memref<1x10x10x8xf32, #tpu.memory_space<vmem>>, vector<1x1x10x8xf32>,
    %c0_97 = arith.constant 0 : index
    %c9 = arith.constant 9 : index
    %c0_98 = arith.constant 0 : index
    %c0_99 = arith.constant 0 : index
    %58 = vector.load %arg14[%c0_97, %c9, %c0_98, %c0_99] : memref<1x10x10x8xf32, #tpu.memory_space<vmem>>, vector<1x1x10x8xf32>
    tpu.vector_store %arg14[%c0_97, %c9, %c0_98, %c0_99], %56 {strides = array<i32>} : memref<1x10x10x8xf32, #tpu.memory_space<vmem>>, vector<1x1x10x8xf32>,
    %cst_100 = arith.constant 0.000000e+00 : f32
    %59 = vector.broadcast %cst_100 : f32 to vector<1x10x1x8xf32>
    %c0_101 = arith.constant 0 : index
    %c0_102 = arith.constant 0 : index
    %c0_103 = arith.constant 0 : index
    %c0_104 = arith.constant 0 : index
    %60 = vector.load %arg14[%c0_101, %c0_102, %c0_103, %c0_104] : memref<1x10x10x8xf32, #tpu.memory_space<vmem>>, vector<1x10x1x8xf32>
    tpu.vector_store %arg14[%c0_101, %c0_102, %c0_103, %c0_104], %59 {strides = array<i32>} : memref<1x10x10x8xf32, #tpu.memory_space<vmem>>, vector<1x10x1x8xf32>,
    %c0_105 = arith.constant 0 : index
    %c0_106 = arith.constant 0 : index
    %c9_107 = arith.constant 9 : index
    %c0_108 = arith.constant 0 : index
    %61 = vector.load %arg14[%c0_105, %c0_106, %c9_107, %c0_108] : memref<1x10x10x8xf32, #tpu.memory_space<vmem>>, vector<1x10x1x8xf32>
    tpu.vector_store %arg14[%c0_105, %c0_106, %c9_107, %c0_108], %59 {strides = array<i32>} : memref<1x10x10x8xf32, #tpu.memory_space<vmem>>, vector<1x10x1x8xf32>,
    %c0_109 = arith.constant 0 : index
    %c1_110 = arith.constant 1 : index
    %c1_111 = arith.constant 1 : index
    %c0_112 = arith.constant 0 : index
    %62 = vector.load %arg14[%c0_109, %c1_110, %c1_111, %c0_112] : memref<1x10x10x8xf32, #tpu.memory_space<vmem>>, vector<1x8x8x8xf32>
    tpu.vector_store %arg14[%c0_109, %c1_110, %c1_111, %c0_112], %55 {strides = array<i32>} : memref<1x10x10x8xf32, #tpu.memory_space<vmem>>, vector<1x8x8x8xf32>,
    %c0_113 = arith.constant 0 : index
    %c0_114 = arith.constant 0 : index
    %c0_115 = arith.constant 0 : index
    %c0_116 = arith.constant 0 : index
    %63 = vector.load %arg14[%c0_113, %c0_114, %c0_115, %c0_116] : memref<1x10x10x8xf32, #tpu.memory_space<vmem>>, vector<1x8x8x8xf32>
    %64 = vector.shape_cast %63 : vector<1x8x8x8xf32> to vector<64x8xf32>
    %c0_117 = arith.constant 0 : index
    %c0_118 = arith.constant 0 : index
    %65 = vector.load %arg16[%c0_117, %c0_118] : memref<64x72xf32, #tpu.memory_space<vmem>>, vector<64x8xf32>
    tpu.vector_store %arg16[%c0_117, %c0_118], %64 {strides = array<i32>} : memref<64x72xf32, #tpu.memory_space<vmem>>, vector<64x8xf32>,
    %c0_119 = arith.constant 0 : index
    %c0_120 = arith.constant 0 : index
    %c1_121 = arith.constant 1 : index
    %c0_122 = arith.constant 0 : index
    %66 = vector.load %arg14[%c0_119, %c0_120, %c1_121, %c0_122] : memref<1x10x10x8xf32, #tpu.memory_space<vmem>>, vector<1x8x8x8xf32>
    %67 = vector.shape_cast %66 : vector<1x8x8x8xf32> to vector<64x8xf32>
    %c0_123 = arith.constant 0 : index
    %c8_124 = arith.constant 8 : index
    %68 = vector.load %arg16[%c0_123, %c8_124] : memref<64x72xf32, #tpu.memory_space<vmem>>, vector<64x8xf32>
    tpu.vector_store %arg16[%c0_123, %c8_124], %67 {strides = array<i32>} : memref<64x72xf32, #tpu.memory_space<vmem>>, vector<64x8xf32>,
    %c0_125 = arith.constant 0 : index
    %c0_126 = arith.constant 0 : index
    %c2_127 = arith.constant 2 : index
    %c0_128 = arith.constant 0 : index
    %69 = vector.load %arg14[%c0_125, %c0_126, %c2_127, %c0_128] : memref<1x10x10x8xf32, #tpu.memory_space<vmem>>, vector<1x8x8x8xf32>
    %70 = vector.shape_cast %69 : vector<1x8x8x8xf32> to vector<64x8xf32>
    %c0_129 = arith.constant 0 : index
    %c16_130 = arith.constant 16 : index
    %71 = vector.load %arg16[%c0_129, %c16_130] : memref<64x72xf32, #tpu.memory_space<vmem>>, vector<64x8xf32>
    tpu.vector_store %arg16[%c0_129, %c16_130], %70 {strides = array<i32>} : memref<64x72xf32, #tpu.memory_space<vmem>>, vector<64x8xf32>,
    %c0_131 = arith.constant 0 : index
    %c1_132 = arith.constant 1 : index
    %c0_133 = arith.constant 0 : index
    %c0_134 = arith.constant 0 : index
    %72 = vector.load %arg14[%c0_131, %c1_132, %c0_133, %c0_134] : memref<1x10x10x8xf32, #tpu.memory_space<vmem>>, vector<1x8x8x8xf32>
    %73 = vector.shape_cast %72 : vector<1x8x8x8xf32> to vector<64x8xf32>
    %c0_135 = arith.constant 0 : index
    %c24_136 = arith.constant 24 : index
    %74 = vector.load %arg16[%c0_135, %c24_136] : memref<64x72xf32, #tpu.memory_space<vmem>>, vector<64x8xf32>
    tpu.vector_store %arg16[%c0_135, %c24_136], %73 {strides = array<i32>} : memref<64x72xf32, #tpu.memory_space<vmem>>, vector<64x8xf32>,
    %c0_137 = arith.constant 0 : index
    %c1_138 = arith.constant 1 : index
    %c1_139 = arith.constant 1 : index
    %c0_140 = arith.constant 0 : index
    %75 = vector.load %arg14[%c0_137, %c1_138, %c1_139, %c0_140] : memref<1x10x10x8xf32, #tpu.memory_space<vmem>>, vector<1x8x8x8xf32>
    %76 = vector.shape_cast %75 : vector<1x8x8x8xf32> to vector<64x8xf32>
    %c0_141 = arith.constant 0 : index
    %c32_142 = arith.constant 32 : index
    %77 = vector.load %arg16[%c0_141, %c32_142] : memref<64x72xf32, #tpu.memory_space<vmem>>, vector<64x8xf32>
    tpu.vector_store %arg16[%c0_141, %c32_142], %76 {strides = array<i32>} : memref<64x72xf32, #tpu.memory_space<vmem>>, vector<64x8xf32>,
    %c0_143 = arith.constant 0 : index
    %c1_144 = arith.constant 1 : index
    %c2_145 = arith.constant 2 : index
    %c0_146 = arith.constant 0 : index
    %78 = vector.load %arg14[%c0_143, %c1_144, %c2_145, %c0_146] : memref<1x10x10x8xf32, #tpu.memory_space<vmem>>, vector<1x8x8x8xf32>
    %79 = vector.shape_cast %78 : vector<1x8x8x8xf32> to vector<64x8xf32>
    %c0_147 = arith.constant 0 : index
    %c40 = arith.constant 40 : index
    %80 = vector.load %arg16[%c0_147, %c40] : memref<64x72xf32, #tpu.memory_space<vmem>>, vector<64x8xf32>
    tpu.vector_store %arg16[%c0_147, %c40], %79 {strides = array<i32>} : memref<64x72xf32, #tpu.memory_space<vmem>>, vector<64x8xf32>,
    %c0_148 = arith.constant 0 : index
    %c2_149 = arith.constant 2 : index
    %c0_150 = arith.constant 0 : index
    %c0_151 = arith.constant 0 : index
    %81 = vector.load %arg14[%c0_148, %c2_149, %c0_150, %c0_151] : memref<1x10x10x8xf32, #tpu.memory_space<vmem>>, vector<1x8x8x8xf32>
    %82 = vector.shape_cast %81 : vector<1x8x8x8xf32> to vector<64x8xf32>
    %c0_152 = arith.constant 0 : index
    %c48 = arith.constant 48 : index
    %83 = vector.load %arg16[%c0_152, %c48] : memref<64x72xf32, #tpu.memory_space<vmem>>, vector<64x8xf32>
    tpu.vector_store %arg16[%c0_152, %c48], %82 {strides = array<i32>} : memref<64x72xf32, #tpu.memory_space<vmem>>, vector<64x8xf32>,
    %c0_153 = arith.constant 0 : index
    %c2_154 = arith.constant 2 : index
    %c1_155 = arith.constant 1 : index
    %c0_156 = arith.constant 0 : index
    %84 = vector.load %arg14[%c0_153, %c2_154, %c1_155, %c0_156] : memref<1x10x10x8xf32, #tpu.memory_space<vmem>>, vector<1x8x8x8xf32>
    %85 = vector.shape_cast %84 : vector<1x8x8x8xf32> to vector<64x8xf32>
    %c0_157 = arith.constant 0 : index
    %c56 = arith.constant 56 : index
    %86 = vector.load %arg16[%c0_157, %c56] : memref<64x72xf32, #tpu.memory_space<vmem>>, vector<64x8xf32>
    tpu.vector_store %arg16[%c0_157, %c56], %85 {strides = array<i32>} : memref<64x72xf32, #tpu.memory_space<vmem>>, vector<64x8xf32>,
    %c0_158 = arith.constant 0 : index
    %c2_159 = arith.constant 2 : index
    %c2_160 = arith.constant 2 : index
    %c0_161 = arith.constant 0 : index
    %87 = vector.load %arg14[%c0_158, %c2_159, %c2_160, %c0_161] : memref<1x10x10x8xf32, #tpu.memory_space<vmem>>, vector<1x8x8x8xf32>
    %88 = vector.shape_cast %87 : vector<1x8x8x8xf32> to vector<64x8xf32>
    %c0_162 = arith.constant 0 : index
    %c64 = arith.constant 64 : index
    %89 = vector.load %arg16[%c0_162, %c64] : memref<64x72xf32, #tpu.memory_space<vmem>>, vector<64x8xf32>
    tpu.vector_store %arg16[%c0_162, %c64], %88 {strides = array<i32>} : memref<64x72xf32, #tpu.memory_space<vmem>>, vector<64x8xf32>,
    %c0_163 = arith.constant 0 : index
    %c0_164 = arith.constant 0 : index
    %90 = vector.load %arg16[%c0_163, %c0_164] : memref<64x72xf32, #tpu.memory_space<vmem>>, vector<64x72xf32>
    %c0_165 = arith.constant 0 : index
    %c0_166 = arith.constant 0 : index
    %91 = vector.load %arg5[%c0_165, %c0_166] : memref<72x16xf32, #tpu.memory_space<vmem>>, vector<72x16xf32>
    %cst_167 = arith.constant dense<0.000000e+00> : vector<64x16xf32>
    %92 = tpu.matmul %90, %91, %cst_167 {dimension_numbers = #tpu.dot_dimension_numbers<[1], [0], [0], [1], [0, 0, 1, 1], [], []>} : vector<64x72xf32>, vector<72x16xf32>, vector<64x16xf32> -> vector<64x16xf32>
    %c0_168 = arith.constant 0 : index
    %c0_169 = arith.constant 0 : index
    %93 = vector.load %arg6[%c0_168, %c0_169] : memref<1x16xf32, #tpu.memory_space<vmem>>, vector<1x16xf32>
    %94 = vector.broadcast %93 : vector<1x16xf32> to vector<64x16xf32>
    %95 = arith.mulf %92, %94 : vector<64x16xf32>
    %c0_170 = arith.constant 0 : index
    %c0_171 = arith.constant 0 : index
    %96 = vector.load %arg7[%c0_170, %c0_171] : memref<1x16xf32, #tpu.memory_space<vmem>>, vector<1x16xf32>
    %97 = vector.broadcast %96 : vector<1x16xf32> to vector<64x16xf32>
    %98 = arith.addf %95, %97 : vector<64x16xf32>
    %cst_172 = arith.constant 0.000000e+00 : f32
    %99 = vector.broadcast %cst_172 : f32 to vector<64x16xf32>
    %100 = arith.maximumf %98, %99 : vector<64x16xf32>
    %101 = vector.shape_cast %100 : vector<64x16xf32> to vector<8x8x16xf32>
    %c0_173 = arith.constant 0 : index
    %c0_174 = arith.constant 0 : index
    %c0_175 = arith.constant 0 : index
    %102 = vector.load %arg18[%c0_173, %c0_174, %c0_175] : memref<8x8x16xf32, #tpu.memory_space<vmem>>, vector<8x8x16xf32>
    tpu.vector_store %arg18[%c0_173, %c0_174, %c0_175], %101 {strides = array<i32>} : memref<8x8x16xf32, #tpu.memory_space<vmem>>, vector<8x8x16xf32>,
    %c0_176 = arith.constant 0 : index
    %c0_177 = arith.constant 0 : index
    %c0_178 = arith.constant 0 : index
    %103 = tpu.strided_load %arg18[%c0_176, %c0_177, %c0_178] {strides = array<i32: 2, 2, 1>} : memref<8x8x16xf32, #tpu.memory_space<vmem>>, vector<4x4x16xf32>
    %c0_179 = arith.constant 0 : index
    %c1_180 = arith.constant 1 : index
    %c0_181 = arith.constant 0 : index
    %104 = tpu.strided_load %arg18[%c0_179, %c1_180, %c0_181] {strides = array<i32: 2, 2, 1>} : memref<8x8x16xf32, #tpu.memory_space<vmem>>, vector<4x4x16xf32>
    %c1_182 = arith.constant 1 : index
    %c0_183 = arith.constant 0 : index
    %c0_184 = arith.constant 0 : index
    %105 = tpu.strided_load %arg18[%c1_182, %c0_183, %c0_184] {strides = array<i32: 2, 2, 1>} : memref<8x8x16xf32, #tpu.memory_space<vmem>>, vector<4x4x16xf32>
    %c1_185 = arith.constant 1 : index
    %c1_186 = arith.constant 1 : index
    %c0_187 = arith.constant 0 : index
    %106 = tpu.strided_load %arg18[%c1_185, %c1_186, %c0_187] {strides = array<i32: 2, 2, 1>} : memref<8x8x16xf32, #tpu.memory_space<vmem>>, vector<4x4x16xf32>
    %107 = arith.maximumf %103, %104 : vector<4x4x16xf32>
    %108 = arith.maximumf %105, %106 : vector<4x4x16xf32>
    %109 = arith.maximumf %107, %108 : vector<4x4x16xf32>
    %110 = vector.shape_cast %109 : vector<4x4x16xf32> to vector<1x4x4x16xf32>
    %111 = vector.extract_strided_slice %110 {offsets = [0, 0, 0, 0], sizes = [1, 1, 1, 16], strides = [1, 1, 1, 1]} : vector<1x4x4x16xf32> to vector<1x1x1x16xf32>
    %112 = vector.shape_cast %111 : vector<1x1x1x16xf32> to vector<1x16xf32>
    %113 = vector.extract_strided_slice %110 {offsets = [0, 0, 1, 0], sizes = [1, 1, 1, 16], strides = [1, 1, 1, 1]} : vector<1x4x4x16xf32> to vector<1x1x1x16xf32>
    %114 = vector.shape_cast %113 : vector<1x1x1x16xf32> to vector<1x16xf32>
    %115 = vector.extract_strided_slice %110 {offsets = [0, 0, 2, 0], sizes = [1, 1, 1, 16], strides = [1, 1, 1, 1]} : vector<1x4x4x16xf32> to vector<1x1x1x16xf32>
    %116 = vector.shape_cast %115 : vector<1x1x1x16xf32> to vector<1x16xf32>
    %117 = vector.extract_strided_slice %110 {offsets = [0, 0, 3, 0], sizes = [1, 1, 1, 16], strides = [1, 1, 1, 1]} : vector<1x4x4x16xf32> to vector<1x1x1x16xf32>
    %118 = vector.shape_cast %117 : vector<1x1x1x16xf32> to vector<1x16xf32>
    %119 = vector.extract_strided_slice %110 {offsets = [0, 1, 0, 0], sizes = [1, 1, 1, 16], strides = [1, 1, 1, 1]} : vector<1x4x4x16xf32> to vector<1x1x1x16xf32>
    %120 = vector.shape_cast %119 : vector<1x1x1x16xf32> to vector<1x16xf32>
    %121 = vector.extract_strided_slice %110 {offsets = [0, 1, 1, 0], sizes = [1, 1, 1, 16], strides = [1, 1, 1, 1]} : vector<1x4x4x16xf32> to vector<1x1x1x16xf32>
    %122 = vector.shape_cast %121 : vector<1x1x1x16xf32> to vector<1x16xf32>
    %123 = vector.extract_strided_slice %110 {offsets = [0, 1, 2, 0], sizes = [1, 1, 1, 16], strides = [1, 1, 1, 1]} : vector<1x4x4x16xf32> to vector<1x1x1x16xf32>
    %124 = vector.shape_cast %123 : vector<1x1x1x16xf32> to vector<1x16xf32>
    %125 = vector.extract_strided_slice %110 {offsets = [0, 1, 3, 0], sizes = [1, 1, 1, 16], strides = [1, 1, 1, 1]} : vector<1x4x4x16xf32> to vector<1x1x1x16xf32>
    %126 = vector.shape_cast %125 : vector<1x1x1x16xf32> to vector<1x16xf32>
    %127 = vector.extract_strided_slice %110 {offsets = [0, 2, 0, 0], sizes = [1, 1, 1, 16], strides = [1, 1, 1, 1]} : vector<1x4x4x16xf32> to vector<1x1x1x16xf32>
    %128 = vector.shape_cast %127 : vector<1x1x1x16xf32> to vector<1x16xf32>
    %129 = vector.extract_strided_slice %110 {offsets = [0, 2, 1, 0], sizes = [1, 1, 1, 16], strides = [1, 1, 1, 1]} : vector<1x4x4x16xf32> to vector<1x1x1x16xf32>
    %130 = vector.shape_cast %129 : vector<1x1x1x16xf32> to vector<1x16xf32>
    %131 = vector.extract_strided_slice %110 {offsets = [0, 2, 2, 0], sizes = [1, 1, 1, 16], strides = [1, 1, 1, 1]} : vector<1x4x4x16xf32> to vector<1x1x1x16xf32>
    %132 = vector.shape_cast %131 : vector<1x1x1x16xf32> to vector<1x16xf32>
    %133 = vector.extract_strided_slice %110 {offsets = [0, 2, 3, 0], sizes = [1, 1, 1, 16], strides = [1, 1, 1, 1]} : vector<1x4x4x16xf32> to vector<1x1x1x16xf32>
    %134 = vector.shape_cast %133 : vector<1x1x1x16xf32> to vector<1x16xf32>
    %135 = vector.extract_strided_slice %110 {offsets = [0, 3, 0, 0], sizes = [1, 1, 1, 16], strides = [1, 1, 1, 1]} : vector<1x4x4x16xf32> to vector<1x1x1x16xf32>
    %136 = vector.shape_cast %135 : vector<1x1x1x16xf32> to vector<1x16xf32>
    %137 = vector.extract_strided_slice %110 {offsets = [0, 3, 1, 0], sizes = [1, 1, 1, 16], strides = [1, 1, 1, 1]} : vector<1x4x4x16xf32> to vector<1x1x1x16xf32>
    %138 = vector.shape_cast %137 : vector<1x1x1x16xf32> to vector<1x16xf32>
    %139 = vector.extract_strided_slice %110 {offsets = [0, 3, 2, 0], sizes = [1, 1, 1, 16], strides = [1, 1, 1, 1]} : vector<1x4x4x16xf32> to vector<1x1x1x16xf32>
    %140 = vector.shape_cast %139 : vector<1x1x1x16xf32> to vector<1x16xf32>
    %141 = vector.extract_strided_slice %110 {offsets = [0, 3, 3, 0], sizes = [1, 1, 1, 16], strides = [1, 1, 1, 1]} : vector<1x4x4x16xf32> to vector<1x1x1x16xf32>
    %142 = vector.shape_cast %141 : vector<1x1x1x16xf32> to vector<1x16xf32>
    %143 = tpu.concatenate %112, %114, %116, %118, %120, %122, %124, %126, %128, %130, %132, %134, %136, %138, %140, %142 in 1 : vector<1x16xf32>, vector<1x16xf32>, vector<1x16xf32>, vector<1x16xf32>, vector<1x16xf32>, vector<1x16xf32>, vector<1x16xf32>, vector<1x16xf32>, vector<1x16xf32>, vector<1x16xf32>, vector<1x16xf32>, vector<1x16xf32>, vector<1x16xf32>, vector<1x16xf32>, vector<1x16xf32>, vector<1x16xf32> -> vector<1x256xf32>
    %c0_188 = arith.constant 0 : index
    %c0_189 = arith.constant 0 : index
    %144 = vector.load %arg8[%c0_188, %c0_189] : memref<256x32xf32, #tpu.memory_space<vmem>>, vector<256x32xf32>
    %cst_190 = arith.constant dense<0.000000e+00> : vector<1x32xf32>
    %145 = tpu.matmul %143, %144, %cst_190 {dimension_numbers = #tpu.dot_dimension_numbers<[1], [0], [0], [1], [0, 0, 1, 1], [], []>} : vector<1x256xf32>, vector<256x32xf32>, vector<1x32xf32> -> vector<1x32xf32>
    %c0_191 = arith.constant 0 : index
    %c0_192 = arith.constant 0 : index
    %146 = vector.load %arg9[%c0_191, %c0_192] : memref<1x32xf32, #tpu.memory_space<vmem>>, vector<1x32xf32>
    %147 = arith.addf %145, %146 : vector<1x32xf32>
    %cst_193 = arith.constant 0.000000e+00 : f32
    %148 = vector.broadcast %cst_193 : f32 to vector<1x32xf32>
    %149 = arith.maximumf %147, %148 : vector<1x32xf32>
    %c0_194 = arith.constant 0 : index
    %c0_195 = arith.constant 0 : index
    %150 = vector.load %arg10[%c0_194, %c0_195] : memref<32x10xf32, #tpu.memory_space<vmem>>, vector<32x10xf32>
    %cst_196 = arith.constant dense<0.000000e+00> : vector<1x10xf32>
    %151 = tpu.matmul %149, %150, %cst_196 {dimension_numbers = #tpu.dot_dimension_numbers<[1], [0], [0], [1], [0, 0, 1, 1], [], []>} : vector<1x32xf32>, vector<32x10xf32>, vector<1x10xf32> -> vector<1x10xf32>
    %c0_197 = arith.constant 0 : index
    %c0_198 = arith.constant 0 : index
    %152 = vector.load %arg11[%c0_197, %c0_198] : memref<1x10xf32, #tpu.memory_space<vmem>>, vector<1x10xf32>
    %153 = arith.addf %151, %152 : vector<1x10xf32>
    %154 = vector.extract_strided_slice %153 {offsets = [0, 0], sizes = [1, 5], strides = [1, 1]} : vector<1x10xf32> to vector<1x5xf32>
    %155 = vector.extract_strided_slice %153 {offsets = [0, 5], sizes = [1, 5], strides = [1, 1]} : vector<1x10xf32> to vector<1x5xf32>
    %cst_199 = arith.constant 2.000000e+01 : f32
    %156 = vector.broadcast %cst_199 : f32 to vector<1x5xf32>
    %157 = arith.cmpf ogt, %155, %156 : vector<1x5xf32>
    %cst_200 = arith.constant 2.000000e+01 : f32
    %158 = vector.broadcast %cst_200 : f32 to vector<1x5xf32>
    %159 = arith.minimumf %155, %158 : vector<1x5xf32>
    %160 = math.exp %159 : vector<1x5xf32>
    %161 = math.log1p %160 : vector<1x5xf32>
    %162 = arith.select %157, %155, %161 : vector<1x5xi1>, vector<1x5xf32>
    %163 = tpu.concatenate %154, %162 in 1 : vector<1x5xf32>, vector<1x5xf32> -> vector<1x10xf32>
    %c0_201 = arith.constant 0 : index
    %c0_202 = arith.constant 0 : index
    %c0_203 = arith.constant 0 : index
    %164 = vector.load %arg12[%c0_201, %c0_202, %c0_203] : memref<1x1x10xf32, #tpu.memory_space<vmem>>, vector<1x1x10xf32>
    %165 = vector.shape_cast %164 : vector<1x1x10xf32> to vector<1x10xf32>
    %166 = vector.shape_cast %163 : vector<1x10xf32> to vector<1x1x10xf32>
    tpu.vector_store %arg12[%c0_201, %c0_202, %c0_203], %166 {strides = array<i32>} : memref<1x1x10xf32, #tpu.memory_space<vmem>>, vector<1x1x10xf32>,
    return
  }
  func.func @transform_0(%arg0: i32) -> (i32, i32, i32, i32) {
    %c0_i32 = arith.constant 0 : i32
    %c0_i32_0 = arith.constant 0 : i32
    %c0_i32_1 = arith.constant 0 : i32
    %c0_i32_2 = arith.constant 0 : i32
    return %arg0, %c0_i32, %c0_i32_0, %c0_i32_1 : i32, i32, i32, i32
  }
  func.func @transform_1(%arg0: i32) -> (i32, i32) {
    %c0_i32 = arith.constant 0 : i32
    %c0_i32_0 = arith.constant 0 : i32
    %c0_i32_1 = arith.constant 0 : i32
    return %c0_i32, %c0_i32_0 : i32, i32
  }
  func.func @transform_2(%arg0: i32) -> (i32, i32) {
    %c0_i32 = arith.constant 0 : i32
    %c0_i32_0 = arith.constant 0 : i32
    %c0_i32_1 = arith.constant 0 : i32
    return %c0_i32, %c0_i32_0 : i32, i32
  }
  func.func @transform_3(%arg0: i32) -> (i32, i32) {
    %c0_i32 = arith.constant 0 : i32
    %c0_i32_0 = arith.constant 0 : i32
    %c0_i32_1 = arith.constant 0 : i32
    return %c0_i32, %c0_i32_0 : i32, i32
  }
  func.func @transform_4(%arg0: i32) -> (i32, i32) {
    %c0_i32 = arith.constant 0 : i32
    %c0_i32_0 = arith.constant 0 : i32
    %c0_i32_1 = arith.constant 0 : i32
    return %c0_i32, %c0_i32_0 : i32, i32
  }
  func.func @transform_5(%arg0: i32) -> (i32, i32) {
    %c0_i32 = arith.constant 0 : i32
    %c0_i32_0 = arith.constant 0 : i32
    %c0_i32_1 = arith.constant 0 : i32
    return %c0_i32, %c0_i32_0 : i32, i32
  }
  func.func @transform_6(%arg0: i32) -> (i32, i32) {
    %c0_i32 = arith.constant 0 : i32
    %c0_i32_0 = arith.constant 0 : i32
    %c0_i32_1 = arith.constant 0 : i32
    return %c0_i32, %c0_i32_0 : i32, i32
  }
  func.func @transform_7(%arg0: i32) -> (i32, i32) {
    %c0_i32 = arith.constant 0 : i32
    %c0_i32_0 = arith.constant 0 : i32
    %c0_i32_1 = arith.constant 0 : i32
    return %c0_i32, %c0_i32_0 : i32, i32
  }
  func.func @transform_8(%arg0: i32) -> (i32, i32) {
    %c0_i32 = arith.constant 0 : i32
    %c0_i32_0 = arith.constant 0 : i32
    %c0_i32_1 = arith.constant 0 : i32
    return %c0_i32, %c0_i32_0 : i32, i32
  }
  func.func @transform_9(%arg0: i32) -> (i32, i32) {
    %c0_i32 = arith.constant 0 : i32
    %c0_i32_0 = arith.constant 0 : i32
    %c0_i32_1 = arith.constant 0 : i32
    return %c0_i32, %c0_i32_0 : i32, i32
  }
  func.func @transform_10(%arg0: i32) -> (i32, i32) {
    %c0_i32 = arith.constant 0 : i32
    %c0_i32_0 = arith.constant 0 : i32
    %c0_i32_1 = arith.constant 0 : i32
    return %c0_i32, %c0_i32_0 : i32, i32
  }
  func.func @transform_11(%arg0: i32) -> (i32, i32, i32) {
    %c0_i32 = arith.constant 0 : i32
    %c0_i32_0 = arith.constant 0 : i32
    %c0_i32_1 = arith.constant 0 : i32
    return %arg0, %c0_i32, %c0_i32_0 : i32, i32, i32
  }
}

</mosaic_0001>

<bundles_post_ra>
// kernel: shadow_net_forward.1
= control target key start
LH: loop header
LB: loop body
LE: loop exit
PB: predicated region body
PF: predicated region fallthrough
CT: control target
= control target key end

     0   :  { %s4125_s17 = smov 0   ;;  %s5595_s0 = inlined_call_operand.vmem [shape: f32[2,16,16,4], index: 0, kind: input, shape index: {}]   ;;  %s5596_s1 = inlined_call_operand.vmem [shape: f32[36,8], index: 1, kind: input, shape index: {}]   ;;  %s5597_s2 = inlined_call_operand.vmem [shape: f32[1,8], index: 2, kind: input, shape index: {}]   ;;  %s5598_s3 = inlined_call_operand.vmem [shape: f32[1,8], index: 3, kind: input, shape index: {}]   ;;  %s5599_s4 = inlined_call_operand.vmem [shape: f32[72,16], index: 4, kind: input, shape index: {}]   ;;  %s5600_s5 = inlined_call_operand.vmem [shape: f32[1,16], index: 5, kind: input, shape index: {}]   ;;  %s5601_s6 = inlined_call_operand.vmem [shape: f32[1,16], index: 6, kind: input, shape index: {}]   ;;  %s5602_s7 = inlined_call_operand.vmem [shape: f32[256,32], index: 7, kind: input, shape index: {}]   ;;  %s5603_s8 = inlined_call_operand.vmem [shape: f32[1,32], index: 8, kind: input, shape index: {}]   ;;  %s5604_s9 = inlined_call_operand.vmem [shape: f32[32,10], index: 9, kind: input, shape index: {}]   ;;  %s5605_s10 = inlined_call_operand.vmem [shape: f32[1,10], index: 10, kind: input, shape index: {}]   ;;  %s5606_s11 = inlined_call_operand.vmem [shape: f32[2,1,10], index: 11, kind: output, shape index: {}]  }
   0x1 LB: > { %s3725_s18 = sadd.s32 4294967295, %s4046_s17   ;;  %p3729_p0 = scmp.ge.s32.totalorder %s4046_s17, 1  ;;  %s4046_s17 = sphi %s4125_s17, %s21_s17  }
   0x2   : > { %p337_p1 = scmp.lt.s32.totalorder %s4046_s17, 3 }
   0x4   : > { %p338_p2 = pnand %p3729_p0, %p337_p1 }
   0x5   : > { %p375_p3 = scmp.lt.s32.totalorder (!%p338_p2), %s3725_s18, 1  ;;  %s4049_s23 = smov (!%p338_p2), 8  }
   0x6   : > { %341 = sbr.rel (%p338_p2) target bundleno = 1813 (0x715), region = 64  ;;  %s4050_s24 = smov (!%p338_p2), 4  }
   0x7   : > { %s4051_s25 = smov (!%p338_p2), 12   ;;  %s4052_s26 = smov (!%p338_p2), 16  }
   0x8   : > { %s4053_s27 = smov (!%p338_p2), 20   ;;  %s4054_s28 = smov (!%p338_p2), 24  }
   0x9   : > { %s4055_s29 = smov (!%p338_p2), 28   ;;  %s4056_s21 = smov (!%p338_p2), 32  }
   0xb   : > { %vm415_vm0 = vcmask 31744   ;;  %vm424_vm1 = vcmask 24576   ;;  %vm418_vm2 = vcmask 25600   ;;  %v4048_v0 = vmov 0.0   ;;  %s5608_s18 = smov (!%p375_p3, %s3725_s18), 1  ;;  %v2138_v37 = vld [vmem:[%s5596_s1 + $0x18] sm:$0xff] }
   0xc   : > { %416 = vst.msk [vmem:[#allocation2] sm:$0xff] %vm415_vm0, %v4048_v0  ;;  %417 = vst.msk [vmem:[#allocation2 + $0x8] sm:$0xff] %vm415_vm0, %v4048_v0  ;;  %s3780_s19 = sshll.u32 %s5608_s18, 8  ;;  %v2139_v36 = vld [vmem:[%s5596_s1 + $0x20] sm:$0xf]  ;;  %vm2237_vm3 = vcmask 1043456  }
   0xd   : > { %421 = vst.msk [vmem:[#allocation2 + $0x198] sm:$0xff] %vm415_vm0, %v4048_v0  ;;  %422 = vst.msk [vmem:[#allocation2 + $0x1a0] sm:$0xff] %vm415_vm0, %v4048_v0  ;;  %s4227_s22 = scalar_lea.vmem %s5595_s0, %s3780_s19  ;;  %3875 = vmatprep.subr.msk.mxu0 %vm2237_vm3, %v2139_v36  ;;  %v2137_v38 = vld [vmem:[%s5596_s1 + $0x10] sm:$0xff]  ;;  %v2136_v41 = vld [vmem:[%s5596_s1 + $0x8] sm:$0xff]  ;;  %vm718_vm4 = vcmask 64544   ;;  %vm911_vm5 = vcmask 97344  }
   0xe   : > { %426 = vst.msk [vmem:[#allocation2 + $0x18] sm:$0x1] %vm424_vm1, %v4048_v0  ;;  %427 = vst.msk [vmem:[#allocation2 + $0x30] sm:$0x1] %vm424_vm1, %v4048_v0  ;;  %v383_v1 = vld [vmem:[%s4227_s22] sm:$0xff]  ;;  %v384_v2 = vld [vmem:[%s4227_s22 + $0x8] sm:$0xff]  ;;  %3876 = vmatpush3.msk.msra.mxu0 %vm2237_vm3, %v2139_v36 }
   0xf   : > { %428 = vst.msk [vmem:[#allocation2 + $0x48] sm:$0x1] %vm424_vm1, %v4048_v0  ;;  %429 = vst.msk [vmem:[#allocation2 + $0x60] sm:$0x1] %vm424_vm1, %v4048_v0  ;;  %v385_v3 = vld [vmem:[%s4227_s22 + $0x10] sm:$0xff]  ;;  %v386_v8 = vld [vmem:[%s4227_s22 + $0x18] sm:$0xff]  ;;  %3877 = vmatprep.subr.mxu0 %v2138_v37 }
  0x10   : > { %430 = vst.msk [vmem:[#allocation2 + $0x78] sm:$0x1] %vm424_vm1, %v4048_v0  ;;  %431 = vst.msk [vmem:[#allocation2 + $0x90] sm:$0x1] %vm424_vm1, %v4048_v0  ;;  %v387_v9 = vld [vmem:[%s4227_s22 + $0x20] sm:$0xff]  ;;  %v388_v10 = vld [vmem:[%s4227_s22 + $0x28] sm:$0xff]  ;;  %3878 = vmatpush3.msra.mxu0 %v2138_v37 }
  0x11   : > { %432 = vst.msk [vmem:[#allocation2 + $0xa8] sm:$0x1] %vm424_vm1, %v4048_v0  ;;  %433 = vst.msk [vmem:[#allocation2 + $0xc0] sm:$0x1] %vm424_vm1, %v4048_v0  ;;  %v389_v11 = vld [vmem:[%s4227_s22 + $0x30] sm:$0xff]  ;;  %v390_v12 = vld [vmem:[%s4227_s22 + $0x38] sm:$0xff]  ;;  %3879 = vmatprep.subr.mxu0 %v2137_v38 }
  0x12   : > { %434 = vst.msk [vmem:[#allocation2 + $0xd8] sm:$0x1] %vm424_vm1, %v4048_v0  ;;  %435 = vst.msk [vmem:[#allocation2 + $0xf0] sm:$0x1] %vm424_vm1, %v4048_v0  ;;  %v391_v15 = vld [vmem:[%s4227_s22 + $0x40] sm:$0xff]  ;;  %v392_v16 = vld [vmem:[%s4227_s22 + $0x48] sm:$0xff]  ;;  %3880 = vmatpush3.msra.mxu0 %v2137_v38 }
  0x13   : > { %436 = vst.msk [vmem:[#allocation2 + $0x108] sm:$0x1] %vm424_vm1, %v4048_v0  ;;  %437 = vst.msk [vmem:[#allocation2 + $0x120] sm:$0x1] %vm424_vm1, %v4048_v0  ;;  %v751_v4 = vld [vmem:[#allocation2 + $0x2] sm:$0xff]  ;;  %v393_v30 = vld [vmem:[%s4227_s22 + $0x50] sm:$0xff]  ;;  %3881 = vmatprep.subr.mxu0 %v2136_v41 }
  0x14   : > { %438 = vst.msk [vmem:[#allocation2 + $0x138] sm:$0x1] %vm424_vm1, %v4048_v0  ;;  %439 = vst.msk [vmem:[#allocation2 + $0x150] sm:$0x1] %vm424_vm1, %v4048_v0  ;;  %v558_v5 = vld [vmem:[#allocation2 + $0x1] sm:$0xff]  ;;  %815 = vrot.lane.b32.xlu1 %v751_v4, %s4049_s23  ;;  %v394_v32 = vld [vmem:[%s4227_s22 + $0x58] sm:$0xff]  ;;  %3882 = vmatpush3.msra.mxu0 %v2136_v41 }
  0x15   : > { %440 = vst.msk [vmem:[#allocation2 + $0x168] sm:$0x1] %vm424_vm1, %v4048_v0  ;;  %441 = vst.msk [vmem:[#allocation2 + $0x180] sm:$0x1] %vm424_vm1, %v4048_v0  ;;  %622 = vrot.lane.b32.xlu0 %v558_v5, %s4050_s24  ;;  %v495_v14 = vld [vmem:[#allocation2 + $0x8] sm:$0xff]  ;;  %v2135_v42 = vld [vmem:[%s5596_s1] sm:$0xff] }
  0x16   : > { %444 = vst.msk [vmem:[#allocation2 + $0x29] sm:$0x1] %vm424_vm1, %v4048_v0  ;;  %445 = vst.msk [vmem:[#allocation2 + $0x41] sm:$0x1] %vm424_vm1, %v4048_v0  ;;  %3883 = vmatprep.subr.mxu0 %v2135_v42  ;;  %v395_v44 = vld [vmem:[%s4227_s22 + $0x60] sm:$0xff]  ;;  %v396_v46 = vld [vmem:[%s4227_s22 + $0x68] sm:$0xff] }
  0x17   : > { %446 = vst.msk [vmem:[#allocation2 + $0x59] sm:$0x1] %vm424_vm1, %v4048_v0  ;;  %447 = vst.msk [vmem:[#allocation2 + $0x71] sm:$0x1] %vm424_vm1, %v4048_v0  ;;  %3884 = vmatpush3.msra.mxu0 %v2135_v42  ;;  %v397_v52 = vld [vmem:[%s4227_s22 + $0x70] sm:$0xff]  ;;  %v398_v54 = vld [vmem:[%s4227_s22 + $0x78] sm:$0xff] }
  0x18   : > { %448 = vst.msk [vmem:[#allocation2 + $0x89] sm:$0x1] %vm424_vm1, %v4048_v0  ;;  %449 = vst.msk [vmem:[#allocation2 + $0xa1] sm:$0x1] %vm424_vm1, %v4048_v0  ;;  %v399_v60 = vld [vmem:[%s4227_s22 + $0x80] sm:$0xff]  ;;  %vm1104_vm6 = vcmask 130144  }
  0x19   : > { %450 = vst.msk [vmem:[#allocation2 + $0xb9] sm:$0x1] %vm424_vm1, %v4048_v0  ;;  %451 = vst.msk [vmem:[#allocation2 + $0xd1] sm:$0x1] %vm424_vm1, %v4048_v0  ;;  %vm1297_vm7 = vcmask 162944   ;;  %vm1490_vm8 = vcmask 195744  }
  0x1a   : > { %452 = vst.msk [vmem:[#allocation2 + $0xe9] sm:$0x1] %vm424_vm1, %v4048_v0  ;;  %453 = vst.msk [vmem:[#allocation2 + $0x101] sm:$0x1] %vm424_vm1, %v4048_v0  ;;  %vm1684_vm9 = vcmask 228544   ;;  %vm1877_vm10 = vcmask 261344  }
  0x1b   : > { %454 = vst.msk [vmem:[#allocation2 + $0x119] sm:$0x1] %vm424_vm1, %v4048_v0  ;;  %455 = vst.msk [vmem:[#allocation2 + $0x131] sm:$0x1] %vm424_vm1, %v4048_v0  ;;  %vm2070_vm11 = vcmask 294144   ;;  %vm2140_vm12 = vcmask 293888  }
  0x1c   : > { %456 = vst.msk [vmem:[#allocation2 + $0x149] sm:$0x1] %vm424_vm1, %v4048_v0  ;;  %457 = vst.msk [vmem:[#allocation2 + $0x161] sm:$0x1] %vm424_vm1, %v4048_v0  ;;  %vm2576_vm13 = vcmask 64512   ;;  %vm2702_vm14 = vcmask 57344  }
  0x1d   : > { %458 = vst.msk [vmem:[#allocation2 + $0x179] sm:$0x1] %vm424_vm1, %v4048_v0  ;;  %459 = vst.msk [vmem:[#allocation2 + $0x191] sm:$0x1] %vm424_vm1, %v4048_v0  ;;  %vm2697_vm15 = vcmask 58368   ;;  %vm2935_vm3 = vcmask 326912  }
  0x1e   : > { %419 = vst.msk [vmem:[#allocation2 + $0x10] sm:$0x3] %vm418_vm2, %v4048_v0  ;;  %423 = vst.msk [vmem:[#allocation2 + $0x1a8] sm:$0x3] %vm418_vm2, %v4048_v0  ;;  %vm2886_vm2 = vcmask 261312  }
  0x1f   : > { %425 = vst.msk [vmem:[#allocation2] sm:$0x1] %vm424_vm1, %v4048_v0  ;;  %442 = vst.msk [vmem:[#allocation2 + $0x198] sm:$0x1] %vm424_vm1, %v4048_v0 }
  0x20   : > { %443 = vst.msk [vmem:[#allocation2 + $0x11] sm:$0x1] %vm424_vm1, %v4048_v0  ;;  %460 = vst.msk [vmem:[#allocation2 + $0x1a9] sm:$0x1] %vm424_vm1, %v4048_v0  ;;  %vm2837_vm1 = vcmask 195712  }
  0x21   : > { %462 = vst.msk [vmem:[#allocation2 + $0x19] sm:$0xff] %vm415_vm0, %v383_v1  ;;  %463 = vst.msk [vmem:[#allocation2 + $0x21] sm:$0xff] %vm415_vm0, %v384_v2 }
  0x22   : > { %464 = vst.msk [vmem:[#allocation2 + $0x31] sm:$0xff] %vm415_vm0, %v385_v3  ;;  %465 = vst.msk [vmem:[#allocation2 + $0x39] sm:$0xff] %vm415_vm0, %v386_v8  ;;  %v400_v3 = vld [vmem:[%s4227_s22 + $0x88] sm:$0xff] }
  0x23   : > { %466 = vst.msk [vmem:[#allocation2 + $0x49] sm:$0xff] %vm415_vm0, %v387_v9  ;;  %467 = vst.msk [vmem:[#allocation2 + $0x51] sm:$0xff] %vm415_vm0, %v388_v10 }
  0x24   : > { %468 = vst.msk [vmem:[#allocation2 + $0x61] sm:$0xff] %vm415_vm0, %v389_v11  ;;  %469 = vst.msk [vmem:[#allocation2 + $0x69] sm:$0xff] %vm415_vm0, %v390_v12 }
  0x25   : > { %v559_v6 = vld [vmem:[#allocation2 + $0x9] sm:$0xff]  ;;  %527 = vst.msk [vmem:[#allocation4 + $0x8] sm:$0xff] %vm415_vm0, %v495_v14  ;;  %470 = vst.msk [vmem:[#allocation2 + $0x79] sm:$0xff] %vm415_vm0, %v391_v15 }
  0x26   : > { %v494_v13 = vld [vmem:[#allocation2] sm:$0xff]  ;;  %624 = vrot.lane.b32.xlu0 %v559_v6, %s4050_s24  ;;  %471 = vst.msk [vmem:[#allocation2 + $0x81] sm:$0xff] %vm415_vm0, %v392_v16  ;;  %472 = vst.msk [vmem:[#allocation2 + $0x91] sm:$0xff] %vm415_vm0, %v393_v30 }
  0x27   : > { %v752_v7 = vld [vmem:[#allocation2 + $0xa] sm:$0xff]  ;;  %526 = vst.msk [vmem:[#allocation4] sm:$0xff] %vm415_vm0, %v494_v13  ;;  %473 = vst.msk [vmem:[#allocation2 + $0x99] sm:$0xff] %vm415_vm0, %v394_v32 }
  0x28   : > { %817 = vrot.lane.b32.xlu1 %v752_v7, %s4049_s23  ;;  %v945_v17 = vld [vmem:[#allocation2 + $0x20] sm:$0xff]  ;;  %v944_v18 = vld [vmem:[#allocation2 + $0x18] sm:$0xff]  ;;  %474 = vst.msk [vmem:[#allocation2 + $0xa9] sm:$0xff] %vm415_vm0, %v395_v44  ;;  %475 = vst.msk [vmem:[#allocation2 + $0xb1] sm:$0xff] %vm415_vm0, %v396_v46 }
  0x29   : > { %528 = vst.msk [vmem:[#allocation4 + $0x10] sm:$0xff] %vm415_vm0, %v944_v18  ;;  %529 = vst.msk [vmem:[#allocation4 + $0x18] sm:$0xff] %vm415_vm0, %v945_v17  ;;  %v1524_v19 = vld [vmem:[#allocation2 + $0x30] sm:$0xff]  ;;  %v1525_v20 = vld [vmem:[#allocation2 + $0x38] sm:$0xff] }
  0x2a   : > { %1008 = vrot.lane.b32.xlu0 %v944_v18, %s4051_s25  ;;  %v1137_v21 = vld [vmem:[#allocation2 + $0x19] sm:$0xff]  ;;  %530 = vst.msk [vmem:[#allocation4 + $0x20] sm:$0xff] %vm415_vm0, %v1524_v19  ;;  %531 = vst.msk [vmem:[#allocation4 + $0x28] sm:$0xff] %vm415_vm0, %v1525_v20  ;;  %v4261_v22 = vld [vmem:[#allocation2 + $0x48] sm:$0xff] }
  0x2b   : > { %v4263_v23 = vld [vmem:[#allocation2 + $0x50] sm:$0xff]  ;;  %532 = vst.msk [vmem:[#allocation4 + $0x30] sm:$0xff] %vm415_vm0, %v4261_v22  ;;  %v4271_v24 = vld [vmem:[#allocation2 + $0x60] sm:$0xff]  ;;  %v4273_v25 = vld [vmem:[#allocation2 + $0x68] sm:$0xff] }
  0x2c   : > { %1010 = vrot.lane.b32.xlu1 %v945_v17, %s4051_s25  ;;  %533 = vst.msk [vmem:[#allocation4 + $0x38] sm:$0xff] %vm415_vm0, %v4263_v23  ;;  %v1138_v26 = vld [vmem:[#allocation2 + $0x21] sm:$0xff]  ;;  %534 = vst.msk [vmem:[#allocation4 + $0x40] sm:$0xff] %vm415_vm0, %v4271_v24  ;;  %v4279_v28 = vld [vmem:[#allocation2 + $0x78] sm:$0xff] }
  0x2d   : > { %v1330_v27 = vld [vmem:[#allocation2 + $0x1a] sm:$0xff]  ;;  %535 = vst.msk [vmem:[#allocation4 + $0x48] sm:$0xff] %vm415_vm0, %v4273_v25  ;;  %536 = vst.msk [vmem:[#allocation4 + $0x50] sm:$0xff] %vm415_vm0, %v4279_v28  ;;  %v1331_v31 = vld [vmem:[#allocation2 + $0x22] sm:$0xff] }
  0x2e   : > { %1201 = vrot.lane.b32.xlu0 %v1137_v21, %s4052_s26  ;;  %v4281_v29 = vld [vmem:[#allocation2 + $0x80] sm:$0xff]  ;;  %v4296_v33 = vld [vmem:[#allocation2 + $0x90] sm:$0xff]  ;;  %v4303_v35 = vld [vmem:[#allocation2 + $0x98] sm:$0xff]  ;;  %476 = vst.msk [vmem:[#allocation2 + $0xc1] sm:$0xff] %vm415_vm0, %v397_v52 }
  0x2f   : > { %537 = vst.msk [vmem:[#allocation4 + $0x58] sm:$0xff] %vm415_vm0, %v4281_v29  ;;  %538 = vst.msk [vmem:[#allocation4 + $0x60] sm:$0xff] %vm415_vm0, %v4296_v33  ;;  %v1717_v34 = vld [vmem:[#allocation2 + $0x31] sm:$0xff]  ;;  %v1718_v39 = vld [vmem:[#allocation2 + $0x39] sm:$0xff] }
  0x30   : > { %626 = vrot.lane.b32.xlu1 %v1137_v21, %s4050_s24  ;;  %539 = vst.msk [vmem:[#allocation4 + $0x68] sm:$0xff] %vm415_vm0, %v4303_v35  ;;  %v1910_v40 = vld [vmem:[#allocation2 + $0x32] sm:$0xff]  ;;  %v1911_v43 = vld [vmem:[#allocation2 + $0x3a] sm:$0xff]  ;;  %v4336_v45 = vld [vmem:[#allocation2 + $0xa8] sm:$0xff] }
  0x31   : > { %540 = vst.msk [vmem:[#allocation4 + $0x70] sm:$0xff] %vm415_vm0, %v4336_v45  ;;  %v1719_v47 = vld [vmem:[#allocation2 + $0x49] sm:$0xff]  ;;  %v1720_v49 = vld [vmem:[#allocation2 + $0x51] sm:$0xff]  ;;  %477 = vst.msk [vmem:[#allocation2 + $0xc9] sm:$0xff] %vm415_vm0, %v398_v54 }
  0x32   : > { %1203 = vrot.lane.b32.xlu0 %v1138_v26, %s4052_s26  ;;  %v4348_v48 = vld [vmem:[#allocation2 + $0xb0] sm:$0xff]  ;;  %v1721_v55 = vld [vmem:[#allocation2 + $0x61] sm:$0xff]  ;;  %478 = vst.msk [vmem:[#allocation2 + $0xd9] sm:$0xff] %vm415_vm0, %v399_v60  ;;  %479 = vst.msk [vmem:[#allocation2 + $0xe1] sm:$0xff] %vm415_vm0, %v400_v3 }
  0x33   : > { %541 = vst.msk [vmem:[#allocation4 + $0x78] sm:$0xff] %vm415_vm0, %v4348_v48  ;;  %v1912_v50 = vld [vmem:[#allocation2 + $0x4a] sm:$0xff]  ;;  %v1913_v51 = vld [vmem:[#allocation2 + $0x52] sm:$0xff]  ;;  %v1914_v58 = vld [vmem:[#allocation2 + $0x62] sm:$0xff] }
  0x34   : > { %1394 = vrot.lane.b32.xlu1 %v1330_v27, %s4053_s27  ;;  %v1722_v57 = vld [vmem:[#allocation2 + $0x69] sm:$0xff]  ;;  %v1723_v6 = vld [vmem:[#allocation2 + $0x79] sm:$0xff]  ;;  %v1724_v12 = vld [vmem:[#allocation2 + $0x81] sm:$0xff]  ;;  %2696 = vst.msk [vmem:[#allocation3] sm:$0xff] %vm2576_vm13, %v4048_v0 }
  0x35   : > { %v4368_v53 = vld [vmem:[#allocation2 + $0xc0] sm:$0xff]  ;;  %v1915_v59 = vld [vmem:[#allocation2 + $0x6a] sm:$0xff]  ;;  %2700 = vst.msk [vmem:[#allocation3 + $0x90] sm:$0xff] %vm2576_vm13, %v4048_v0 }
  0x36   : > { %628 = vrot.lane.b32.xlu0 %v1138_v26, %s4050_s24  ;;  %542 = vst.msk [vmem:[#allocation4 + $0x80] sm:$0xff] %vm415_vm0, %v4368_v53  ;;  %v1916_v13 = vld [vmem:[#allocation2 + $0x7a] sm:$0xff]  ;;  %v1917_v18 = vld [vmem:[#allocation2 + $0x82] sm:$0xff]  ;;  %v401_v21 = vld [vmem:[%s4227_s22 + $0x90] sm:$0xff] }
  0x37   : > { %480 = vst.msk [vmem:[#allocation2 + $0xf1] sm:$0xff] %vm415_vm0, %v401_v21  ;;  %v1725_v30 = vld [vmem:[#allocation2 + $0x91] sm:$0xff]  ;;  %v1726_v38 = vld [vmem:[#allocation2 + $0x99] sm:$0xff]  ;;  %v1727_v60 = vld [vmem:[#allocation2 + $0xa9] sm:$0xff] }
  0x38   : > { %819 = vrot.lane.b32.xlu1 %v1330_v27, %s4049_s23  ;;  %v4380_v56 = vld [vmem:[#allocation2 + $0xc8] sm:$0xff]  ;;  %v402_v27 = vld [vmem:[%s4227_s22 + $0x98] sm:$0xff]  ;;  %2703 = vst.msk [vmem:[#allocation3] sm:$0x1] %vm2702_vm14, %v4048_v0  ;;  %2704 = vst.msk [vmem:[#allocation3 + $0x10] sm:$0x1] %vm2702_vm14, %v4048_v0 }
  0x39   : > { %543 = vst.msk [vmem:[#allocation4 + $0x88] sm:$0xff] %vm415_vm0, %v4380_v56  ;;  %v4403_v2 = vld [vmem:[#allocation2 + $0xd8] sm:$0xff]  ;;  %v4420_v9 = vld [vmem:[#allocation2 + $0xe0] sm:$0xff]  ;;  %481 = vst.msk [vmem:[#allocation2 + $0xf9] sm:$0xff] %vm415_vm0, %v402_v27 }
  0x3a   : > { %1396 = vrot.lane.b32.xlu0 %v1331_v31, %s4053_s27  ;;  %544 = vst.msk [vmem:[#allocation4 + $0x90] sm:$0xff] %vm415_vm0, %v4403_v2  ;;  %545 = vst.msk [vmem:[#allocation4 + $0x98] sm:$0xff] %vm415_vm0, %v4420_v9 }
  0x3b   : > { %2705 = vst.msk [vmem:[#allocation3 + $0x20] sm:$0x1] %vm2702_vm14, %v4048_v0  ;;  %2706 = vst.msk [vmem:[#allocation3 + $0x30] sm:$0x1] %vm2702_vm14, %v4048_v0 }
  0x3c   : > { %1588 = vrot.lane.b32.xlu1 %v1524_v19, %s4054_s28  ;;  %2707 = vst.msk [vmem:[#allocation3 + $0x40] sm:$0x1] %vm2702_vm14, %v4048_v0  ;;  %2708 = vst.msk [vmem:[#allocation3 + $0x50] sm:$0x1] %vm2702_vm14, %v4048_v0 }
  0x3d   : > { %2709 = vst.msk [vmem:[#allocation3 + $0x60] sm:$0x1] %vm2702_vm14, %v4048_v0  ;;  %2710 = vst.msk [vmem:[#allocation3 + $0x70] sm:$0x1] %vm2702_vm14, %v4048_v0 }
  0x3e   : > { %821 = vrot.lane.b32.xlu0 %v1331_v31, %s4049_s23  ;;  %v4452_v26 = vld [vmem:[#allocation2 + $0xf0] sm:$0xff]  ;;  %2711 = vst.msk [vmem:[#allocation3 + $0x80] sm:$0x1] %vm2702_vm14, %v4048_v0  ;;  %2712 = vst.msk [vmem:[#allocation3 + $0x90] sm:$0x1] %vm2702_vm14, %v4048_v0 }
  0x3f   : > { %546 = vst.msk [vmem:[#allocation4 + $0xa0] sm:$0xff] %vm415_vm0, %v4452_v26 }
  0x40   : > { %1012 = vrot.lane.b32.xlu1 %v1524_v19, %s4051_s25  ;;  %2714 = vst.msk [vmem:[#allocation3 + $0x19] sm:$0x1] %vm2702_vm14, %v4048_v0  ;;  %2715 = vst.msk [vmem:[#allocation3 + $0x29] sm:$0x1] %vm2702_vm14, %v4048_v0 }
  0x41   : > { %2716 = vst.msk [vmem:[#allocation3 + $0x39] sm:$0x1] %vm2702_vm14, %v4048_v0  ;;  %2717 = vst.msk [vmem:[#allocation3 + $0x49] sm:$0x1] %vm2702_vm14, %v4048_v0 }
  0x42   : > { %1590 = vrot.lane.b32.xlu0 %v1525_v20, %s4054_s28  ;;  %2718 = vst.msk [vmem:[#allocation3 + $0x59] sm:$0x1] %vm2702_vm14, %v4048_v0  ;;  %2719 = vst.msk [vmem:[#allocation3 + $0x69] sm:$0x1] %vm2702_vm14, %v4048_v0 }
  0x43   : > { %2720 = vst.msk [vmem:[#allocation3 + $0x79] sm:$0x1] %vm2702_vm14, %v4048_v0  ;;  %2721 = vst.msk [vmem:[#allocation3 + $0x89] sm:$0x1] %vm2702_vm14, %v4048_v0 }
  0x44   : > { %1781 = vrot.lane.b32.xlu1 %v1717_v34, %s4055_s29  ;;  %2698 = vst.msk [vmem:[#allocation3 + $0x8] sm:$0x3] %vm2697_vm15, %v4048_v0  ;;  %2701 = vst.msk [vmem:[#allocation3 + $0x98] sm:$0x3] %vm2697_vm15, %v4048_v0  ;;  %vm3447_vm15 = vcmask 916480  }
  0x45   : > { %2713 = vst.msk [vmem:[#allocation3 + $0x9] sm:$0x1] %vm2702_vm14, %v4048_v0  ;;  %2722 = vst.msk [vmem:[#allocation3 + $0x99] sm:$0x1] %vm2702_vm14, %v4048_v0  ;;  %vm3445_vm14 = vcmask 785408  }
  0x46   : > { %1014 = vrot.lane.b32.xlu0 %v1525_v20, %s4051_s25 }
  0x48   : > { %1205 = vrot.lane.b32.xlu1 %v1717_v34, %s4052_s26 }
  0x4a   : > { %1783 = vrot.lane.b32.xlu0 %v1718_v39, %s4055_s29 }
  0x4c   : > { %1974 = vrot.lane.b32.xlu1 %v1910_v40, %s4056_s21 }
  0x4e   : > { %630 = vrot.lane.b32.xlu0 %v1717_v34, %s4050_s24  ;;  %v4468_v34 = vld [vmem:[#allocation2 + $0xf8] sm:$0xff] }
  0x4f   : > { %547 = vst.msk [vmem:[#allocation4 + $0xa8] sm:$0xff] %vm415_vm0, %v4468_v34 }
  0x50   : > { %1207 = vrot.lane.b32.xlu1 %v1718_v39, %s4052_s26 }
  0x52   : > { %1398 = vrot.lane.b32.xlu0 %v1910_v40, %s4053_s27 }
  0x54   : > { %1976 = vrot.lane.b32.xlu1 %v1911_v43, %s4056_s21 }
  0x56   : > { %632 = vrot.lane.b32.xlu0 %v1718_v39, %s4050_s24  ;;  %v1918_v39 = vld [vmem:[#allocation2 + $0x92] sm:$0xff] }
  0x58   : > { %823 = vrot.lane.b32.xlu1 %v1910_v40, %s4049_s23 }
  0x5a   : > { %1400 = vrot.lane.b32.xlu0 %v1911_v43, %s4053_s27 }
  0x5c   : > { %1592 = vrot.lane.b32.xlu1 %v4261_v22, %s4054_s28 }
  0x5e   : > { %825 = vrot.lane.b32.xlu0 %v1911_v43, %s4049_s23 }
  0x60   : > { %1016 = vrot.lane.b32.xlu1 %v4261_v22, %s4051_s25 }
  0x62   : > { %1594 = vrot.lane.b32.xlu0 %v4263_v23, %s4054_s28 }
  0x64   : > { %1785 = vrot.lane.b32.xlu1 %v1719_v47, %s4055_s29 }
  0x66   : > { %1018 = vrot.lane.b32.xlu0 %v4263_v23, %s4051_s25 }
  0x68   : > { %1209 = vrot.lane.b32.xlu1 %v1719_v47, %s4052_s26 }
  0x6a   : > { %1787 = vrot.lane.b32.xlu0 %v1720_v49, %s4055_s29 }
  0x6c   : > { %1978 = vrot.lane.b32.xlu1 %v1912_v50, %s4056_s21 }
  0x6e   : > { %634 = vrot.lane.b32.xlu0 %v1719_v47, %s4050_s24 }
  0x70   : > { %1211 = vrot.lane.b32.xlu1 %v1720_v49, %s4052_s26 }
  0x72   : > { %1402 = vrot.lane.b32.xlu0 %v1912_v50, %s4053_s27 }
  0x74   : > { %1980 = vrot.lane.b32.xlu1 %v1913_v51, %s4056_s21 }
  0x76   : > { %636 = vrot.lane.b32.xlu0 %v1720_v49, %s4050_s24  ;;  %v403_v49 = vld [vmem:[%s4227_s22 + $0xa0] sm:$0xff] }
  0x77   : > { %482 = vst.msk [vmem:[#allocation2 + $0x109] sm:$0xff] %vm415_vm0, %v403_v49 }
  0x78   : > { %827 = vrot.lane.b32.xlu1 %v1912_v50, %s4049_s23 }
  0x7a   : > { %1404 = vrot.lane.b32.xlu0 %v1913_v51, %s4053_s27 }
  0x7c   : > { %1596 = vrot.lane.b32.xlu1 %v4271_v24, %s4054_s28 }
  0x7e   : > { %829 = vrot.lane.b32.xlu0 %v1913_v51, %s4049_s23 }
  0x80   : > { %1020 = vrot.lane.b32.xlu1 %v4271_v24, %s4051_s25 }
  0x82   : > { %1598 = vrot.lane.b32.xlu0 %v4273_v25, %s4054_s28 }
  0x84   : > { %1789 = vrot.lane.b32.xlu1 %v1721_v55, %s4055_s29 }
  0x86   : > { %1022 = vrot.lane.b32.xlu0 %v4273_v25, %s4051_s25  ;;  %v816_v61 = vpop.permute.xlu1 %815 }
  0x87   : > { %v623_v62 = vpop.permute.xlu0 %622 }
  0x88   : > { %1213 = vrot.lane.b32.xlu1 %v1721_v55, %s4052_s26  ;;  %719 = vst.msk [vmem:[#allocation4] sm:$0xff] %vm718_vm4, %v623_v62 }
  0x89   : > { %912 = vst.msk [vmem:[#allocation4] sm:$0xff] %vm911_vm5, %v816_v61 }
  0x8a   : > { %1791 = vrot.lane.b32.xlu0 %v1722_v57, %s4055_s29 }
  0x8c   : > { %1982 = vrot.lane.b32.xlu1 %v1914_v58, %s4056_s21 }
  0x8e   : > { %638 = vrot.lane.b32.xlu0 %v1721_v55, %s4050_s24  ;;  %v4502_v55 = vld [vmem:[#allocation2 + $0x108] sm:$0xff] }
  0x8f   : > { %548 = vst.msk [vmem:[#allocation4 + $0xb0] sm:$0xff] %vm415_vm0, %v4502_v55 }
  0x90   : > { %1215 = vrot.lane.b32.xlu1 %v1722_v57, %s4052_s26 }
  0x92   : > { %1406 = vrot.lane.b32.xlu0 %v1914_v58, %s4053_s27 }
  0x94   : > { %1984 = vrot.lane.b32.xlu1 %v1915_v59, %s4056_s21 }
  0x96   : > { %640 = vrot.lane.b32.xlu0 %v1722_v57, %s4050_s24  ;;  %v404_v57 = vld [vmem:[%s4227_s22 + $0xa8] sm:$0xff] }
  0x97   : > { %483 = vst.msk [vmem:[#allocation2 + $0x111] sm:$0xff] %vm415_vm0, %v404_v57 }
  0x98   : > { %831 = vrot.lane.b32.xlu1 %v1914_v58, %s4049_s23  ;;  %v625_v1 = vpop.permute.xlu0 %624 }
  0x99   : > { %720 = vst.msk [vmem:[#allocation4 + $0x8] sm:$0xff] %vm718_vm4, %v625_v1 }
  0x9a   : > { %v818_v63 = vpop.permute.xlu1 %817  ;;  %1408 = vrot.lane.b32.xlu0 %v1915_v59, %s4053_s27 }
  0x9b   : > { %913 = vst.msk [vmem:[#allocation4 + $0x8] sm:$0xff] %vm911_vm5, %v818_v63 }
  0x9c   : > { %1600 = vrot.lane.b32.xlu1 %v4279_v28, %s4054_s28  ;;  %v1009_v5 = vpop.permute.xlu0 %1008 }
  0x9d   : > { %1105 = vst.msk [vmem:[#allocation4] sm:$0xff] %vm1104_vm6, %v1009_v5  ;;  %v1920_v5 = vld [vmem:[#allocation2 + $0xaa] sm:$0xff] }
  0x9e   : > { %v1011_v4 = vpop.permute.xlu1 %1010  ;;  %833 = vrot.lane.b32.xlu0 %v1915_v59, %s4049_s23  ;;  %v4518_v63 = vld [vmem:[#allocation2 + $0x110] sm:$0xff] }
  0x9f   : > { %1106 = vst.msk [vmem:[#allocation4 + $0x8] sm:$0xff] %vm1104_vm6, %v1011_v4  ;;  %v1728_v4 = vld [vmem:[#allocation2 + $0xb1] sm:$0xff] }
  0xa0   : > { %1024 = vrot.lane.b32.xlu1 %v4279_v28, %s4051_s25  ;;  %v1202_v7 = vpop.permute.xlu0 %1201  ;;  %549 = vst.msk [vmem:[#allocation4 + $0xb8] sm:$0xff] %vm415_vm0, %v4518_v63 }
  0xa1   : > { %1298 = vst.msk [vmem:[#allocation4] sm:$0xff] %vm1297_vm7, %v1202_v7 }
  0xa2   : > { %v627_v8 = vpop.permute.xlu1 %626  ;;  %1602 = vrot.lane.b32.xlu0 %v4281_v29, %s4054_s28 }
  0xa3   : > { %721 = vst.msk [vmem:[#allocation4 + $0x10] sm:$0xff] %vm718_vm4, %v627_v8 }
  0xa4   : > { %1793 = vrot.lane.b32.xlu1 %v1723_v6, %s4055_s29  ;;  %v1204_v10 = vpop.permute.xlu0 %1203 }
  0xa5   : > { %1299 = vst.msk [vmem:[#allocation4 + $0x8] sm:$0xff] %vm1297_vm7, %v1204_v10 }
  0xa6   : > { %v1395_v11 = vpop.permute.xlu1 %1394  ;;  %1026 = vrot.lane.b32.xlu0 %v4281_v29, %s4051_s25 }
  0xa7   : > { %1491 = vst.msk [vmem:[#allocation4] sm:$0xff] %vm1490_vm8, %v1395_v11 }
  0xa8   : > { %1217 = vrot.lane.b32.xlu1 %v1723_v6, %s4052_s26  ;;  %v629_v14 = vpop.permute.xlu0 %628 }
  0xa9   : > { %722 = vst.msk [vmem:[#allocation4 + $0x18] sm:$0xff] %vm718_vm4, %v629_v14  ;;  %v405_v14 = vld [vmem:[%s4227_s22 + $0xb0] sm:$0xff] }
  0xaa   : > { %v820_v15 = vpop.permute.xlu1 %819  ;;  %1795 = vrot.lane.b32.xlu0 %v1724_v12, %s4055_s29  ;;  %484 = vst.msk [vmem:[#allocation2 + $0x121] sm:$0xff] %vm415_vm0, %v405_v14 }
  0xab   : > { %914 = vst.msk [vmem:[#allocation4 + $0x10] sm:$0xff] %vm911_vm5, %v820_v15 }
  0xac   : > { %1986 = vrot.lane.b32.xlu1 %v1916_v13, %s4056_s21  ;;  %v1397_v16 = vpop.permute.xlu0 %1396 }
  0xad   : > { %1492 = vst.msk [vmem:[#allocation4 + $0x8] sm:$0xff] %vm1490_vm8, %v1397_v16 }
  0xae   : > { %v1589_v17 = vpop.permute.xlu1 %1588  ;;  %642 = vrot.lane.b32.xlu0 %v1723_v6, %s4050_s24 }
  0xaf   : > { %1685 = vst.msk [vmem:[#allocation4] sm:$0xff] %vm1684_vm9, %v1589_v17 }
  0xb0   : > { %1219 = vrot.lane.b32.xlu1 %v1724_v12, %s4052_s26  ;;  %v822_v19 = vpop.permute.xlu0 %821 }
  0xb1   : > { %915 = vst.msk [vmem:[#allocation4 + $0x18] sm:$0xff] %vm911_vm5, %v822_v19  ;;  %v4552_v19 = vld [vmem:[#allocation2 + $0x120] sm:$0xff] }
  0xb2   : > { %v1013_v20 = vpop.permute.xlu1 %1012  ;;  %1410 = vrot.lane.b32.xlu0 %v1916_v13, %s4053_s27  ;;  %550 = vst.msk [vmem:[#allocation4 + $0xc0] sm:$0xff] %vm415_vm0, %v4552_v19 }
  0xb3   : > { %1107 = vst.msk [vmem:[#allocation4 + $0x10] sm:$0xff] %vm1104_vm6, %v1013_v20  ;;  %v406_v20 = vld [vmem:[%s4227_s22 + $0xb8] sm:$0xff] }
  0xb4   : > { %1988 = vrot.lane.b32.xlu1 %v1917_v18, %s4056_s21  ;;  %v1591_v22 = vpop.permute.xlu0 %1590  ;;  %485 = vst.msk [vmem:[#allocation2 + $0x129] sm:$0xff] %vm415_vm0, %v406_v20 }
  0xb5   : > { %1686 = vst.msk [vmem:[#allocation4 + $0x8] sm:$0xff] %vm1684_vm9, %v1591_v22 }
  0xb6   : > { %v1782_v23 = vpop.permute.xlu1 %1781  ;;  %644 = vrot.lane.b32.xlu0 %v1724_v12, %s4050_s24 }
  0xb7   : > { %1878 = vst.msk [vmem:[#allocation4] sm:$0xff] %vm1877_vm10, %v1782_v23  ;;  %v1729_v23 = vld [vmem:[#allocation2 + $0xc1] sm:$0xff] }
  0xb8   : > { %835 = vrot.lane.b32.xlu1 %v1916_v13, %s4049_s23  ;;  %v1015_v24 = vpop.permute.xlu0 %1014 }
  0xb9   : > { %1108 = vst.msk [vmem:[#allocation4 + $0x18] sm:$0xff] %vm1104_vm6, %v1015_v24 }
  0xba   : > { %v1206_v25 = vpop.permute.xlu1 %1205  ;;  %1412 = vrot.lane.b32.xlu0 %v1917_v18, %s4053_s27 }
  0xbb   : > { %1300 = vst.msk [vmem:[#allocation4 + $0x10] sm:$0xff] %vm1297_vm7, %v1206_v25  ;;  %v4568_v27 = vld [vmem:[#allocation2 + $0x128] sm:$0xff] }
  0xbc   : > { %1604 = vrot.lane.b32.xlu1 %v4296_v33, %s4054_s28  ;;  %v1784_v28 = vpop.permute.xlu0 %1783  ;;  %551 = vst.msk [vmem:[#allocation4 + $0xc8] sm:$0xff] %vm415_vm0, %v4568_v27 }
  0xbd   : > { %1879 = vst.msk [vmem:[#allocation4 + $0x8] sm:$0xff] %vm1877_vm10, %v1784_v28 }
  0xbe   : > { %v1975_v29 = vpop.permute.xlu1 %1974  ;;  %837 = vrot.lane.b32.xlu0 %v1917_v18, %s4049_s23 }
  0xbf   : > { %2071 = vst.msk [vmem:[#allocation4] sm:$0xff] %vm2070_vm11, %v1975_v29 }
  0xc0   : > { %1028 = vrot.lane.b32.xlu1 %v4296_v33, %s4051_s25  ;;  %v631_v31 = vpop.permute.xlu0 %630 }
  0xc1   : > { %723 = vst.msk [vmem:[#allocation4 + $0x20] sm:$0xff] %vm718_vm4, %v631_v31  ;;  %v1922_v31 = vld [vmem:[#allocation2 + $0xc2] sm:$0xff] }
  0xc2   : > { %v1208_v32 = vpop.permute.xlu1 %1207  ;;  %1606 = vrot.lane.b32.xlu0 %v4303_v35, %s4054_s28 }
  0xc3   : > { %1301 = vst.msk [vmem:[#allocation4 + $0x18] sm:$0xff] %vm1297_vm7, %v1208_v32 }
  0xc4   : > { %1797 = vrot.lane.b32.xlu1 %v1725_v30, %s4055_s29  ;;  %v1399_v36 = vpop.permute.xlu0 %1398 }
  0xc5   : > { %1493 = vst.msk [vmem:[#allocation4 + $0x10] sm:$0xff] %vm1490_vm8, %v1399_v36 }
  0xc6   : > { %v1977_v33 = vpop.permute.xlu1 %1976  ;;  %v2103_v37 = vld [vmem:[#allocation4] sm:$0xff]  ;;  %1030 = vrot.lane.b32.xlu0 %v4303_v35, %s4051_s25  ;;  %v1919_v35 = vld [vmem:[#allocation2 + $0x9a] sm:$0xff] }
  0xc7   : > { %2072 = vst.msk [vmem:[#allocation4 + $0x8] sm:$0xff] %vm2070_vm11, %v1977_v33  ;;  %3885 = vmatprep.mubr.msk.f32.mxu0 %vm2140_vm12, %v2103_v37 }
  0xc8   : > { %1221 = vrot.lane.b32.xlu1 %v1725_v30, %s4052_s26  ;;  %v633_v40 = vpop.permute.xlu0 %632 }
  0xc9   : > { %724 = vst.msk [vmem:[#allocation4 + $0x28] sm:$0xff] %vm718_vm4, %v633_v40 }
  0xca   : > { %v824_v41 = vpop.permute.xlu1 %823  ;;  %1799 = vrot.lane.b32.xlu0 %v1726_v38, %s4055_s29 }
  0xcb   : > { %916 = vst.msk [vmem:[#allocation4 + $0x20] sm:$0xff] %vm911_vm5, %v824_v41  ;;  %v407_v41 = vld [vmem:[%s4227_s22 + $0xc0] sm:$0xff] }
  0xcc   : > { %1990 = vrot.lane.b32.xlu1 %v1918_v39, %s4056_s21  ;;  %v1401_v42 = vpop.permute.xlu0 %1400  ;;  %486 = vst.msk [vmem:[#allocation2 + $0x139] sm:$0xff] %vm415_vm0, %v407_v41 }
  0xcd   : > { %1494 = vst.msk [vmem:[#allocation4 + $0x18] sm:$0xff] %vm1490_vm8, %v1401_v42 }
  0xce   : > { %v1593_v43 = vpop.permute.xlu1 %1592  ;;  %v2104_v44 = vld [vmem:[#allocation4 + $0x8] sm:$0xff]  ;;  %646 = vrot.lane.b32.xlu0 %v1725_v30, %s4050_s24  ;;  %v1730_v30 = vld [vmem:[#allocation2 + $0xc9] sm:$0xff] }
  0xcf   : > { %1687 = vst.msk [vmem:[#allocation4 + $0x10] sm:$0xff] %vm1684_vm9, %v1593_v43  ;;  %3886 = vmatmul.mubr.msk.f32.vlgmr.msra.gmra.mxu0 %vm2140_vm12, %v2104_v44 }
  0xd0   : > { %1223 = vrot.lane.b32.xlu1 %v1726_v38, %s4052_s26  ;;  %v826_v46 = vpop.permute.xlu0 %825 }
  0xd1   : > { %917 = vst.msk [vmem:[#allocation4 + $0x28] sm:$0xff] %vm911_vm5, %v826_v46 }
  0xd2   : > { %v1017_v47 = vpop.permute.xlu1 %1016  ;;  %1414 = vrot.lane.b32.xlu0 %v1918_v39, %s4053_s27 }
  0xd3   : > { %1109 = vst.msk [vmem:[#allocation4 + $0x20] sm:$0xff] %vm1104_vm6, %v1017_v47  ;;  %v4606_v46 = vld [vmem:[#allocation2 + $0x138] sm:$0xff]  ;;  %v408_v47 = vld [vmem:[%s4227_s22 + $0xc8] sm:$0xff] }
  0xd4   : > { %1992 = vrot.lane.b32.xlu1 %v1919_v35, %s4056_s21  ;;  %v1595_v50 = vpop.permute.xlu0 %1594  ;;  %487 = vst.msk [vmem:[#allocation2 + $0x141] sm:$0xff] %vm415_vm0, %v408_v47  ;;  %552 = vst.msk [vmem:[#allocation4 + $0xd0] sm:$0xff] %vm415_vm0, %v4606_v46 }
  0xd5   : > { %1688 = vst.msk [vmem:[#allocation4 + $0x18] sm:$0xff] %vm1684_vm9, %v1595_v50 }
  0xd6   : > { %v1786_v51 = vpop.permute.xlu1 %1785  ;;  %648 = vrot.lane.b32.xlu0 %v1726_v38, %s4050_s24 }
  0xd7   : > { %1880 = vst.msk [vmem:[#allocation4 + $0x10] sm:$0xff] %vm1877_vm10, %v1786_v51  ;;  %v1731_v51 = vld [vmem:[#allocation2 + $0xd9] sm:$0xff] }
  0xd8   : > { %839 = vrot.lane.b32.xlu1 %v1918_v39, %s4049_s23  ;;  %v1019_v52 = vpop.permute.xlu0 %1018 }
  0xd9   : > { %1110 = vst.msk [vmem:[#allocation4 + $0x28] sm:$0xff] %vm1104_vm6, %v1019_v52 }
  0xda   : > { %v1210_v54 = vpop.permute.xlu1 %1209  ;;  %1416 = vrot.lane.b32.xlu0 %v1919_v35, %s4053_s27 }
  0xdb   : > { %1302 = vst.msk [vmem:[#allocation4 + $0x20] sm:$0xff] %vm1297_vm7, %v1210_v54  ;;  %v4622_v57 = vld [vmem:[#allocation2 + $0x140] sm:$0xff] }
  0xdc   : > { %1608 = vrot.lane.b32.xlu1 %v4336_v45, %s4054_s28  ;;  %v1788_v58 = vpop.permute.xlu0 %1787  ;;  %553 = vst.msk [vmem:[#allocation4 + $0xd8] sm:$0xff] %vm415_vm0, %v4622_v57 }
  0xdd   : > { %1881 = vst.msk [vmem:[#allocation4 + $0x18] sm:$0xff] %vm1877_vm10, %v1788_v58 }
  0xde   : > { %v1979_v59 = vpop.permute.xlu1 %1978  ;;  %841 = vrot.lane.b32.xlu0 %v1919_v35, %s4049_s23 }
  0xdf   : > { %2073 = vst.msk [vmem:[#allocation4 + $0x10] sm:$0xff] %vm2070_vm11, %v1979_v59 }
  0xe0   : > { %1032 = vrot.lane.b32.xlu1 %v4336_v45, %s4051_s25  ;;  %v635_v61 = vpop.permute.xlu0 %634 }
  0xe1   : > { %725 = vst.msk [vmem:[#allocation4 + $0x30] sm:$0xff] %vm718_vm4, %v635_v61  ;;  %v1924_v61 = vld [vmem:[#allocation2 + $0xda] sm:$0xff] }
  0xe2   : > { %v1212_v62 = vpop.permute.xlu1 %1211  ;;  %1610 = vrot.lane.b32.xlu0 %v4348_v48, %s4054_s28 }
  0xe3   : > { %1303 = vst.msk [vmem:[#allocation4 + $0x28] sm:$0xff] %vm1297_vm7, %v1212_v62 }
  0xe4   : > { %1801 = vrot.lane.b32.xlu1 %v1727_v60, %s4055_s29  ;;  %v1403_v1 = vpop.permute.xlu0 %1402 }
  0xe5   : > { %1495 = vst.msk [vmem:[#allocation4 + $0x20] sm:$0xff] %vm1490_vm8, %v1403_v1 }
  0xe6   : > { %v1981_v3 = vpop.permute.xlu1 %1980  ;;  %v2105_v45 = vld [vmem:[#allocation4 + $0x10] sm:$0xff]  ;;  %1034 = vrot.lane.b32.xlu0 %v4348_v48, %s4051_s25  ;;  %v1921_v48 = vld [vmem:[#allocation2 + $0xb2] sm:$0xff] }
  0xe7   : > { %2074 = vst.msk [vmem:[#allocation4 + $0x18] sm:$0xff] %vm2070_vm11, %v1981_v3  ;;  %3888 = vmatprep.mubr.msk.f32.mxu0 %vm2140_vm12, %v2105_v45 }
  0xe8   : > { %1225 = vrot.lane.b32.xlu1 %v1727_v60, %s4052_s26  ;;  %v637_v6 = vpop.permute.xlu0 %636 }
  0xe9   : > { %726 = vst.msk [vmem:[#allocation4 + $0x38] sm:$0xff] %vm718_vm4, %v637_v6 }
  0xea   : > { %v828_v7 = vpop.permute.xlu1 %827  ;;  %1803 = vrot.lane.b32.xlu0 %v1728_v4, %s4055_s29 }
  0xeb   : > { %918 = vst.msk [vmem:[#allocation4 + $0x30] sm:$0xff] %vm911_vm5, %v828_v7  ;;  %v409_v7 = vld [vmem:[%s4227_s22 + $0xd0] sm:$0xff] }
  0xec   : > { %1994 = vrot.lane.b32.xlu1 %v1920_v5, %s4056_s21  ;;  %v1405_v8 = vpop.permute.xlu0 %1404  ;;  %488 = vst.msk [vmem:[#allocation2 + $0x151] sm:$0xff] %vm415_vm0, %v409_v7 }
  0xed   : > { %1496 = vst.msk [vmem:[#allocation4 + $0x28] sm:$0xff] %vm1490_vm8, %v1405_v8 }
  0xee   : > { %v1597_v10 = vpop.permute.xlu1 %1596  ;;  %v2106_v11 = vld [vmem:[#allocation4 + $0x18] sm:$0xff]  ;;  %650 = vrot.lane.b32.xlu0 %v1727_v60, %s4050_s24 }
  0xef   : > { %1689 = vst.msk [vmem:[#allocation4 + $0x20] sm:$0xff] %vm1684_vm9, %v1597_v10  ;;  %3889 = vmatmul.mubr.msk.f32.gmra.mxu0 %vm2140_vm12, %v2106_v11  ;;  %v1732_v60 = vld [vmem:[#allocation2 + $0xe1] sm:$0xff] }
  0xf0   : > { %1227 = vrot.lane.b32.xlu1 %v1728_v4, %s4052_s26  ;;  %v830_v12 = vpop.permute.xlu0 %829 }
  0xf1   : > { %919 = vst.msk [vmem:[#allocation4 + $0x38] sm:$0xff] %vm911_vm5, %v830_v12 }
  0xf2   : > { %v1021_v13 = vpop.permute.xlu1 %1020  ;;  %1418 = vrot.lane.b32.xlu0 %v1920_v5, %s4053_s27 }
  0xf3   : > { %1111 = vst.msk [vmem:[#allocation4 + $0x30] sm:$0xff] %vm1104_vm6, %v1021_v13  ;;  %v4656_v12 = vld [vmem:[#allocation2 + $0x150] sm:$0xff]  ;;  %v410_v13 = vld [vmem:[%s4227_s22 + $0xd8] sm:$0xff] }
  0xf4   : > { %1996 = vrot.lane.b32.xlu1 %v1921_v48, %s4056_s21  ;;  %v1599_v15 = vpop.permute.xlu0 %1598  ;;  %489 = vst.msk [vmem:[#allocation2 + $0x159] sm:$0xff] %vm415_vm0, %v410_v13  ;;  %554 = vst.msk [vmem:[#allocation4 + $0xe0] sm:$0xff] %vm415_vm0, %v4656_v12 }
  0xf5   : > { %1690 = vst.msk [vmem:[#allocation4 + $0x28] sm:$0xff] %vm1684_vm9, %v1599_v15 }
  0xf6   : > { %v1790_v16 = vpop.permute.xlu1 %1789  ;;  %652 = vrot.lane.b32.xlu0 %v1728_v4, %s4050_s24 }
  0xf7   : > { %1882 = vst.msk [vmem:[#allocation4 + $0x20] sm:$0xff] %vm1877_vm10, %v1790_v16  ;;  %v1733_v16 = vld [vmem:[#allocation2 + $0xf1] sm:$0xff] }
  0xf8   : > { %843 = vrot.lane.b32.xlu1 %v1920_v5, %s4049_s23  ;;  %v1023_v17 = vpop.permute.xlu0 %1022 }
  0xf9   : > { %1112 = vst.msk [vmem:[#allocation4 + $0x38] sm:$0xff] %vm1104_vm6, %v1023_v17 }
  0xfa   : > { %v1214_v18 = vpop.permute.xlu1 %1213  ;;  %1420 = vrot.lane.b32.xlu0 %v1921_v48, %s4053_s27 }
  0xfb   : > { %1304 = vst.msk [vmem:[#allocation4 + $0x30] sm:$0xff] %vm1297_vm7, %v1214_v18  ;;  %v4672_v20 = vld [vmem:[#allocation2 + $0x158] sm:$0xff] }
  0xfc   : > { %1612 = vrot.lane.b32.xlu1 %v4368_v53, %s4054_s28  ;;  %v1792_v21 = vpop.permute.xlu0 %1791  ;;  %555 = vst.msk [vmem:[#allocation4 + $0xe8] sm:$0xff] %vm415_vm0, %v4672_v20 }
  0xfd   : > { %1883 = vst.msk [vmem:[#allocation4 + $0x28] sm:$0xff] %vm1877_vm10, %v1792_v21 }
  0xfe   : > { %v1983_v22 = vpop.permute.xlu1 %1982  ;;  %845 = vrot.lane.b32.xlu0 %v1921_v48, %s4049_s23 }
  0xff   : > { %2075 = vst.msk [vmem:[#allocation4 + $0x20] sm:$0xff] %vm2070_vm11, %v1983_v22 }
 0x100   : > { %1036 = vrot.lane.b32.xlu1 %v4368_v53, %s4051_s25  ;;  %v639_v24 = vpop.permute.xlu0 %638 }
 0x101   : > { %727 = vst.msk [vmem:[#allocation4 + $0x40] sm:$0xff] %vm718_vm4, %v639_v24  ;;  %v1926_v24 = vld [vmem:[#allocation2 + $0xf2] sm:$0xff] }
 0x102   : > { %v1216_v25 = vpop.permute.xlu1 %1215  ;;  %1614 = vrot.lane.b32.xlu0 %v4380_v56, %s4054_s28 }
 0x103   : > { %1305 = vst.msk [vmem:[#allocation4 + $0x38] sm:$0xff] %vm1297_vm7, %v1216_v25 }
 0x104   : > { %1805 = vrot.lane.b32.xlu1 %v1729_v23, %s4055_s29  ;;  %v1407_v28 = vpop.permute.xlu0 %1406 }
 0x105   : > { %1497 = vst.msk [vmem:[#allocation4 + $0x30] sm:$0xff] %vm1490_vm8, %v1407_v28 }
 0x106   : > { %v1985_v29 = vpop.permute.xlu1 %1984  ;;  %v2107_v53 = vld [vmem:[#allocation4 + $0x20] sm:$0xff]  ;;  %1038 = vrot.lane.b32.xlu0 %v4380_v56, %s4051_s25 }
 0x107   : > { %2076 = vst.msk [vmem:[#allocation4 + $0x28] sm:$0xff] %vm2070_vm11, %v1985_v29  ;;  %3891 = vmatprep.mubr.msk.f32.mxu0 %vm2140_vm12, %v2107_v53  ;;  %v1923_v56 = vld [vmem:[#allocation2 + $0xca] sm:$0xff] }
 0x108   : > { %1229 = vrot.lane.b32.xlu1 %v1729_v23, %s4052_s26  ;;  %v641_v32 = vpop.permute.xlu0 %640 }
 0x109   : > { %728 = vst.msk [vmem:[#allocation4 + $0x48] sm:$0xff] %vm718_vm4, %v641_v32 }
 0x10a   : > { %v832_v36 = vpop.permute.xlu1 %831  ;;  %1807 = vrot.lane.b32.xlu0 %v1730_v30, %s4055_s29 }
 0x10b   : > { %920 = vst.msk [vmem:[#allocation4 + $0x40] sm:$0xff] %vm911_vm5, %v832_v36  ;;  %v411_v36 = vld [vmem:[%s4227_s22 + $0xe0] sm:$0xff] }
 0x10c   : > { %1998 = vrot.lane.b32.xlu1 %v1922_v31, %s4056_s21  ;;  %v1409_v33 = vpop.permute.xlu0 %1408  ;;  %490 = vst.msk [vmem:[#allocation2 + $0x169] sm:$0xff] %vm415_vm0, %v411_v36 }
 0x10d   : > { %1498 = vst.msk [vmem:[#allocation4 + $0x38] sm:$0xff] %vm1490_vm8, %v1409_v33 }
 0x10e   : > { %v1601_v37 = vpop.permute.xlu1 %1600  ;;  %v2108_v38 = vld [vmem:[#allocation4 + $0x28] sm:$0xff]  ;;  %654 = vrot.lane.b32.xlu0 %v1729_v23, %s4050_s24 }
 0x10f   : > { %1691 = vst.msk [vmem:[#allocation4 + $0x30] sm:$0xff] %vm1684_vm9, %v1601_v37  ;;  %3892 = vmatmul.mubr.msk.f32.gmra.mxu0 %vm2140_vm12, %v2108_v38  ;;  %v1734_v23 = vld [vmem:[#allocation2 + $0xf9] sm:$0xff] }
 0x110   : > { %1231 = vrot.lane.b32.xlu1 %v1730_v30, %s4052_s26  ;;  %v834_v39 = vpop.permute.xlu0 %833 }
 0x111   : > { %921 = vst.msk [vmem:[#allocation4 + $0x48] sm:$0xff] %vm911_vm5, %v834_v39 }
 0x112   : > { %v1025_v40 = vpop.permute.xlu1 %1024  ;;  %1422 = vrot.lane.b32.xlu0 %v1922_v31, %s4053_s27 }
 0x113   : > { %1113 = vst.msk [vmem:[#allocation4 + $0x40] sm:$0xff] %vm1104_vm6, %v1025_v40  ;;  %v4742_v39 = vld [vmem:[#allocation2 + $0x168] sm:$0xff] }
 0x114   : > { %2000 = vrot.lane.b32.xlu1 %v1923_v56, %s4056_s21  ;;  %v1603_v42 = vpop.permute.xlu0 %1602  ;;  %v412_v40 = vld [vmem:[%s4227_s22 + $0xe8] sm:$0xff]  ;;  %556 = vst.msk [vmem:[#allocation4 + $0xf0] sm:$0xff] %vm415_vm0, %v4742_v39 }
 0x115   : > { %1692 = vst.msk [vmem:[#allocation4 + $0x38] sm:$0xff] %vm1684_vm9, %v1603_v42 }
 0x116   : > { %v1794_v43 = vpop.permute.xlu1 %1793  ;;  %656 = vrot.lane.b32.xlu0 %v1730_v30, %s4050_s24  ;;  %491 = vst.msk [vmem:[#allocation2 + $0x171] sm:$0xff] %vm415_vm0, %v412_v40 }
 0x117   : > { %1884 = vst.msk [vmem:[#allocation4 + $0x30] sm:$0xff] %vm1877_vm10, %v1794_v43  ;;  %v1735_v43 = vld [vmem:[#allocation2 + $0x109] sm:$0xff] }
 0x118   : > { %847 = vrot.lane.b32.xlu1 %v1922_v31, %s4049_s23  ;;  %v1027_v44 = vpop.permute.xlu0 %1026 }
 0x119   : > { %1114 = vst.msk [vmem:[#allocation4 + $0x48] sm:$0xff] %vm1104_vm6, %v1027_v44 }
 0x11a   : > { %v1218_v35 = vpop.permute.xlu1 %1217  ;;  %1424 = vrot.lane.b32.xlu0 %v1923_v56, %s4053_s27 }
 0x11b   : > { %1306 = vst.msk [vmem:[#allocation4 + $0x40] sm:$0xff] %vm1297_vm7, %v1218_v35 }
 0x11c   : > { %1616 = vrot.lane.b32.xlu1 %v4403_v2, %s4054_s28  ;;  %v1796_v49 = vpop.permute.xlu0 %1795 }
 0x11d   : > { %1885 = vst.msk [vmem:[#allocation4 + $0x38] sm:$0xff] %vm1877_vm10, %v1796_v49  ;;  %v4758_v47 = vld [vmem:[#allocation2 + $0x170] sm:$0xff] }
 0x11e   : > { %v1987_v50 = vpop.permute.xlu1 %1986  ;;  %849 = vrot.lane.b32.xlu0 %v1923_v56, %s4049_s23  ;;  %557 = vst.msk [vmem:[#allocation4 + $0xf8] sm:$0xff] %vm415_vm0, %v4758_v47 }
 0x11f   : > { %2077 = vst.msk [vmem:[#allocation4 + $0x30] sm:$0xff] %vm2070_vm11, %v1987_v50 }
 0x120   : > { %1040 = vrot.lane.b32.xlu1 %v4403_v2, %s4051_s25  ;;  %v643_v52 = vpop.permute.xlu0 %642 }
 0x121   : > { %729 = vst.msk [vmem:[#allocation4 + $0x50] sm:$0xff] %vm718_vm4, %v643_v52  ;;  %v1928_v52 = vld [vmem:[#allocation2 + $0x10a] sm:$0xff] }
 0x122   : > { %v1220_v54 = vpop.permute.xlu1 %1219  ;;  %1618 = vrot.lane.b32.xlu0 %v4420_v9, %s4054_s28 }
 0x123   : > { %1307 = vst.msk [vmem:[#allocation4 + $0x48] sm:$0xff] %vm1297_vm7, %v1220_v54 }
 0x124   : > { %1809 = vrot.lane.b32.xlu1 %v1731_v51, %s4055_s29  ;;  %v1411_v58 = vpop.permute.xlu0 %1410 }
 0x125   : > { %1499 = vst.msk [vmem:[#allocation4 + $0x40] sm:$0xff] %vm1490_vm8, %v1411_v58 }
 0x126   : > { %v1989_v59 = vpop.permute.xlu1 %1988  ;;  %v2109_v2 = vld [vmem:[#allocation4 + $0x30] sm:$0xff]  ;;  %1042 = vrot.lane.b32.xlu0 %v4420_v9, %s4051_s25 }
 0x127   : > { %2078 = vst.msk [vmem:[#allocation4 + $0x38] sm:$0xff] %vm2070_vm11, %v1989_v59  ;;  %3894 = vmatprep.mubr.msk.f32.mxu0 %vm2140_vm12, %v2109_v2  ;;  %v1925_v9 = vld [vmem:[#allocation2 + $0xe2] sm:$0xff] }
 0x128   : > { %1233 = vrot.lane.b32.xlu1 %v1731_v51, %s4052_s26  ;;  %v645_v62 = vpop.permute.xlu0 %644 }
 0x129   : > { %730 = vst.msk [vmem:[#allocation4 + $0x58] sm:$0xff] %vm718_vm4, %v645_v62 }
 0x12a   : > { %v836_v1 = vpop.permute.xlu1 %835  ;;  %1811 = vrot.lane.b32.xlu0 %v1732_v60, %s4055_s29 }
 0x12b   : > { %922 = vst.msk [vmem:[#allocation4 + $0x50] sm:$0xff] %vm911_vm5, %v836_v1  ;;  %v413_v1 = vld [vmem:[%s4227_s22 + $0xf0] sm:$0xff] }
 0x12c   : > { %2002 = vrot.lane.b32.xlu1 %v1924_v61, %s4056_s21  ;;  %v1413_v3 = vpop.permute.xlu0 %1412  ;;  %492 = vst.msk [vmem:[#allocation2 + $0x181] sm:$0xff] %vm415_vm0, %v413_v1 }
 0x12d   : > { %1500 = vst.msk [vmem:[#allocation4 + $0x48] sm:$0xff] %vm1490_vm8, %v1413_v3 }
 0x12e   : > { %v1605_v45 = vpop.permute.xlu1 %1604  ;;  %v2110_v4 = vld [vmem:[#allocation4 + $0x38] sm:$0xff]  ;;  %658 = vrot.lane.b32.xlu0 %v1731_v51, %s4050_s24  ;;  %v1736_v51 = vld [vmem:[#allocation2 + $0x111] sm:$0xff] }
 0x12f   : > { %1693 = vst.msk [vmem:[#allocation4 + $0x40] sm:$0xff] %vm1684_vm9, %v1605_v45  ;;  %3895 = vmatmul.mubr.msk.f32.gmra.mxu0 %vm2140_vm12, %v2110_v4 }
 0x130   : > { %1235 = vrot.lane.b32.xlu1 %v1732_v60, %s4052_s26  ;;  %v838_v5 = vpop.permute.xlu0 %837 }
 0x131   : > { %923 = vst.msk [vmem:[#allocation4 + $0x58] sm:$0xff] %vm911_vm5, %v838_v5  ;;  %v414_v5 = vld [vmem:[%s4227_s22 + $0xf8] sm:$0xff] }
 0x132   : > { %v1029_v6 = vpop.permute.xlu1 %1028  ;;  %1426 = vrot.lane.b32.xlu0 %v1924_v61, %s4053_s27  ;;  %493 = vst.msk [vmem:[#allocation2 + $0x189] sm:$0xff] %vm415_vm0, %v414_v5  ;;  %vm2788_vm0 = vcmask 130112  }
 0x133   : > { %1115 = vst.msk [vmem:[#allocation4 + $0x50] sm:$0xff] %vm1104_vm6, %v1029_v6 }
 0x134   : > { %2004 = vrot.lane.b32.xlu1 %v1925_v9, %s4056_s21  ;;  %v1607_v8 = vpop.permute.xlu0 %1606 }
 0x135   : > { %1694 = vst.msk [vmem:[#allocation4 + $0x48] sm:$0xff] %vm1684_vm9, %v1607_v8  ;;  %v1737_v8 = vld [vmem:[#allocation2 + $0x121] sm:$0xff] }
 0x136   : > { %v1798_v10 = vpop.permute.xlu1 %1797  ;;  %660 = vrot.lane.b32.xlu0 %v1732_v60, %s4050_s24 }
 0x137   : > { %1886 = vst.msk [vmem:[#allocation4 + $0x40] sm:$0xff] %vm1877_vm10, %v1798_v10 }
 0x138   : > { %851 = vrot.lane.b32.xlu1 %v1924_v61, %s4049_s23  ;;  %v1031_v11 = vpop.permute.xlu0 %1030 }
 0x139   : > { %1116 = vst.msk [vmem:[#allocation4 + $0x58] sm:$0xff] %vm1104_vm6, %v1031_v11 }
 0x13a   : > { %v1222_v48 = vpop.permute.xlu1 %1221  ;;  %1428 = vrot.lane.b32.xlu0 %v1925_v9, %s4053_s27 }
 0x13b   : > { %1308 = vst.msk [vmem:[#allocation4 + $0x50] sm:$0xff] %vm1297_vm7, %v1222_v48 }
 0x13c   : > { %1620 = vrot.lane.b32.xlu1 %v4452_v26, %s4054_s28  ;;  %v1800_v14 = vpop.permute.xlu0 %1799 }
 0x13d   : > { %1887 = vst.msk [vmem:[#allocation4 + $0x48] sm:$0xff] %vm1877_vm10, %v1800_v14 }
 0x13e   : > { %v1991_v15 = vpop.permute.xlu1 %1990  ;;  %853 = vrot.lane.b32.xlu0 %v1925_v9, %s4049_s23 }
 0x13f   : > { %2079 = vst.msk [vmem:[#allocation4 + $0x40] sm:$0xff] %vm2070_vm11, %v1991_v15  ;;  %v1930_v15 = vld [vmem:[#allocation2 + $0x122] sm:$0xff] }
 0x140   : > { %1044 = vrot.lane.b32.xlu1 %v4452_v26, %s4051_s25  ;;  %v647_v17 = vpop.permute.xlu0 %646 }
 0x141   : > { %731 = vst.msk [vmem:[#allocation4 + $0x60] sm:$0xff] %vm718_vm4, %v647_v17 }
 0x142   : > { %v1224_v18 = vpop.permute.xlu1 %1223  ;;  %1622 = vrot.lane.b32.xlu0 %v4468_v34, %s4054_s28 }
 0x143   : > { %1309 = vst.msk [vmem:[#allocation4 + $0x58] sm:$0xff] %vm1297_vm7, %v1224_v18  ;;  %v4820_v18 = vld [vmem:[%s5597_s2] ss:$0 sm:$0xff] }
 0x144   : > { %1813 = vrot.lane.b32.xlu1 %v1733_v16, %s4055_s29  ;;  %v1415_v26 = vpop.permute.xlu0 %1414 }
 0x145   : > { %1501 = vst.msk [vmem:[#allocation4 + $0x50] sm:$0xff] %vm1490_vm8, %v1415_v26 }
 0x146   : > { %v1993_v21 = vpop.permute.xlu1 %1992  ;;  %v2111_v22 = vld [vmem:[#allocation4 + $0x40] sm:$0xff]  ;;  %1046 = vrot.lane.b32.xlu0 %v4468_v34, %s4051_s25  ;;  %v1927_v34 = vld [vmem:[#allocation2 + $0xfa] sm:$0xff] }
 0x147   : > { %2080 = vst.msk [vmem:[#allocation4 + $0x48] sm:$0xff] %vm2070_vm11, %v1993_v21  ;;  %3897 = vmatprep.mubr.msk.f32.mxu0 %vm2140_vm12, %v2111_v22 }
 0x148   : > { %1237 = vrot.lane.b32.xlu1 %v1733_v16, %s4052_s26  ;;  %v649_v25 = vpop.permute.xlu0 %648 }
 0x149   : > { %732 = vst.msk [vmem:[#allocation4 + $0x68] sm:$0xff] %vm718_vm4, %v649_v25 }
 0x14a   : > { %v840_v28 = vpop.permute.xlu1 %839  ;;  %1815 = vrot.lane.b32.xlu0 %v1734_v23, %s4055_s29 }
 0x14b   : > { %924 = vst.msk [vmem:[#allocation4 + $0x60] sm:$0xff] %vm911_vm5, %v840_v28  ;;  %v1931_v28 = vld [vmem:[#allocation2 + $0x12a] sm:$0xff] }
 0x14c   : > { %2006 = vrot.lane.b32.xlu1 %v1926_v24, %s4056_s21  ;;  %v1417_v29 = vpop.permute.xlu0 %1416 }
 0x14d   : > { %1502 = vst.msk [vmem:[#allocation4 + $0x58] sm:$0xff] %vm1490_vm8, %v1417_v29 }
 0x14e   : > { %v1609_v53 = vpop.permute.xlu1 %1608  ;;  %v2112_v30 = vld [vmem:[#allocation4 + $0x48] sm:$0xff]  ;;  %662 = vrot.lane.b32.xlu0 %v1733_v16, %s4050_s24 }
 0x14f   : > { %1695 = vst.msk [vmem:[#allocation4 + $0x50] sm:$0xff] %vm1684_vm9, %v1609_v53  ;;  %3898 = vmatmul.mubr.msk.f32.gmra.mxu0 %vm2140_vm12, %v2112_v30 }
 0x150   : > { %1239 = vrot.lane.b32.xlu1 %v1734_v23, %s4052_s26  ;;  %v842_v31 = vpop.permute.xlu0 %841 }
 0x151   : > { %925 = vst.msk [vmem:[#allocation4 + $0x68] sm:$0xff] %vm911_vm5, %v842_v31 }
 0x152   : > { %v1033_v32 = vpop.permute.xlu1 %1032  ;;  %1430 = vrot.lane.b32.xlu0 %v1926_v24, %s4053_s27 }
 0x153   : > { %1117 = vst.msk [vmem:[#allocation4 + $0x60] sm:$0xff] %vm1104_vm6, %v1033_v32 }
 0x154   : > { %2008 = vrot.lane.b32.xlu1 %v1927_v34, %s4056_s21  ;;  %v1611_v33 = vpop.permute.xlu0 %1610 }
 0x155   : > { %1696 = vst.msk [vmem:[#allocation4 + $0x58] sm:$0xff] %vm1684_vm9, %v1611_v33 }
 0x156   : > { %v1802_v37 = vpop.permute.xlu1 %1801  ;;  %664 = vrot.lane.b32.xlu0 %v1734_v23, %s4050_s24  ;;  %v4827_v23 = vld [vmem:[%s5598_s3] ss:$0 sm:$0xff] }
 0x157   : > { %1888 = vst.msk [vmem:[#allocation4 + $0x50] sm:$0xff] %vm1877_vm10, %v1802_v37 }
 0x158   : > { %855 = vrot.lane.b32.xlu1 %v1926_v24, %s4049_s23  ;;  %v1035_v38 = vpop.permute.xlu0 %1034 }
 0x159   : > { %1118 = vst.msk [vmem:[#allocation4 + $0x68] sm:$0xff] %vm1104_vm6, %v1035_v38 }
 0x15a   : > { %v1226_v56 = vpop.permute.xlu1 %1225  ;;  %1432 = vrot.lane.b32.xlu0 %v1927_v34, %s4053_s27 }
 0x15b   : > { %1310 = vst.msk [vmem:[#allocation4 + $0x60] sm:$0xff] %vm1297_vm7, %v1226_v56 }
 0x15c   : > { %1624 = vrot.lane.b32.xlu1 %v4502_v55, %s4054_s28  ;;  %v1804_v41 = vpop.permute.xlu0 %1803 }
 0x15d   : > { %1889 = vst.msk [vmem:[#allocation4 + $0x58] sm:$0xff] %vm1877_vm10, %v1804_v41 }
 0x15e   : > { %v1995_v42 = vpop.permute.xlu1 %1994  ;;  %857 = vrot.lane.b32.xlu0 %v1927_v34, %s4049_s23 }
 0x15f   : > { %2081 = vst.msk [vmem:[#allocation4 + $0x50] sm:$0xff] %vm2070_vm11, %v1995_v42  ;;  %v1739_v42 = vld [vmem:[#allocation2 + $0x139] sm:$0xff] }
 0x160   : > { %1048 = vrot.lane.b32.xlu1 %v4502_v55, %s4051_s25  ;;  %v651_v44 = vpop.permute.xlu0 %650 }
 0x161   : > { %733 = vst.msk [vmem:[#allocation4 + $0x70] sm:$0xff] %vm718_vm4, %v651_v44 }
 0x162   : > { %v1228_v35 = vpop.permute.xlu1 %1227  ;;  %1626 = vrot.lane.b32.xlu0 %v4518_v63, %s4054_s28 }
 0x163   : > { %1311 = vst.msk [vmem:[#allocation4 + $0x68] sm:$0xff] %vm1297_vm7, %v1228_v35 }
 0x164   : > { %1817 = vrot.lane.b32.xlu1 %v1735_v43, %s4055_s29  ;;  %v1419_v49 = vpop.permute.xlu0 %1418 }
 0x165   : > { %1503 = vst.msk [vmem:[#allocation4 + $0x60] sm:$0xff] %vm1490_vm8, %v1419_v49 }
 0x166   : > { %v1997_v50 = vpop.permute.xlu1 %1996  ;;  %v2113_v55 = vld [vmem:[#allocation4 + $0x50] sm:$0xff]  ;;  %1050 = vrot.lane.b32.xlu0 %v4518_v63, %s4051_s25  ;;  %v1929_v63 = vld [vmem:[#allocation2 + $0x112] sm:$0xff] }
 0x167   : > { %2082 = vst.msk [vmem:[#allocation4 + $0x58] sm:$0xff] %vm2070_vm11, %v1997_v50  ;;  %3900 = vmatprep.mubr.msk.f32.mxu0 %vm2140_vm12, %v2113_v55  ;;  %v1932_v55 = vld [vmem:[#allocation2 + $0x13a] sm:$0xff] }
 0x168   : > { %1241 = vrot.lane.b32.xlu1 %v1735_v43, %s4052_s26  ;;  %v653_v54 = vpop.permute.xlu0 %652 }
 0x169   : > { %734 = vst.msk [vmem:[#allocation4 + $0x78] sm:$0xff] %vm718_vm4, %v653_v54 }
 0x16a   : > { %v844_v58 = vpop.permute.xlu1 %843  ;;  %1819 = vrot.lane.b32.xlu0 %v1736_v51, %s4055_s29 }
 0x16b   : > { %926 = vst.msk [vmem:[#allocation4 + $0x70] sm:$0xff] %vm911_vm5, %v844_v58 }
 0x16c   : > { %2010 = vrot.lane.b32.xlu1 %v1928_v52, %s4056_s21  ;;  %v1421_v59 = vpop.permute.xlu0 %1420 }
 0x16d   : > { %1504 = vst.msk [vmem:[#allocation4 + $0x68] sm:$0xff] %vm1490_vm8, %v1421_v59 }
 0x16e   : > { %v1613_v2 = vpop.permute.xlu1 %1612  ;;  %v2114_v60 = vld [vmem:[#allocation4 + $0x58] sm:$0xff]  ;;  %666 = vrot.lane.b32.xlu0 %v1735_v43, %s4050_s24 }
 0x16f   : > { %1697 = vst.msk [vmem:[#allocation4 + $0x60] sm:$0xff] %vm1684_vm9, %v1613_v2  ;;  %3901 = vmatmul.mubr.msk.f32.gmra.mxu0 %vm2140_vm12, %v2114_v60 }
 0x170   : > { %1243 = vrot.lane.b32.xlu1 %v1736_v51, %s4052_s26  ;;  %v846_v61 = vpop.permute.xlu0 %845 }
 0x171   : > { %927 = vst.msk [vmem:[#allocation4 + $0x78] sm:$0xff] %vm911_vm5, %v846_v61 }
 0x172   : > { %v1037_v62 = vpop.permute.xlu1 %1036  ;;  %1434 = vrot.lane.b32.xlu0 %v1928_v52, %s4053_s27 }
 0x173   : > { %1119 = vst.msk [vmem:[#allocation4 + $0x70] sm:$0xff] %vm1104_vm6, %v1037_v62 }
 0x174   : > { %2012 = vrot.lane.b32.xlu1 %v1929_v63, %s4056_s21  ;;  %v1615_v3 = vpop.permute.xlu0 %1614 }
 0x175   : > { %1698 = vst.msk [vmem:[#allocation4 + $0x68] sm:$0xff] %vm1684_vm9, %v1615_v3 }
 0x176   : > { %v1806_v45 = vpop.permute.xlu1 %1805  ;;  %668 = vrot.lane.b32.xlu0 %v1736_v51, %s4050_s24 }
 0x177   : > { %1890 = vst.msk [vmem:[#allocation4 + $0x60] sm:$0xff] %vm1877_vm10, %v1806_v45 }
 0x178   : > { %859 = vrot.lane.b32.xlu1 %v1928_v52, %s4049_s23  ;;  %v1039_v4 = vpop.permute.xlu0 %1038 }
 0x179   : > { %1120 = vst.msk [vmem:[#allocation4 + $0x78] sm:$0xff] %vm1104_vm6, %v1039_v4 }
 0x17a   : > { %v1230_v9 = vpop.permute.xlu1 %1229  ;;  %1436 = vrot.lane.b32.xlu0 %v1929_v63, %s4053_s27 }
 0x17b   : > { %1312 = vst.msk [vmem:[#allocation4 + $0x70] sm:$0xff] %vm1297_vm7, %v1230_v9 }
 0x17c   : > { %1628 = vrot.lane.b32.xlu1 %v4552_v19, %s4054_s28  ;;  %v1808_v6 = vpop.permute.xlu0 %1807 }
 0x17d   : > { %1891 = vst.msk [vmem:[#allocation4 + $0x68] sm:$0xff] %vm1877_vm10, %v1808_v6 }
 0x17e   : > { %v1999_v7 = vpop.permute.xlu1 %1998  ;;  %861 = vrot.lane.b32.xlu0 %v1929_v63, %s4049_s23  ;;  %v1933_v63 = vld [vmem:[#allocation2 + $0x142] sm:$0xff] }
 0x17f   : > { %2083 = vst.msk [vmem:[#allocation4 + $0x60] sm:$0xff] %vm2070_vm11, %v1999_v7 }
 0x180   : > { %1052 = vrot.lane.b32.xlu1 %v4552_v19, %s4051_s25  ;;  %v655_v10 = vpop.permute.xlu0 %654  ;;  %v1738_v19 = vld [vmem:[#allocation2 + $0x129] sm:$0xff] }
 0x181   : > { %735 = vst.msk [vmem:[#allocation4 + $0x80] sm:$0xff] %vm718_vm4, %v655_v10 }
 0x182   : > { %v1232_v11 = vpop.permute.xlu1 %1231  ;;  %1630 = vrot.lane.b32.xlu0 %v4568_v27, %s4054_s28 }
 0x183   : > { %1313 = vst.msk [vmem:[#allocation4 + $0x78] sm:$0xff] %vm1297_vm7, %v1232_v11 }
 0x184   : > { %1821 = vrot.lane.b32.xlu1 %v1737_v8, %s4055_s29  ;;  %v1423_v48 = vpop.permute.xlu0 %1422 }
 0x185   : > { %1505 = vst.msk [vmem:[#allocation4 + $0x70] sm:$0xff] %vm1490_vm8, %v1423_v48 }
 0x186   : > { %v2001_v13 = vpop.permute.xlu1 %2000  ;;  %v2115_v14 = vld [vmem:[#allocation4 + $0x60] sm:$0xff]  ;;  %1054 = vrot.lane.b32.xlu0 %v4568_v27, %s4051_s25 }
 0x187   : > { %2084 = vst.msk [vmem:[#allocation4 + $0x68] sm:$0xff] %vm2070_vm11, %v2001_v13  ;;  %3903 = vmatprep.mubr.msk.f32.mxu0 %vm2140_vm12, %v2115_v14 }
 0x188   : > { %1245 = vrot.lane.b32.xlu1 %v1737_v8, %s4052_s26  ;;  %v657_v16 = vpop.permute.xlu0 %656 }
 0x189   : > { %736 = vst.msk [vmem:[#allocation4 + $0x88] sm:$0xff] %vm718_vm4, %v657_v16 }
 0x18a   : > { %v848_v17 = vpop.permute.xlu1 %847  ;;  %1823 = vrot.lane.b32.xlu0 %v1738_v19, %s4055_s29 }
 0x18b   : > { %928 = vst.msk [vmem:[#allocation4 + $0x80] sm:$0xff] %vm911_vm5, %v848_v17  ;;  %v1741_v17 = vld [vmem:[#allocation2 + $0x151] sm:$0xff] }
 0x18c   : > { %2014 = vrot.lane.b32.xlu1 %v1930_v15, %s4056_s21  ;;  %v1425_v27 = vpop.permute.xlu0 %1424 }
 0x18d   : > { %1506 = vst.msk [vmem:[#allocation4 + $0x78] sm:$0xff] %vm1490_vm8, %v1425_v27 }
 0x18e   : > { %v1617_v26 = vpop.permute.xlu1 %1616  ;;  %v2116_v21 = vld [vmem:[#allocation4 + $0x68] sm:$0xff]  ;;  %670 = vrot.lane.b32.xlu0 %v1737_v8, %s4050_s24 }
 0x18f   : > { %1699 = vst.msk [vmem:[#allocation4 + $0x70] sm:$0xff] %vm1684_vm9, %v1617_v26  ;;  %v3887_v22 = vpop.f32.mrf.mxu0  ;;  %3904 = vmatmul.mubr.msk.f32.gmra.mxu0 %vm2140_vm12, %v2116_v21 }
 0x190   : > { %v2474_v24 = vmul.f32 %v3887_v22, %v4820_v18  ;;  %1247 = vrot.lane.b32.xlu1 %v1738_v19, %s4052_s26  ;;  %v850_v30 = vpop.permute.xlu0 %849 }
 0x191   : > { %v2307_v25 = vpop.f32.mrf.mxu0  ;;  %929 = vst.msk [vmem:[#allocation4 + $0x88] sm:$0xff] %vm911_vm5, %v850_v30 }
 0x192   : > { %v2513_v29 = vadd.f32 %v4827_v23, %v2474_v24  ;;  %v2473_v53 = vmul.f32 %v4820_v18, %v2307_v25  ;;  %v1041_v34 = vpop.permute.xlu1 %1040  ;;  %1438 = vrot.lane.b32.xlu0 %v1930_v15, %s4053_s27 }
 0x193   : > { %1121 = vst.msk [vmem:[#allocation4 + $0x80] sm:$0xff] %vm1104_vm6, %v1041_v34 }
 0x194   : > { %v2545_v31 = vmax.f32 %v2513_v29, 0.0  ;;  %v2512_v32 = vadd.f32 %v4827_v23, %v2473_v53  ;;  %2016 = vrot.lane.b32.xlu1 %v1931_v28, %s4056_s21  ;;  %v1619_v33 = vpop.permute.xlu0 %1618 }
 0x195   : > { %1700 = vst.msk [vmem:[#allocation4 + $0x78] sm:$0xff] %vm1684_vm9, %v1619_v33 }
 0x196   : > { %2578 = vst.msk [vmem:[#allocation6 + $0x8] sm:$0xff] %vm2576_vm13, %v2545_v31  ;;  %v2544_v36 = vmax.f32 %v2512_v32, 0.0  ;;  %v1810_v37 = vpop.permute.xlu1 %1809  ;;  %672 = vrot.lane.b32.xlu0 %v1738_v19, %s4050_s24 }
 0x197   : > { %1892 = vst.msk [vmem:[#allocation4 + $0x70] sm:$0xff] %vm1877_vm10, %v1810_v37  ;;  %v1935_v37 = vld [vmem:[#allocation2 + $0x15a] sm:$0xff] }
 0x198   : > { %2577 = vst.msk [vmem:[#allocation6] sm:$0xff] %vm2576_vm13, %v2544_v36  ;;  %863 = vrot.lane.b32.xlu1 %v1930_v15, %s4049_s23  ;;  %v1043_v38 = vpop.permute.xlu0 %1042 }
 0x199   : > { %1122 = vst.msk [vmem:[#allocation4 + $0x88] sm:$0xff] %vm1104_vm6, %v1043_v38 }
 0x19a   : > { %v1234_v56 = vpop.permute.xlu1 %1233  ;;  %1440 = vrot.lane.b32.xlu0 %v1931_v28, %s4053_s27 }
 0x19b   : > { %1314 = vst.msk [vmem:[#allocation4 + $0x80] sm:$0xff] %vm1297_vm7, %v1234_v56 }
 0x19c   : > { %1632 = vrot.lane.b32.xlu1 %v4606_v46, %s4054_s28  ;;  %v1812_v40 = vpop.permute.xlu0 %1811 }
 0x19d   : > { %1893 = vst.msk [vmem:[#allocation4 + $0x78] sm:$0xff] %vm1877_vm10, %v1812_v40 }
 0x19e   : > { %v2003_v41 = vpop.permute.xlu1 %2002  ;;  %865 = vrot.lane.b32.xlu0 %v1931_v28, %s4049_s23  ;;  %v1934_v28 = vld [vmem:[#allocation2 + $0x152] sm:$0xff] }
 0x19f   : > { %2085 = vst.msk [vmem:[#allocation4 + $0x70] sm:$0xff] %vm2070_vm11, %v2003_v41  ;;  %v2609_v10 = vld [vmem:[#allocation6] ss:$2 sm:$0xff]  ;;  %v2625_v11 = vld [vmem:[#allocation6 + $0x1] ss:$2 sm:$0xff] }
 0x1a0   : > { %1056 = vrot.lane.b32.xlu1 %v4606_v46, %s4051_s25  ;;  %v659_v43 = vpop.permute.xlu0 %658  ;;  %v1740_v46 = vld [vmem:[#allocation2 + $0x141] sm:$0xff]  ;;  %v2672_v15 = vmax.f32 %v2609_v10, %v2625_v11 }
 0x1a1   : > { %737 = vst.msk [vmem:[#allocation4 + $0x90] sm:$0xff] %vm718_vm4, %v659_v43 }
 0x1a2   : > { %v1236_v44 = vpop.permute.xlu1 %1235  ;;  %1634 = vrot.lane.b32.xlu0 %v4622_v57, %s4054_s28 }
 0x1a3   : > { %1315 = vst.msk [vmem:[#allocation4 + $0x88] sm:$0xff] %vm1297_vm7, %v1236_v44 }
 0x1a4   : > { %1825 = vrot.lane.b32.xlu1 %v1739_v42, %s4055_s29  ;;  %v1427_v35 = vpop.permute.xlu0 %1426 }
 0x1a5   : > { %1507 = vst.msk [vmem:[#allocation4 + $0x80] sm:$0xff] %vm1490_vm8, %v1427_v35 }
 0x1a6   : > { %v2005_v49 = vpop.permute.xlu1 %2004  ;;  %v2117_v50 = vld [vmem:[#allocation4 + $0x70] sm:$0xff]  ;;  %1058 = vrot.lane.b32.xlu0 %v4622_v57, %s4051_s25 }
 0x1a7   : > { %2086 = vst.msk [vmem:[#allocation4 + $0x78] sm:$0xff] %vm2070_vm11, %v2005_v49  ;;  %3906 = vmatprep.mubr.msk.f32.mxu0 %vm2140_vm12, %v2117_v50 }
 0x1a8   : > { %1249 = vrot.lane.b32.xlu1 %v1739_v42, %s4052_s26  ;;  %v661_v51 = vpop.permute.xlu0 %660 }
 0x1a9   : > { %738 = vst.msk [vmem:[#allocation4 + $0x98] sm:$0xff] %vm718_vm4, %v661_v51 }
 0x1aa   : > { %v852_v52 = vpop.permute.xlu1 %851  ;;  %1827 = vrot.lane.b32.xlu0 %v1740_v46, %s4055_s29 }
 0x1ab   : > { %930 = vst.msk [vmem:[#allocation4 + $0x90] sm:$0xff] %vm911_vm5, %v852_v52  ;;  %v1743_v52 = vld [vmem:[#allocation2 + $0x169] sm:$0xff] }
 0x1ac   : > { %2018 = vrot.lane.b32.xlu1 %v1932_v55, %s4056_s21  ;;  %v1429_v54 = vpop.permute.xlu0 %1428 }
 0x1ad   : > { %1508 = vst.msk [vmem:[#allocation4 + $0x88] sm:$0xff] %vm1490_vm8, %v1429_v54 }
 0x1ae   : > { %v1621_v58 = vpop.permute.xlu1 %1620  ;;  %v2118_v59 = vld [vmem:[#allocation4 + $0x78] sm:$0xff]  ;;  %674 = vrot.lane.b32.xlu0 %v1739_v42, %s4050_s24 }
 0x1af   : > { %1701 = vst.msk [vmem:[#allocation4 + $0x80] sm:$0xff] %vm1684_vm9, %v1621_v58  ;;  %v3890_v57 = vpop.f32.mrf.mxu0  ;;  %3907 = vmatmul.mubr.msk.f32.gmra.mxu0 %vm2140_vm12, %v2118_v59 }
 0x1b0   : > { %v2476_v2 = vmul.f32 %v3890_v57, %v4820_v18  ;;  %1251 = vrot.lane.b32.xlu1 %v1740_v46, %s4052_s26  ;;  %v854_v1 = vpop.permute.xlu0 %853 }
 0x1b1   : > { %v2317_v60 = vpop.f32.mrf.mxu0  ;;  %931 = vst.msk [vmem:[#allocation4 + $0x98] sm:$0xff] %vm911_vm5, %v854_v1 }
 0x1b2   : > { %v2515_v61 = vadd.f32 %v4827_v23, %v2476_v2  ;;  %v2475_v62 = vmul.f32 %v4820_v18, %v2317_v60  ;;  %v1045_v3 = vpop.permute.xlu1 %1044  ;;  %1442 = vrot.lane.b32.xlu0 %v1932_v55, %s4053_s27  ;;  %v1936_v60 = vld [vmem:[#allocation2 + $0x16a] sm:$0xff] }
 0x1b3   : > { %1123 = vst.msk [vmem:[#allocation4 + $0x90] sm:$0xff] %vm1104_vm6, %v1045_v3 }
 0x1b4   : > { %v2547_v45 = vmax.f32 %v2515_v61, 0.0  ;;  %v2514_v4 = vadd.f32 %v4827_v23, %v2475_v62  ;;  %2020 = vrot.lane.b32.xlu1 %v1933_v63, %s4056_s21  ;;  %v1623_v5 = vpop.permute.xlu0 %1622 }
 0x1b5   : > { %1702 = vst.msk [vmem:[#allocation4 + $0x88] sm:$0xff] %vm1684_vm9, %v1623_v5 }
 0x1b6   : > { %2580 = vst.msk [vmem:[#allocation6 + $0x18] sm:$0xff] %vm2576_vm13, %v2547_v45  ;;  %v2546_v9 = vmax.f32 %v2514_v4, 0.0  ;;  %v1814_v6 = vpop.permute.xlu1 %1813  ;;  %676 = vrot.lane.b32.xlu0 %v1740_v46, %s4050_s24 }
 0x1b7   : > { %1894 = vst.msk [vmem:[#allocation4 + $0x80] sm:$0xff] %vm1877_vm10, %v1814_v6 }
 0x1b8   : > { %2579 = vst.msk [vmem:[#allocation6 + $0x10] sm:$0xff] %vm2576_vm13, %v2546_v9  ;;  %867 = vrot.lane.b32.xlu1 %v1932_v55, %s4049_s23  ;;  %v1047_v7 = vpop.permute.xlu0 %1046  ;;  %v1937_v9 = vld [vmem:[#allocation2 + $0x172] sm:$0xff] }
 0x1b9   : > { %1124 = vst.msk [vmem:[#allocation4 + $0x98] sm:$0xff] %vm1104_vm6, %v1047_v7 }
 0x1ba   : > { %v1238_v8 = vpop.permute.xlu1 %1237  ;;  %1444 = vrot.lane.b32.xlu0 %v1933_v63, %s4053_s27 }
 0x1bb   : > { %1316 = vst.msk [vmem:[#allocation4 + $0x90] sm:$0xff] %vm1297_vm7, %v1238_v8 }
 0x1bc   : > { %1636 = vrot.lane.b32.xlu1 %v4656_v12, %s4054_s28  ;;  %v1816_v48 = vpop.permute.xlu0 %1815 }
 0x1bd   : > { %1895 = vst.msk [vmem:[#allocation4 + $0x88] sm:$0xff] %vm1877_vm10, %v1816_v48 }
 0x1be   : > { %v2007_v13 = vpop.permute.xlu1 %2006  ;;  %869 = vrot.lane.b32.xlu0 %v1933_v63, %s4049_s23 }
 0x1bf   : > { %v2641_v14 = vld [vmem:[#allocation6 + $0x10] ss:$2 sm:$0xff]  ;;  %v2657_v19 = vld [vmem:[#allocation6 + $0x11] ss:$2 sm:$0xff]  ;;  %2087 = vst.msk [vmem:[#allocation4 + $0x80] sm:$0xff] %vm2070_vm11, %v2007_v13 }
 0x1c0   : > { %v2680_v16 = vmax.f32 %v2641_v14, %v2657_v19  ;;  %1060 = vrot.lane.b32.xlu1 %v4656_v12, %s4051_s25  ;;  %v663_v27 = vpop.permute.xlu0 %662  ;;  %v1742_v12 = vld [vmem:[#allocation2 + $0x159] sm:$0xff] }
 0x1c1   : > { %739 = vst.msk [vmem:[#allocation4 + $0xa0] sm:$0xff] %vm718_vm4, %v663_v27  ;;  %v1552_v19 = vld [vmem:[#allocation2 + $0x180] sm:$0xff] }
 0x1c2   : > { %v1240_v26 = vpop.permute.xlu1 %1239  ;;  %v2688_v21 = vmax.f32 %v2672_v15, %v2680_v16  ;;  %1638 = vrot.lane.b32.xlu0 %v4672_v20, %s4054_s28 }
 0x1c3   : > { %1317 = vst.msk [vmem:[#allocation4 + $0x98] sm:$0xff] %vm1297_vm7, %v1240_v26 }
 0x1c4   : > { %1829 = vrot.lane.b32.xlu1 %v1741_v17, %s4055_s29  ;;  %2724 = vst.msk [vmem:[#allocation3 + $0x11] sm:$0xff] %vm2576_vm13, %v2688_v21  ;;  %v1431_v22 = vpop.permute.xlu0 %1430 }
 0x1c5   : > { %1509 = vst.msk [vmem:[#allocation4 + $0x90] sm:$0xff] %vm1490_vm8, %v1431_v22 }
 0x1c6   : > { %v2009_v24 = vpop.permute.xlu1 %2008  ;;  %v2119_v25 = vld [vmem:[#allocation4 + $0x80] sm:$0xff]  ;;  %1062 = vrot.lane.b32.xlu0 %v4672_v20, %s4051_s25 }
 0x1c7   : > { %2088 = vst.msk [vmem:[#allocation4 + $0x88] sm:$0xff] %vm2070_vm11, %v2009_v24  ;;  %3909 = vmatprep.mubr.msk.f32.mxu0 %vm2140_vm12, %v2119_v25 }
 0x1c8   : > { %1253 = vrot.lane.b32.xlu1 %v1741_v17, %s4052_s26  ;;  %v665_v29 = vpop.permute.xlu0 %664 }
 0x1c9   : > { %740 = vst.msk [vmem:[#allocation4 + $0xa8] sm:$0xff] %vm718_vm4, %v665_v29  ;;  %v1745_v29 = vld [vmem:[#allocation2 + $0x181] sm:$0xff] }
 0x1ca   : > { %v856_v53 = vpop.permute.xlu1 %855  ;;  %1831 = vrot.lane.b32.xlu0 %v1742_v12, %s4055_s29 }
 0x1cb   : > { %932 = vst.msk [vmem:[#allocation4 + $0xa0] sm:$0xff] %vm911_vm5, %v856_v53  ;;  %v4920_v30 = vld [vmem:[#allocation3 + $0x10] sm:$0xff] }
 0x1cc   : > { %2022 = vrot.lane.b32.xlu1 %v1934_v28, %s4056_s21  ;;  %2741 = vst.msk [vmem:[#allocation5 + $0x8] sm:$0xff] %vm2576_vm13, %v4920_v30  ;;  %v1433_v20 = vpop.permute.xlu0 %1432 }
 0x1cd   : > { %1510 = vst.msk [vmem:[#allocation4 + $0x98] sm:$0xff] %vm1490_vm8, %v1433_v20 }
 0x1ce   : > { %v1625_v34 = vpop.permute.xlu1 %1624  ;;  %v2120_v31 = vld [vmem:[#allocation4 + $0x88] sm:$0xff]  ;;  %678 = vrot.lane.b32.xlu0 %v1741_v17, %s4050_s24 }
 0x1cf   : > { %1703 = vst.msk [vmem:[#allocation4 + $0x90] sm:$0xff] %vm1684_vm9, %v1625_v34  ;;  %v3893_v32 = vpop.f32.mrf.mxu0  ;;  %3910 = vmatmul.mubr.msk.f32.gmra.mxu0 %vm2140_vm12, %v2120_v31 }
 0x1d0   : > { %v2478_v36 = vmul.f32 %v3893_v32, %v4820_v18  ;;  %1255 = vrot.lane.b32.xlu1 %v1742_v12, %s4052_s26  ;;  %v858_v40 = vpop.permute.xlu0 %857 }
 0x1d1   : > { %v2327_v33 = vpop.f32.mrf.mxu0  ;;  %933 = vst.msk [vmem:[#allocation4 + $0xa8] sm:$0xff] %vm911_vm5, %v858_v40 }
 0x1d2   : > { %v2517_v38 = vadd.f32 %v4827_v23, %v2478_v36  ;;  %v2477_v56 = vmul.f32 %v4820_v18, %v2327_v33  ;;  %v1049_v41 = vpop.permute.xlu1 %1048  ;;  %1446 = vrot.lane.b32.xlu0 %v1934_v28, %s4053_s27  ;;  %v1746_v33 = vld [vmem:[#allocation2 + $0x189] sm:$0xff] }
 0x1d3   : > { %1125 = vst.msk [vmem:[#allocation4 + $0xa0] sm:$0xff] %vm1104_vm6, %v1049_v41 }
 0x1d4   : > { %v2549_v42 = vmax.f32 %v2517_v38, 0.0  ;;  %v2516_v43 = vadd.f32 %v4827_v23, %v2477_v56  ;;  %2024 = vrot.lane.b32.xlu1 %v1935_v37, %s4056_s21  ;;  %v1627_v35 = vpop.permute.xlu0 %1626 }
 0x1d5   : > { %1704 = vst.msk [vmem:[#allocation4 + $0x98] sm:$0xff] %vm1684_vm9, %v1627_v35 }
 0x1d6   : > { %2582 = vst.msk [vmem:[#allocation6 + $0x28] sm:$0xff] %vm2576_vm13, %v2549_v42  ;;  %v2548_v44 = vmax.f32 %v2516_v43, 0.0  ;;  %v1818_v49 = vpop.permute.xlu1 %1817  ;;  %680 = vrot.lane.b32.xlu0 %v1742_v12, %s4050_s24 }
 0x1d7   : > { %1896 = vst.msk [vmem:[#allocation4 + $0x90] sm:$0xff] %vm1877_vm10, %v1818_v49 }
 0x1d8   : > { %2581 = vst.msk [vmem:[#allocation6 + $0x20] sm:$0xff] %vm2576_vm13, %v2548_v44  ;;  %871 = vrot.lane.b32.xlu1 %v1934_v28, %s4049_s23  ;;  %v1051_v50 = vpop.permute.xlu0 %1050  ;;  %v1553_v28 = vld [vmem:[#allocation2 + $0x188] sm:$0xff] }
 0x1d9   : > { %1126 = vst.msk [vmem:[#allocation4 + $0xa8] sm:$0xff] %vm1104_vm6, %v1051_v50  ;;  %v1939_v50 = vld [vmem:[#allocation2 + $0x18a] sm:$0xff] }
 0x1da   : > { %v1242_v46 = vpop.permute.xlu1 %1241  ;;  %1448 = vrot.lane.b32.xlu0 %v1935_v37, %s4053_s27 }
 0x1db   : > { %1318 = vst.msk [vmem:[#allocation4 + $0xa0] sm:$0xff] %vm1297_vm7, %v1242_v46 }
 0x1dc   : > { %1640 = vrot.lane.b32.xlu1 %v4742_v39, %s4054_s28  ;;  %v1820_v55 = vpop.permute.xlu0 %1819 }
 0x1dd   : > { %1897 = vst.msk [vmem:[#allocation4 + $0x98] sm:$0xff] %vm1877_vm10, %v1820_v55 }
 0x1de   : > { %v2011_v51 = vpop.permute.xlu1 %2010  ;;  %873 = vrot.lane.b32.xlu0 %v1935_v37, %s4049_s23  ;;  %v1938_v37 = vld [vmem:[#allocation2 + $0x182] sm:$0xff] }
 0x1df   : > { %2089 = vst.msk [vmem:[#allocation4 + $0x90] sm:$0xff] %vm2070_vm11, %v2011_v51  ;;  %v2611_v17 = vld [vmem:[#allocation6 + $0x20] ss:$2 sm:$0xff]  ;;  %v2627_v27 = vld [vmem:[#allocation6 + $0x21] ss:$2 sm:$0xff] }
 0x1e0   : > { %1064 = vrot.lane.b32.xlu1 %v4742_v39, %s4051_s25  ;;  %v667_v54 = vpop.permute.xlu0 %666  ;;  %v1744_v39 = vld [vmem:[#allocation2 + $0x171] sm:$0xff]  ;;  %v2673_v25 = vmax.f32 %v2611_v17, %v2627_v27 }
 0x1e1   : > { %741 = vst.msk [vmem:[#allocation4 + $0xb0] sm:$0xff] %vm718_vm4, %v667_v54 }
 0x1e2   : > { %v1244_v58 = vpop.permute.xlu1 %1243  ;;  %1642 = vrot.lane.b32.xlu0 %v4758_v47, %s4054_s28 }
 0x1e3   : > { %1319 = vst.msk [vmem:[#allocation4 + $0xa8] sm:$0xff] %vm1297_vm7, %v1244_v58 }
 0x1e4   : > { %1833 = vrot.lane.b32.xlu1 %v1743_v52, %s4055_s29  ;;  %v1435_v59 = vpop.permute.xlu0 %1434 }
 0x1e5   : > { %1511 = vst.msk [vmem:[#allocation4 + $0xa0] sm:$0xff] %vm1490_vm8, %v1435_v59  ;;  %v1554_v59 = vld [vmem:[#allocation2 + $0x198] sm:$0xff] }
 0x1e6   : > { %v2013_v57 = vpop.permute.xlu1 %2012  ;;  %v2121_v2 = vld [vmem:[#allocation4 + $0x90] sm:$0xff]  ;;  %1066 = vrot.lane.b32.xlu0 %v4758_v47, %s4051_s25 }
 0x1e7   : > { %2090 = vst.msk [vmem:[#allocation4 + $0x98] sm:$0xff] %vm2070_vm11, %v2013_v57  ;;  %3912 = vmatprep.mubr.msk.f32.mxu0 %vm2140_vm12, %v2121_v2  ;;  %v1555_v57 = vld [vmem:[#allocation2 + $0x1a0] sm:$0xff] }
 0x1e8   : > { %1257 = vrot.lane.b32.xlu1 %v1743_v52, %s4052_s26  ;;  %v669_v63 = vpop.permute.xlu0 %668 }
 0x1e9   : > { %742 = vst.msk [vmem:[#allocation4 + $0xb8] sm:$0xff] %vm718_vm4, %v669_v63  ;;  %v1747_v63 = vld [vmem:[#allocation2 + $0x199] sm:$0xff] }
 0x1ea   : > { %v860_v61 = vpop.permute.xlu1 %859  ;;  %1835 = vrot.lane.b32.xlu0 %v1744_v39, %s4055_s29 }
 0x1eb   : > { %934 = vst.msk [vmem:[#allocation4 + $0xb0] sm:$0xff] %vm911_vm5, %v860_v61  ;;  %v1748_v61 = vld [vmem:[#allocation2 + $0x1a1] sm:$0xff] }
 0x1ec   : > { %2026 = vrot.lane.b32.xlu1 %v1936_v60, %s4056_s21  ;;  %v1437_v62 = vpop.permute.xlu0 %1436 }
 0x1ed   : > { %1512 = vst.msk [vmem:[#allocation4 + $0xa8] sm:$0xff] %vm1490_vm8, %v1437_v62 }
 0x1ee   : > { %v1629_v1 = vpop.permute.xlu1 %1628  ;;  %v2122_v3 = vld [vmem:[#allocation4 + $0x98] sm:$0xff]  ;;  %682 = vrot.lane.b32.xlu0 %v1743_v52, %s4050_s24 }
 0x1ef   : > { %1705 = vst.msk [vmem:[#allocation4 + $0xa0] sm:$0xff] %vm1684_vm9, %v1629_v1  ;;  %v3896_v47 = vpop.f32.mrf.mxu0  ;;  %3913 = vmatmul.mubr.msk.f32.gmra.mxu0 %vm2140_vm12, %v2122_v3  ;;  %v2732_v3 = vld [vmem:[#allocation3] sm:$0xff] }
 0x1f0   : > { %v2480_v45 = vmul.f32 %v3896_v47, %v4820_v18  ;;  %1259 = vrot.lane.b32.xlu1 %v1744_v39, %s4052_s26  ;;  %v862_v7 = vpop.permute.xlu0 %861  ;;  %2740 = vst.msk [vmem:[#allocation5] sm:$0xff] %vm2576_vm13, %v2732_v3  ;;  %v1940_v47 = vld [vmem:[#allocation2 + $0x19a] sm:$0xff] }
 0x1f1   : > { %v2337_v4 = vpop.f32.mrf.mxu0  ;;  %935 = vst.msk [vmem:[#allocation4 + $0xb8] sm:$0xff] %vm911_vm5, %v862_v7 }
 0x1f2   : > { %v2519_v5 = vadd.f32 %v4827_v23, %v2480_v45  ;;  %v2479_v6 = vmul.f32 %v4820_v18, %v2337_v4  ;;  %v1053_v8 = vpop.permute.xlu1 %1052  ;;  %1450 = vrot.lane.b32.xlu0 %v1936_v60, %s4053_s27  ;;  %v1941_v45 = vld [vmem:[#allocation2 + $0x1a2] sm:$0xff] }
 0x1f3   : > { %1127 = vst.msk [vmem:[#allocation4 + $0xb0] sm:$0xff] %vm1104_vm6, %v1053_v8  ;;  %v2749_v8 = vld [vmem:[#allocation3 + $0x11] sm:$0xff] }
 0x1f4   : > { %v2551_v10 = vmax.f32 %v2519_v5, 0.0  ;;  %v2518_v11 = vadd.f32 %v4827_v23, %v2479_v6  ;;  %2028 = vrot.lane.b32.xlu1 %v1937_v9, %s4056_s21  ;;  %v1631_v13 = vpop.permute.xlu0 %1630  ;;  %v2748_v5 = vld [vmem:[#allocation3 + $0x1] sm:$0xff] }
 0x1f5   : > { %1706 = vst.msk [vmem:[#allocation4 + $0xa8] sm:$0xff] %vm1684_vm9, %v1631_v13 }
 0x1f6   : > { %2584 = vst.msk [vmem:[#allocation6 + $0x38] sm:$0xff] %vm2576_vm13, %v2551_v10  ;;  %v2550_v48 = vmax.f32 %v2518_v11, 0.0  ;;  %v1822_v14 = vpop.permute.xlu1 %1821  ;;  %684 = vrot.lane.b32.xlu0 %v1744_v39, %s4050_s24  ;;  %v2797_v10 = vld [vmem:[#allocation3 + $0x2] sm:$0xff]  ;;  %s4057_s24 = smov 40  }
 0x1f7   : > { %1898 = vst.msk [vmem:[#allocation4 + $0xa0] sm:$0xff] %vm1877_vm10, %v1822_v14  ;;  %v2798_v14 = vld [vmem:[#allocation3 + $0x12] sm:$0xff] }
 0x1f8   : > { %2583 = vst.msk [vmem:[#allocation6 + $0x30] sm:$0xff] %vm2576_vm13, %v2550_v48  ;;  %875 = vrot.lane.b32.xlu1 %v1936_v60, %s4049_s23  ;;  %v1055_v15 = vpop.permute.xlu0 %1054 }
 0x1f9   : > { %1128 = vst.msk [vmem:[#allocation4 + $0xb8] sm:$0xff] %vm1104_vm6, %v1055_v15 }
 0x1fa   : > { %v1246_v16 = vpop.permute.xlu1 %1245  ;;  %1452 = vrot.lane.b32.xlu0 %v1937_v9, %s4053_s27 }
 0x1fb   : > { %1320 = vst.msk [vmem:[#allocation4 + $0xb0] sm:$0xff] %vm1297_vm7, %v1246_v16 }
 0x1fc   : > { %1644 = vrot.lane.b32.xlu1 %v1552_v19, %s4054_s28  ;;  %v1824_v26 = vpop.permute.xlu0 %1823 }
 0x1fd   : > { %1899 = vst.msk [vmem:[#allocation4 + $0xa8] sm:$0xff] %vm1877_vm10, %v1824_v26 }
 0x1fe   : > { %v2015_v21 = vpop.permute.xlu1 %2014  ;;  %877 = vrot.lane.b32.xlu0 %v1937_v9, %s4049_s23 }
 0x1ff   : > { %v2643_v22 = vld [vmem:[#allocation6 + $0x30] ss:$2 sm:$0xff]  ;;  %v2659_v24 = vld [vmem:[#allocation6 + $0x31] ss:$2 sm:$0xff]  ;;  %2091 = vst.msk [vmem:[#allocation4 + $0xa0] sm:$0xff] %vm2070_vm11, %v2015_v21 }
 0x200   : > { %v2681_v12 = vmax.f32 %v2643_v22, %v2659_v24  ;;  %1068 = vrot.lane.b32.xlu1 %v1552_v19, %s4051_s25  ;;  %v671_v53 = vpop.permute.xlu0 %670 }
 0x201   : > { %743 = vst.msk [vmem:[#allocation4 + $0xc0] sm:$0xff] %vm718_vm4, %v671_v53 }
 0x202   : > { %v1248_v20 = vpop.permute.xlu1 %1247  ;;  %v2689_v34 = vmax.f32 %v2673_v25, %v2681_v12  ;;  %1646 = vrot.lane.b32.xlu0 %v1553_v28, %s4054_s28 }
 0x203   : > { %1321 = vst.msk [vmem:[#allocation4 + $0xb8] sm:$0xff] %vm1297_vm7, %v1248_v20 }
 0x204   : > { %1837 = vrot.lane.b32.xlu1 %v1745_v29, %s4055_s29  ;;  %2725 = vst.msk [vmem:[#allocation3 + $0x21] sm:$0xff] %vm2576_vm13, %v2689_v34  ;;  %v1439_v31 = vpop.permute.xlu0 %1438 }
 0x205   : > { %1513 = vst.msk [vmem:[#allocation4 + $0xb0] sm:$0xff] %vm1490_vm8, %v1439_v31 }
 0x206   : > { %v2017_v32 = vpop.permute.xlu1 %2016  ;;  %v2123_v36 = vld [vmem:[#allocation4 + $0xa0] sm:$0xff]  ;;  %1070 = vrot.lane.b32.xlu0 %v1553_v28, %s4051_s25  ;;  %s4058_s25 = smov 48  }
 0x207   : > { %2092 = vst.msk [vmem:[#allocation4 + $0xa8] sm:$0xff] %vm2070_vm11, %v2017_v32  ;;  %3915 = vmatprep.mubr.msk.f32.mxu0 %vm2140_vm12, %v2123_v36 }
 0x208   : > { %1261 = vrot.lane.b32.xlu1 %v1745_v29, %s4052_s26  ;;  %v673_v38 = vpop.permute.xlu0 %672 }
 0x209   : > { %744 = vst.msk [vmem:[#allocation4 + $0xc8] sm:$0xff] %vm718_vm4, %v673_v38 }
 0x20a   : > { %v864_v56 = vpop.permute.xlu1 %863  ;;  %1839 = vrot.lane.b32.xlu0 %v1746_v33, %s4055_s29 }
 0x20b   : > { %936 = vst.msk [vmem:[#allocation4 + $0xc0] sm:$0xff] %vm911_vm5, %v864_v56  ;;  %v5009_v40 = vld [vmem:[#allocation3 + $0x20] sm:$0xff] }
 0x20c   : > { %2030 = vrot.lane.b32.xlu1 %v1938_v37, %s4056_s21  ;;  %2742 = vst.msk [vmem:[#allocation5 + $0x10] sm:$0xff] %vm2576_vm13, %v5009_v40  ;;  %v1441_v41 = vpop.permute.xlu0 %1440  ;;  %v5061_v21 = vld [vmem:[#allocation3 + $0x21] sm:$0xff] }
 0x20d   : > { %1514 = vst.msk [vmem:[#allocation4 + $0xb8] sm:$0xff] %vm1490_vm8, %v1441_v41  ;;  %v5078_v32 = vld [vmem:[#allocation3 + $0x22] sm:$0xff] }
 0x20e   : > { %v1633_v42 = vpop.permute.xlu1 %1632  ;;  %v2124_v43 = vld [vmem:[#allocation4 + $0xa8] sm:$0xff]  ;;  %1263 = vrot.lane.b32.xlu0 %v1746_v33, %s4052_s26 }
 0x20f   : > { %1707 = vst.msk [vmem:[#allocation4 + $0xb0] sm:$0xff] %vm1684_vm9, %v1633_v42  ;;  %v3899_v44 = vpop.f32.mrf.mxu0  ;;  %3916 = vmatmul.mubr.msk.f32.gmra.mxu0 %vm2140_vm12, %v2124_v43 }
 0x210   : > { %v2482_v35 = vmul.f32 %v3899_v44, %v4820_v18  ;;  %1454 = vrot.lane.b32.xlu1 %v1938_v37, %s4053_s27  ;;  %v866_v51 = vpop.permute.xlu0 %865 }
 0x211   : > { %v2347_v49 = vpop.f32.mrf.mxu0  ;;  %937 = vst.msk [vmem:[#allocation4 + $0xc8] sm:$0xff] %vm911_vm5, %v866_v51 }
 0x212   : > { %v2521_v46 = vadd.f32 %v4827_v23, %v2482_v35  ;;  %v2481_v55 = vmul.f32 %v4820_v18, %v2347_v49  ;;  %v1057_v52 = vpop.permute.xlu1 %1056  ;;  %2032 = vrot.lane.b32.xlu0 %v1939_v50, %s4056_s21 }
 0x213   : > { %1129 = vst.msk [vmem:[#allocation4 + $0xc0] sm:$0xff] %vm1104_vm6, %v1057_v52 }
 0x214   : > { %v2553_v54 = vmax.f32 %v2521_v46, 0.0  ;;  %v2520_v58 = vadd.f32 %v4827_v23, %v2481_v55  ;;  %1456 = vrot.lane.b32.xlu1 %v1939_v50, %s4053_s27  ;;  %v1635_v39 = vpop.permute.xlu0 %1634  ;;  %s4059_s27 = smov 56  }
 0x215   : > { %1708 = vst.msk [vmem:[#allocation4 + $0xb8] sm:$0xff] %vm1684_vm9, %v1635_v39 }
 0x216   : > { %2586 = vst.msk [vmem:[#allocation6 + $0x48] sm:$0xff] %vm2576_vm13, %v2553_v54  ;;  %v2552_v2 = vmax.f32 %v2520_v58, 0.0  ;;  %v1826_v60 = vpop.permute.xlu1 %1825  ;;  %1648 = vrot.lane.b32.xlu0 %v1554_v59, %s4054_s28 }
 0x217   : > { %1900 = vst.msk [vmem:[#allocation4 + $0xb0] sm:$0xff] %vm1877_vm10, %v1826_v60 }
 0x218   : > { %2585 = vst.msk [vmem:[#allocation6 + $0x40] sm:$0xff] %vm2576_vm13, %v2552_v2  ;;  %1650 = vrot.lane.b32.xlu1 %v1555_v57, %s4054_s28  ;;  %v1059_v62 = vpop.permute.xlu0 %1058 }
 0x219   : > { %1130 = vst.msk [vmem:[#allocation4 + $0xc8] sm:$0xff] %vm1104_vm6, %v1059_v62 }
 0x21a   : > { %v1250_v1 = vpop.permute.xlu1 %1249  ;;  %1841 = vrot.lane.b32.xlu0 %v1747_v63, %s4055_s29 }
 0x21b   : > { %1322 = vst.msk [vmem:[#allocation4 + $0xc0] sm:$0xff] %vm1297_vm7, %v1250_v1 }
 0x21c   : > { %1843 = vrot.lane.b32.xlu1 %v1748_v61, %s4055_s29  ;;  %v1828_v4 = vpop.permute.xlu0 %1827  ;;  %s4060_s29 = smov 64  }
 0x21d   : > { %1901 = vst.msk [vmem:[#allocation4 + $0xb8] sm:$0xff] %vm1877_vm10, %v1828_v4 }
 0x21e   : > { %v2019_v9 = vpop.permute.xlu1 %2018  ;;  %2034 = vrot.lane.b32.xlu0 %v1940_v47, %s4056_s21 }
 0x21f   : > { %2093 = vst.msk [vmem:[#allocation4 + $0xb0] sm:$0xff] %vm2070_vm11, %v2019_v9  ;;  %v2613_v37 = vld [vmem:[#allocation6 + $0x40] ss:$2 sm:$0xff]  ;;  %v2629_v38 = vld [vmem:[#allocation6 + $0x41] ss:$2 sm:$0xff] }
 0x220   : > { %2036 = vrot.lane.b32.xlu1 %v1941_v45, %s4056_s21  ;;  %v675_v6 = vpop.permute.xlu0 %674  ;;  %v2674_v44 = vmax.f32 %v2613_v37, %v2629_v38 }
 0x221   : > { %745 = vst.msk [vmem:[#allocation4 + $0xd0] sm:$0xff] %vm718_vm4, %v675_v6 }
 0x222   : > { %v1252_v7 = vpop.permute.xlu1 %1251  ;;  %2764 = vrot.lane.b32.xlu0 %v2748_v5, %s4049_s23 }
 0x223   : > { %1323 = vst.msk [vmem:[#allocation4 + $0xc8] sm:$0xff] %vm1297_vm7, %v1252_v7 }
 0x224   : > { %2766 = vrot.lane.b32.xlu1 %v2749_v8, %s4049_s23  ;;  %v1443_v11 = vpop.permute.xlu0 %1442 }
 0x225   : > { %1515 = vst.msk [vmem:[#allocation4 + $0xc0] sm:$0xff] %vm1490_vm8, %v1443_v11 }
 0x226   : > { %v2021_v48 = vpop.permute.xlu1 %2020  ;;  %v2125_v13 = vld [vmem:[#allocation4 + $0xb0] sm:$0xff]  ;;  %2813 = vrot.lane.b32.xlu0 %v2797_v10, %s4052_s26 }
 0x227   : > { %2094 = vst.msk [vmem:[#allocation4 + $0xb8] sm:$0xff] %vm2070_vm11, %v2021_v48  ;;  %3918 = vmatprep.mubr.msk.f32.mxu0 %vm2140_vm12, %v2125_v13 }
 0x228   : > { %2815 = vrot.lane.b32.xlu1 %v2798_v14, %s4052_s26  ;;  %v677_v19 = vpop.permute.xlu0 %676 }
 0x229   : > { %746 = vst.msk [vmem:[#allocation4 + $0xd8] sm:$0xff] %vm718_vm4, %v677_v19 }
 0x22a   : > { %v868_v15 = vpop.permute.xlu1 %867  ;;  %2862 = vrot.lane.b32.xlu0 %v4920_v30, %s4054_s28 }
 0x22b   : > { %938 = vst.msk [vmem:[#allocation4 + $0xd0] sm:$0xff] %vm911_vm5, %v868_v15 }
 0x22c   : > { %2864 = vrot.lane.b32.xlu1 %v5009_v40, %s4054_s28  ;;  %v1445_v16 = vpop.permute.xlu0 %1444 }
 0x22d   : > { %1516 = vst.msk [vmem:[#allocation4 + $0xc8] sm:$0xff] %vm1490_vm8, %v1445_v16 }
 0x22e   : > { %v1637_v17 = vpop.permute.xlu1 %1636  ;;  %v2126_v27 = vld [vmem:[#allocation4 + $0xb8] sm:$0xff]  ;;  %2911 = vrot.lane.b32.xlu0 %v2749_v8, %s4056_s21 }
 0x22f   : > { %1709 = vst.msk [vmem:[#allocation4 + $0xc0] sm:$0xff] %vm1684_vm9, %v1637_v17  ;;  %v3902_v26 = vpop.f32.mrf.mxu0  ;;  %3919 = vmatmul.mubr.msk.f32.gmra.mxu0 %vm2140_vm12, %v2126_v27 }
 0x230   : > { %v2484_v22 = vmul.f32 %v3902_v26, %v4820_v18  ;;  %2768 = vrot.lane.b32.xlu1 %v5061_v21, %s4049_s23  ;;  %v870_v12 = vpop.permute.xlu0 %869 }
 0x231   : > { %v2357_v30 = vpop.f32.mrf.mxu0  ;;  %939 = vst.msk [vmem:[#allocation4 + $0xd8] sm:$0xff] %vm911_vm5, %v870_v12 }
 0x232   : > { %v2523_v24 = vadd.f32 %v4827_v23, %v2484_v22  ;;  %v2483_v25 = vmul.f32 %v4820_v18, %v2357_v30  ;;  %v1061_v28 = vpop.permute.xlu1 %1060  ;;  %2913 = vrot.lane.b32.xlu0 %v5061_v21, %s4056_s21 }
 0x233   : > { %1131 = vst.msk [vmem:[#allocation4 + $0xd0] sm:$0xff] %vm1104_vm6, %v1061_v28 }
 0x234   : > { %v2555_v29 = vmax.f32 %v2523_v24, 0.0  ;;  %v2522_v53 = vadd.f32 %v4827_v23, %v2483_v25  ;;  %2960 = vrot.lane.b32.xlu1 %v2798_v14, %s4057_s24  ;;  %v1639_v34 = vpop.permute.xlu0 %1638 }
 0x235   : > { %1710 = vst.msk [vmem:[#allocation4 + $0xc8] sm:$0xff] %vm1684_vm9, %v1639_v34 }
 0x236   : > { %2588 = vst.msk [vmem:[#allocation6 + $0x58] sm:$0xff] %vm2576_vm13, %v2555_v29  ;;  %v2554_v20 = vmax.f32 %v2522_v53, 0.0  ;;  %v1830_v31 = vpop.permute.xlu1 %1829 }
 0x237   : > { %1902 = vst.msk [vmem:[#allocation4 + $0xc0] sm:$0xff] %vm1877_vm10, %v1830_v31 }
 0x238   : > { %2587 = vst.msk [vmem:[#allocation6 + $0x50] sm:$0xff] %vm2576_vm13, %v2554_v20  ;;  %2817 = vrot.lane.b32.xlu1 %v5078_v32, %s4052_s26  ;;  %v1063_v36 = vpop.permute.xlu0 %1062 }
 0x239   : > { %1132 = vst.msk [vmem:[#allocation4 + $0xd8] sm:$0xff] %vm1104_vm6, %v1063_v36 }
 0x23a   : > { %v1254_v33 = vpop.permute.xlu1 %1253 }
 0x23b   : > { %1324 = vst.msk [vmem:[#allocation4 + $0xd0] sm:$0xff] %vm1297_vm7, %v1254_v33 }
 0x23c   : > { %3010 = vrot.lane.b32.xlu1 %v5009_v40, %s4058_s25  ;;  %v1832_v56 = vpop.permute.xlu0 %1831 }
 0x23d   : > { %1903 = vst.msk [vmem:[#allocation4 + $0xc8] sm:$0xff] %vm1877_vm10, %v1832_v56 }
 0x23e   : > { %v2023_v41 = vpop.permute.xlu1 %2022 }
 0x23f   : > { %v2645_v42 = vld [vmem:[#allocation6 + $0x50] ss:$2 sm:$0xff]  ;;  %v2661_v43 = vld [vmem:[#allocation6 + $0x51] ss:$2 sm:$0xff]  ;;  %2095 = vst.msk [vmem:[#allocation4 + $0xc0] sm:$0xff] %vm2070_vm11, %v2023_v41  ;;  %v3155_v41 = vld [vmem:[%s5599_s4 + $0x30] sm:$0xff] }
 0x240   : > { %v2682_v35 = vmax.f32 %v2645_v42, %v2661_v43  ;;  %v679_v49 = vpop.permute.xlu0 %678 }
 0x241   : > { %747 = vst.msk [vmem:[#allocation4 + $0xe0] sm:$0xff] %vm718_vm4, %v679_v49  ;;  %v3154_v49 = vld [vmem:[%s5599_s4 + $0x28] sm:$0xff] }
 0x242   : > { %v1256_v50 = vpop.permute.xlu1 %1255  ;;  %v2690_v46 = vmax.f32 %v2674_v44, %v2682_v35 }
 0x243   : > { %1325 = vst.msk [vmem:[#allocation4 + $0xd8] sm:$0xff] %vm1297_vm7, %v1256_v50 }
 0x244   : > { %2726 = vst.msk [vmem:[#allocation3 + $0x31] sm:$0xff] %vm2576_vm13, %v2690_v46  ;;  %v1447_v40 = vpop.permute.xlu0 %1446 }
 0x245   : > { %1517 = vst.msk [vmem:[#allocation4 + $0xd0] sm:$0xff] %vm1490_vm8, %v1447_v40  ;;  %v3153_v40 = vld [vmem:[%s5599_s4 + $0x20] sm:$0xff] }
 0x246   : > { %v2025_v55 = vpop.permute.xlu1 %2024  ;;  %v2127_v51 = vld [vmem:[#allocation4 + $0xc0] sm:$0xff] }
 0x247   : > { %2096 = vst.msk [vmem:[#allocation4 + $0xc8] sm:$0xff] %vm2070_vm11, %v2025_v55  ;;  %3921 = vmatprep.mubr.msk.f32.mxu0 %vm2140_vm12, %v2127_v51 }
 0x248   : > { %v681_v52 = vpop.permute.xlu0 %680 }
 0x249   : > { %748 = vst.msk [vmem:[#allocation4 + $0xe8] sm:$0xff] %vm718_vm4, %v681_v52 }
 0x24a   : > { %v872_v54 = vpop.permute.xlu1 %871 }
 0x24b   : > { %940 = vst.msk [vmem:[#allocation4 + $0xe0] sm:$0xff] %vm911_vm5, %v872_v54  ;;  %v2848_v58 = vld [vmem:[#allocation3 + $0x30] sm:$0xff]  ;;  %v3152_v54 = vld [vmem:[%s5599_s4 + $0x18] sm:$0xff] }
 0x24c   : > { %v5097_v59 = vld [vmem:[#allocation3 + $0x31] sm:$0xff]  ;;  %2866 = vrot.lane.b32.xlu1 %v2848_v58, %s4054_s28  ;;  %2743 = vst.msk [vmem:[#allocation5 + $0x18] sm:$0xff] %vm2576_vm13, %v2848_v58  ;;  %v1449_v57 = vpop.permute.xlu0 %1448 }
 0x24d   : > { %2770 = vrot.lane.b32.xlu0 %v5097_v59, %s4049_s23  ;;  %1518 = vst.msk [vmem:[#allocation4 + $0xd8] sm:$0xff] %vm1490_vm8, %v1449_v57  ;;  %v5115_v45 = vld [vmem:[#allocation3 + $0x32] sm:$0xff] }
 0x24e   : > { %v1641_v2 = vpop.permute.xlu1 %1640  ;;  %v2128_v39 = vld [vmem:[#allocation4 + $0xc8] sm:$0xff] }
 0x24f   : > { %1711 = vst.msk [vmem:[#allocation4 + $0xd0] sm:$0xff] %vm1684_vm9, %v1641_v2  ;;  %v3905_v60 = vpop.f32.mrf.mxu0  ;;  %3922 = vmatmul.mubr.msk.f32.gmra.mxu0 %vm2140_vm12, %v2128_v39 }
 0x250   : > { %v2486_v63 = vmul.f32 %v3905_v60, %v4820_v18  ;;  %3059 = vrot.lane.b32.xlu1 %v5061_v21, %s4059_s27  ;;  %v874_v3 = vpop.permute.xlu0 %873  ;;  %v3150_v60 = vld [vmem:[%s5599_s4 + $0x8] sm:$0xff] }
 0x251   : > { %2962 = vrot.lane.b32.xlu0 %v5078_v32, %s4057_s24  ;;  %v2367_v61 = vpop.f32.mrf.mxu0  ;;  %941 = vst.msk [vmem:[#allocation4 + $0xe8] sm:$0xff] %vm911_vm5, %v874_v3 }
 0x252   : > { %v2525_v62 = vadd.f32 %v4827_v23, %v2486_v63  ;;  %v2485_v1 = vmul.f32 %v4820_v18, %v2367_v61  ;;  %v1065_v47 = vpop.permute.xlu1 %1064  ;;  %v3149_v63 = vld [vmem:[%s5599_s4] sm:$0xff] }
 0x253   : > { %1133 = vst.msk [vmem:[#allocation4 + $0xe0] sm:$0xff] %vm1104_vm6, %v1065_v47 }
 0x254   : > { %v2557_v4 = vmax.f32 %v2525_v62, 0.0  ;;  %v2524_v9 = vadd.f32 %v4827_v23, %v2485_v1  ;;  %2915 = vrot.lane.b32.xlu1 %v5097_v59, %s4056_s21  ;;  %v1643_v6 = vpop.permute.xlu0 %1642 }
 0x255   : > { %2819 = vrot.lane.b32.xlu0 %v5115_v45, %s4052_s26  ;;  %1712 = vst.msk [vmem:[#allocation4 + $0xd8] sm:$0xff] %vm1684_vm9, %v1643_v6  ;;  %v5204_v6 = vld [vmem:[%s5597_s2] ss:$0 sm:$0xff] }
 0x256   : > { %2590 = vst.msk [vmem:[#allocation6 + $0x68] sm:$0xff] %vm2576_vm13, %v2557_v4  ;;  %v2556_v5 = vmax.f32 %v2524_v9, 0.0  ;;  %v1834_v7 = vpop.permute.xlu1 %1833 }
 0x257   : > { %1904 = vst.msk [vmem:[#allocation4 + $0xd0] sm:$0xff] %vm1877_vm10, %v1834_v7 }
 0x258   : > { %2589 = vst.msk [vmem:[#allocation6 + $0x60] sm:$0xff] %vm2576_vm13, %v2556_v5  ;;  %3108 = vrot.lane.b32.xlu1 %v5078_v32, %s4060_s29  ;;  %v1067_v8 = vpop.permute.xlu0 %1066 }
 0x259   : > { %3012 = vrot.lane.b32.xlu0 %v2848_v58, %s4058_s25  ;;  %1134 = vst.msk [vmem:[#allocation4 + $0xe8] sm:$0xff] %vm1104_vm6, %v1067_v8  ;;  %v3151_v58 = vld [vmem:[%s5599_s4 + $0x10] sm:$0xff] }
 0x25a   : > { %v1258_v10 = vpop.permute.xlu1 %1257 }
 0x25b   : > { %1326 = vst.msk [vmem:[#allocation4 + $0xe0] sm:$0xff] %vm1297_vm7, %v1258_v10  ;;  %v5214_v10 = vld [vmem:[%s5598_s3] ss:$0 sm:$0xff] }
 0x25c   : > { %v1836_v11 = vpop.permute.xlu0 %1835 }
 0x25d   : > { %1905 = vst.msk [vmem:[#allocation4 + $0xd8] sm:$0xff] %vm1877_vm10, %v1836_v11 }
 0x25e   : > { %v2027_v48 = vpop.permute.xlu1 %2026 }
 0x25f   : > { %2097 = vst.msk [vmem:[#allocation4 + $0xd0] sm:$0xff] %vm2070_vm11, %v2027_v48  ;;  %v2615_v38 = vld [vmem:[#allocation6 + $0x60] ss:$2 sm:$0xff]  ;;  %v2631_v56 = vld [vmem:[#allocation6 + $0x61] ss:$2 sm:$0xff] }
 0x260   : > { %v683_v13 = vpop.permute.xlu0 %682  ;;  %v2675_v50 = vmax.f32 %v2615_v38, %v2631_v56 }
 0x261   : > { %749 = vst.msk [vmem:[#allocation4 + $0xf0] sm:$0xff] %vm718_vm4, %v683_v13 }
 0x262   : > { %v1260_v14 = vpop.permute.xlu1 %1259 }
 0x263   : > { %1327 = vst.msk [vmem:[#allocation4 + $0xe8] sm:$0xff] %vm1297_vm7, %v1260_v14 }
 0x264   : > { %v1451_v19 = vpop.permute.xlu0 %1450 }
 0x265   : > { %1519 = vst.msk [vmem:[#allocation4 + $0xe0] sm:$0xff] %vm1490_vm8, %v1451_v19 }
 0x266   : > { %v2029_v15 = vpop.permute.xlu1 %2028  ;;  %v2129_v16 = vld [vmem:[#allocation4 + $0xd0] sm:$0xff] }
 0x267   : > { %2098 = vst.msk [vmem:[#allocation4 + $0xd8] sm:$0xff] %vm2070_vm11, %v2029_v15  ;;  %3924 = vmatprep.mubr.msk.f32.mxu0 %vm2140_vm12, %v2129_v16 }
 0x268   : > { %v685_v17 = vpop.permute.xlu0 %684 }
 0x269   : > { %750 = vst.msk [vmem:[#allocation4 + $0xf8] sm:$0xff] %vm718_vm4, %v685_v17  ;;  %vm2984_vm4 = vcmask 392512  }
 0x26a   : > { %v876_v27 = vpop.permute.xlu1 %875 }
 0x26b   : > { %942 = vst.msk [vmem:[#allocation4 + $0xf0] sm:$0xff] %vm911_vm5, %v876_v27 }
 0x26c   : > { %v1453_v26 = vpop.permute.xlu0 %1452 }
 0x26d   : > { %1520 = vst.msk [vmem:[#allocation4 + $0xe8] sm:$0xff] %vm1490_vm8, %v1453_v26 }
 0x26e   : > { %v1645_v21 = vpop.permute.xlu1 %1644  ;;  %v2130_v22 = vld [vmem:[#allocation4 + $0xd8] sm:$0xff] }
 0x26f   : > { %1713 = vst.msk [vmem:[#allocation4 + $0xe0] sm:$0xff] %vm1684_vm9, %v1645_v21  ;;  %v3908_v30 = vpop.f32.mrf.mxu0  ;;  %3925 = vmatmul.mubr.msk.f32.gmra.mxu0 %vm2140_vm12, %v2130_v22 }
 0x270   : > { %v2488_v24 = vmul.f32 %v3908_v30, %v4820_v18  ;;  %v878_v29 = vpop.permute.xlu0 %877 }
 0x271   : > { %v2377_v25 = vpop.f32.mrf.mxu0  ;;  %943 = vst.msk [vmem:[#allocation4 + $0xf8] sm:$0xff] %vm911_vm5, %v878_v29  ;;  %vm3034_vm5 = vcmask 458112  }
 0x272   : > { %v2527_v12 = vadd.f32 %v4827_v23, %v2488_v24  ;;  %v2487_v28 = vmul.f32 %v4820_v18, %v2377_v25  ;;  %v1069_v53 = vpop.permute.xlu1 %1068  ;;  %v3157_v18 = vld [vmem:[%s5599_s4 + $0x40] sm:$0xff] }
 0x273   : > { %1135 = vst.msk [vmem:[#allocation4 + $0xf0] sm:$0xff] %vm1104_vm6, %v1069_v53  ;;  %3933 = vmatprep.subr.mxu1 %v3157_v18 }
 0x274   : > { %v2559_v20 = vmax.f32 %v2527_v12, 0.0  ;;  %v2526_v34 = vadd.f32 %v4827_v23, %v2487_v28  ;;  %v1647_v32 = vpop.permute.xlu0 %1646  ;;  %3934 = vmatpush3.msra.mxu1 %v3157_v18  ;;  %v3156_v23 = vld [vmem:[%s5599_s4 + $0x38] sm:$0xff] }
 0x275   : > { %1714 = vst.msk [vmem:[#allocation4 + $0xe8] sm:$0xff] %vm1684_vm9, %v1647_v32  ;;  %3935 = vmatprep.subr.mxu1 %v3156_v23 }
 0x276   : > { %2592 = vst.msk [vmem:[#allocation6 + $0x78] sm:$0xff] %vm2576_vm13, %v2559_v20  ;;  %v2558_v31 = vmax.f32 %v2526_v34, 0.0  ;;  %v1838_v36 = vpop.permute.xlu1 %1837  ;;  %3936 = vmatpush3.msra.mxu1 %v3156_v23 }
 0x277   : > { %1906 = vst.msk [vmem:[#allocation4 + $0xe0] sm:$0xff] %vm1877_vm10, %v1838_v36  ;;  %3937 = vmatprep.subr.mxu1 %v3155_v41 }
 0x278   : > { %2591 = vst.msk [vmem:[#allocation6 + $0x70] sm:$0xff] %vm2576_vm13, %v2558_v31  ;;  %v1071_v33 = vpop.permute.xlu0 %1070  ;;  %3938 = vmatpush3.msra.mxu1 %v3155_v41 }
 0x279   : > { %1136 = vst.msk [vmem:[#allocation4 + $0xf8] sm:$0xff] %vm1104_vm6, %v1071_v33  ;;  %3939 = vmatprep.subr.mxu1 %v3154_v49  ;;  %vm3083_vm6 = vcmask 523712  }
 0x27a   : > { %v1262_v37 = vpop.permute.xlu1 %1261  ;;  %3940 = vmatpush3.msra.mxu1 %v3154_v49 }
 0x27b   : > { %1328 = vst.msk [vmem:[#allocation4 + $0xf0] sm:$0xff] %vm1297_vm7, %v1262_v37  ;;  %3941 = vmatprep.subr.mxu1 %v3153_v40 }
 0x27c   : > { %v1840_v42 = vpop.permute.xlu0 %1839  ;;  %3942 = vmatpush3.msra.mxu1 %v3153_v40 }
 0x27d   : > { %1907 = vst.msk [vmem:[#allocation4 + $0xe8] sm:$0xff] %vm1877_vm10, %v1840_v42  ;;  %3943 = vmatprep.subr.mxu1 %v3152_v54 }
 0x27e   : > { %v2031_v43 = vpop.permute.xlu1 %2030  ;;  %3944 = vmatpush3.msra.mxu1 %v3152_v54 }
 0x27f   : > { %v2647_v44 = vld [vmem:[#allocation6 + $0x70] ss:$2 sm:$0xff]  ;;  %v2663_v35 = vld [vmem:[#allocation6 + $0x71] ss:$2 sm:$0xff]  ;;  %2099 = vst.msk [vmem:[#allocation4 + $0xe0] sm:$0xff] %vm2070_vm11, %v2031_v43  ;;  %3945 = vmatprep.subr.mxu1 %v3151_v58 }
 0x280   : > { %v2683_v46 = vmax.f32 %v2647_v44, %v2663_v35  ;;  %v1264_v55 = vpop.permute.xlu0 %1263  ;;  %3946 = vmatpush3.msra.mxu1 %v3151_v58 }
 0x281   : > { %1329 = vst.msk [vmem:[#allocation4 + $0xf8] sm:$0xff] %vm1297_vm7, %v1264_v55  ;;  %3947 = vmatprep.subr.mxu1 %v3150_v60  ;;  %vm3132_vm7 = vcmask 589312  }
 0x282   : > { %v1455_v51 = vpop.permute.xlu1 %1454  ;;  %v2691_v52 = vmax.f32 %v2675_v50, %v2683_v46  ;;  %3948 = vmatpush3.msra.mxu1 %v3150_v60 }
 0x283   : > { %1521 = vst.msk [vmem:[#allocation4 + $0xf0] sm:$0xff] %vm1490_vm8, %v1455_v51  ;;  %3949 = vmatprep.subr.mxu1 %v3149_v63 }
 0x284   : > { %2727 = vst.msk [vmem:[#allocation3 + $0x41] sm:$0xff] %vm2576_vm13, %v2691_v52  ;;  %v2033_v57 = vpop.permute.xlu0 %2032  ;;  %3950 = vmatpush3.msra.mxu1 %v3149_v63 }
 0x285   : > { %2100 = vst.msk [vmem:[#allocation4 + $0xe8] sm:$0xff] %vm2070_vm11, %v2033_v57 }
 0x286   : > { %v1457_v2 = vpop.permute.xlu1 %1456  ;;  %v2131_v39 = vld [vmem:[#allocation4 + $0xe0] sm:$0xff] }
 0x287   : > { %1522 = vst.msk [vmem:[#allocation4 + $0xf8] sm:$0xff] %vm1490_vm8, %v1457_v2  ;;  %3927 = vmatprep.mubr.msk.f32.mxu0 %vm2140_vm12, %v2131_v39  ;;  %vm3158_vm8 = vcmask 588800  }
 0x288   : > { %v1649_v61 = vpop.permute.xlu0 %1648 }
 0x289   : > { %1715 = vst.msk [vmem:[#allocation4 + $0xf0] sm:$0xff] %vm1684_vm9, %v1649_v61 }
 0x28a   : > { %v1651_v62 = vpop.permute.xlu1 %1650 }
 0x28b   : > { %1716 = vst.msk [vmem:[#allocation4 + $0xf8] sm:$0xff] %vm1684_vm9, %v1651_v62  ;;  %v5192_v1 = vld [vmem:[#allocation3 + $0x41] sm:$0xff]  ;;  %vm3326_vm9 = vcmask 130048  }
 0x28c   : > { %v2849_v3 = vld [vmem:[#allocation3 + $0x40] sm:$0xff]  ;;  %2917 = vrot.lane.b32.xlu1 %v5192_v1, %s4056_s21  ;;  %v1842_v47 = vpop.permute.xlu0 %1841  ;;  %v2132_v9 = vld [vmem:[#allocation4 + $0xe8] sm:$0xff] }
 0x28d   : > { %2868 = vrot.lane.b32.xlu0 %v2849_v3, %s4054_s28  ;;  %2744 = vst.msk [vmem:[#allocation5 + $0x20] sm:$0xff] %vm2576_vm13, %v2849_v3  ;;  %3928 = vmatmul.mubr.msk.f32.gmra.mxu0 %vm2140_vm12, %v2132_v9  ;;  %v5220_v19 = vld [vmem:[#allocation3 + $0x42] sm:$0xff] }
 0x28e   : > { %v1844_v4 = vpop.permute.xlu1 %1843  ;;  %1908 = vst.msk [vmem:[#allocation4 + $0xf0] sm:$0xff] %vm1877_vm10, %v1842_v47 }
 0x28f   : > { %1909 = vst.msk [vmem:[#allocation4 + $0xf8] sm:$0xff] %vm1877_vm10, %v1844_v4  ;;  %v3911_v5 = vpop.f32.mrf.mxu0  ;;  %vm3437_vm10 = vcmask 261120  }
 0x290   : > { %v2490_v7 = vmul.f32 %v5204_v6, %v3911_v5  ;;  %3110 = vrot.lane.b32.xlu1 %v5115_v45, %s4060_s29  ;;  %v2035_v13 = vpop.permute.xlu0 %2034 }
 0x291   : > { %3061 = vrot.lane.b32.xlu0 %v5097_v59, %s4059_s27  ;;  %v2387_v8 = vpop.f32.mrf.mxu0  ;;  %2101 = vst.msk [vmem:[#allocation4 + $0xf0] sm:$0xff] %vm2070_vm11, %v2035_v13 }
 0x292   : > { %v2529_v11 = vadd.f32 %v5214_v10, %v2490_v7  ;;  %v2489_v48 = vmul.f32 %v5204_v6, %v2387_v8  ;;  %v2037_v14 = vpop.permute.xlu1 %2036 }
 0x293   : > { %2102 = vst.msk [vmem:[#allocation4 + $0xf8] sm:$0xff] %vm2070_vm11, %v2037_v14  ;;  %vm3439_vm11 = vcmask 392192  }
 0x294   : > { %v2561_v15 = vmax.f32 %v2529_v11, 0.0  ;;  %v2528_v59 = vadd.f32 %v5214_v10, %v2489_v48  ;;  %2821 = vrot.lane.b32.xlu1 %v5220_v19, %s4052_s26  ;;  %v2765_v17 = vpop.permute.xlu0 %2764 }
 0x295   : > { %2772 = vrot.lane.b32.xlu0 %v5192_v1, %s4049_s23  ;;  %2789 = vst.msk [vmem:[#allocation5] sm:$0xff] %vm2788_vm0, %v2765_v17 }
 0x296   : > { %2594 = vst.msk [vmem:[#allocation6 + $0x88] sm:$0xff] %vm2576_vm13, %v2561_v15  ;;  %v2560_v16 = vmax.f32 %v2528_v59, 0.0  ;;  %v2767_v27 = vpop.permute.xlu1 %2766 }
 0x297   : > { %2790 = vst.msk [vmem:[#allocation5 + $0x8] sm:$0xff] %vm2788_vm0, %v2767_v27 }
 0x298   : > { %2593 = vst.msk [vmem:[#allocation6 + $0x80] sm:$0xff] %vm2576_vm13, %v2560_v16  ;;  %3014 = vrot.lane.b32.xlu1 %v2849_v3, %s4058_s25  ;;  %v2814_v26 = vpop.permute.xlu0 %2813  ;;  %v2133_v22 = vld [vmem:[#allocation4 + $0xf0] sm:$0xff] }
 0x299   : > { %2964 = vrot.lane.b32.xlu0 %v5115_v45, %s4057_s24  ;;  %2838 = vst.msk [vmem:[#allocation5] sm:$0xff] %vm2837_vm1, %v2814_v26  ;;  %3930 = vmatprep.mubr.msk.f32.mxu0 %vm2140_vm12, %v2133_v22 }
 0x29a   : > { %v2816_v21 = vpop.permute.xlu1 %2815  ;;  %v2134_v30 = vld [vmem:[#allocation4 + $0xf8] sm:$0xff] }
 0x29b   : > { %2839 = vst.msk [vmem:[#allocation5 + $0x8] sm:$0xff] %vm2837_vm1, %v2816_v21  ;;  %3931 = vmatmul.mubr.msk.f32.gmra.mxu0 %vm2140_vm12, %v2134_v30  ;;  %vm3441_vm12 = vcmask 523264  }
 0x29c   : > { %v2863_v24 = vpop.permute.xlu0 %2862 }
 0x29d   : > { %2887 = vst.msk [vmem:[#allocation5] sm:$0xff] %vm2886_vm2, %v2863_v24 }
 0x29e   : > { %v2865_v25 = vpop.permute.xlu1 %2864 }
 0x29f   : > { %2888 = vst.msk [vmem:[#allocation5 + $0x8] sm:$0xff] %vm2886_vm2, %v2865_v25  ;;  %v2617_v38 = vld [vmem:[#allocation6 + $0x80] ss:$2 sm:$0xff]  ;;  %v2633_v56 = vld [vmem:[#allocation6 + $0x81] ss:$2 sm:$0xff] }
 0x2a0   : > { %v2912_v45 = vpop.permute.xlu0 %2911  ;;  %v2676_v35 = vmax.f32 %v2617_v38, %v2633_v56 }
 0x2a1   : > { %2936 = vst.msk [vmem:[#allocation5] sm:$0xff] %vm2935_vm3, %v2912_v45 }
 0x2a2   : > { %v2769_v12 = vpop.permute.xlu1 %2768 }
 0x2a3   : > { %2791 = vst.msk [vmem:[#allocation5 + $0x10] sm:$0xff] %vm2788_vm0, %v2769_v12 }
 0x2a4   : > { %v2914_v28 = vpop.permute.xlu0 %2913 }
 0x2a5   : > { %2937 = vst.msk [vmem:[#allocation5 + $0x8] sm:$0xff] %vm2935_vm3, %v2914_v28 }
 0x2a6   : > { %v2961_v29 = vpop.permute.xlu1 %2960 }
 0x2a7   : > { %2985 = vst.msk [vmem:[#allocation5] sm:$0xff] %vm2984_vm4, %v2961_v29 }
 0x2aa   : > { %v2818_v53 = vpop.permute.xlu1 %2817 }
 0x2ab   : > { %2840 = vst.msk [vmem:[#allocation5 + $0x10] sm:$0xff] %vm2837_vm1, %v2818_v53 }
 0x2ae   : > { %v3011_v20 = vpop.permute.xlu1 %3010 }
 0x2af   : > { %3035 = vst.msk [vmem:[#allocation5] sm:$0xff] %vm3034_vm5, %v3011_v20  ;;  %v3914_v34 = vpop.f32.mrf.mxu0 }
 0x2b0   : > { %v2492_v31 = vmul.f32 %v5204_v6, %v3914_v34 }
 0x2b1   : > { %v2397_v32 = vpop.f32.mrf.mxu0 }
 0x2b2   : > { %v2531_v36 = vadd.f32 %v5214_v10, %v2492_v31  ;;  %v2491_v18 = vmul.f32 %v5204_v6, %v2397_v32 }
 0x2b4   : > { %v2563_v33 = vmax.f32 %v2531_v36, 0.0  ;;  %v2530_v37 = vadd.f32 %v5214_v10, %v2491_v18 }
 0x2b6   : > { %2596 = vst.msk [vmem:[#allocation6 + $0x98] sm:$0xff] %vm2576_vm13, %v2563_v33  ;;  %v2562_v23 = vmax.f32 %v2530_v37, 0.0 }
 0x2b8   : > { %2595 = vst.msk [vmem:[#allocation6 + $0x90] sm:$0xff] %vm2576_vm13, %v2562_v23 }
 0x2be   : > { %v2867_v41 = vpop.permute.xlu1 %2866 }
 0x2bf   : > { %v2771_v42 = vpop.permute.xlu0 %2770  ;;  %v2649_v43 = vld [vmem:[#allocation6 + $0x90] ss:$2 sm:$0xff]  ;;  %v2665_v44 = vld [vmem:[#allocation6 + $0x91] ss:$2 sm:$0xff]  ;;  %2889 = vst.msk [vmem:[#allocation5 + $0x10] sm:$0xff] %vm2886_vm2, %v2867_v41 }
 0x2c0   : > { %2792 = vst.msk [vmem:[#allocation5 + $0x18] sm:$0xff] %vm2788_vm0, %v2771_v42  ;;  %v2684_v49 = vmax.f32 %v2649_v43, %v2665_v44 }
 0x2c2   : > { %v3060_v50 = vpop.permute.xlu1 %3059  ;;  %v2692_v40 = vmax.f32 %v2676_v35, %v2684_v49 }
 0x2c3   : > { %v2963_v46 = vpop.permute.xlu0 %2962  ;;  %3084 = vst.msk [vmem:[#allocation5] sm:$0xff] %vm3083_vm6, %v3060_v50 }
 0x2c4   : > { %2986 = vst.msk [vmem:[#allocation5 + $0x8] sm:$0xff] %vm2984_vm4, %v2963_v46 }
 0x2c5   : > { %2728 = vst.msk [vmem:[#allocation3 + $0x51] sm:$0xff] %vm2576_vm13, %v2692_v40 }
 0x2c6   : > { %v2916_v55 = vpop.permute.xlu1 %2915 }
 0x2c7   : > { %v2820_v51 = vpop.permute.xlu0 %2819  ;;  %2938 = vst.msk [vmem:[#allocation5 + $0x10] sm:$0xff] %vm2935_vm3, %v2916_v55 }
 0x2c8   : > { %2841 = vst.msk [vmem:[#allocation5 + $0x18] sm:$0xff] %vm2837_vm1, %v2820_v51 }
 0x2ca   : > { %v3109_v52 = vpop.permute.xlu1 %3108 }
 0x2cb   : > { %v3013_v54 = vpop.permute.xlu0 %3012  ;;  %3133 = vst.msk [vmem:[#allocation5] sm:$0xff] %vm3132_vm7, %v3109_v52 }
 0x2cc   : > { %3036 = vst.msk [vmem:[#allocation5 + $0x8] sm:$0xff] %vm3034_vm5, %v3013_v54  ;;  %v2850_v58 = vld [vmem:[#allocation3 + $0x50] sm:$0xff] }
 0x2cd   : > { %v5261_v57 = vld [vmem:[#allocation3 + $0x51] sm:$0xff]  ;;  %2870 = vrot.lane.b32.xlu1 %v2850_v58, %s4054_s28  ;;  %2745 = vst.msk [vmem:[#allocation5 + $0x28] sm:$0xff] %vm2576_vm13, %v2850_v58 }
 0x2ce   : > { %2774 = vrot.lane.b32.xlu0 %v5261_v57, %s4049_s23  ;;  %v5275_v3 = vld [vmem:[#allocation3 + $0x52] sm:$0xff] }
 0x2cf   : > { %v3917_v2 = vpop.f32.mrf.mxu0 }
 0x2d0   : > { %v2494_v39 = vmul.f32 %v5204_v6, %v3917_v2 }
 0x2d1   : > { %3063 = vrot.lane.b32.xlu1 %v5192_v1, %s4059_s27  ;;  %v2407_v60 = vpop.f32.mrf.mxu0 }
 0x2d2   : > { %2966 = vrot.lane.b32.xlu0 %v5220_v19, %s4057_s24  ;;  %v2533_v63 = vadd.f32 %v5214_v10, %v2494_v39  ;;  %v2493_v61 = vmul.f32 %v5204_v6, %v2407_v60  ;;  %v3141_v62 = vld [vmem:[#allocation5] sm:$0xff] }
 0x2d3   : > { %3951 = vmatprep.mubr.msk.f32.mxu1 %vm3158_vm8, %v3141_v62 }
 0x2d4   : > { %v2565_v47 = vmax.f32 %v2533_v63, 0.0  ;;  %v2532_v4 = vadd.f32 %v5214_v10, %v2493_v61 }
 0x2d5   : > { %2919 = vrot.lane.b32.xlu1 %v5261_v57, %s4056_s21 }
 0x2d6   : > { %2823 = vrot.lane.b32.xlu0 %v5275_v3, %s4052_s26  ;;  %2598 = vst.msk [vmem:[#allocation6 + $0xa8] sm:$0xff] %vm2576_vm13, %v2565_v47  ;;  %v2564_v1 = vmax.f32 %v2532_v4, 0.0 }
 0x2d8   : > { %2597 = vst.msk [vmem:[#allocation6 + $0xa0] sm:$0xff] %vm2576_vm13, %v2564_v1 }
 0x2d9   : > { %3112 = vrot.lane.b32.xlu1 %v5220_v19, %s4060_s29 }
 0x2da   : > { %3016 = vrot.lane.b32.xlu0 %v2850_v58, %s4058_s25 }
 0x2df   : > { %v2619_v15 = vld [vmem:[#allocation6 + $0xa0] ss:$2 sm:$0xff]  ;;  %v2635_v19 = vld [vmem:[#allocation6 + $0xa1] ss:$2 sm:$0xff] }
 0x2e0   : > { %v2677_v26 = vmax.f32 %v2619_v15, %v2635_v19 }
 0x2ef   : > { %v3920_v9 = vpop.f32.mrf.mxu0 }
 0x2f0   : > { %v2496_v5 = vmul.f32 %v5204_v6, %v3920_v9 }
 0x2f1   : > { %v2417_v7 = vpop.f32.mrf.mxu0 }
 0x2f2   : > { %v2535_v8 = vadd.f32 %v5214_v10, %v2496_v5  ;;  %v2495_v11 = vmul.f32 %v5204_v6, %v2417_v7 }
 0x2f4   : > { %v2567_v48 = vmax.f32 %v2535_v8, 0.0  ;;  %v2534_v13 = vadd.f32 %v5214_v10, %v2495_v11 }
 0x2f6   : > { %2600 = vst.msk [vmem:[#allocation6 + $0xb8] sm:$0xff] %vm2576_vm13, %v2567_v48  ;;  %v2566_v14 = vmax.f32 %v2534_v13, 0.0 }
 0x2f8   : > { %2599 = vst.msk [vmem:[#allocation6 + $0xb0] sm:$0xff] %vm2576_vm13, %v2566_v14 }
 0x2fe   : > { %v2918_v59 = vpop.permute.xlu1 %2917 }
 0x2ff   : > { %v2869_v16 = vpop.permute.xlu0 %2868  ;;  %v2651_v17 = vld [vmem:[#allocation6 + $0xb0] ss:$2 sm:$0xff]  ;;  %v2667_v27 = vld [vmem:[#allocation6 + $0xb1] ss:$2 sm:$0xff] }
 0x300   : > { %2890 = vst.msk [vmem:[#allocation5 + $0x18] sm:$0xff] %vm2886_vm2, %v2869_v16  ;;  %v2685_v21 = vmax.f32 %v2651_v17, %v2667_v27 }
 0x301   : > { %2939 = vst.msk [vmem:[#allocation5 + $0x18] sm:$0xff] %vm2935_vm3, %v2918_v59 }
 0x302   : > { %v3111_v22 = vpop.permute.xlu1 %3110  ;;  %v2693_v24 = vmax.f32 %v2677_v26, %v2685_v21 }
 0x303   : > { %v3062_v30 = vpop.permute.xlu0 %3061 }
 0x304   : > { %3085 = vst.msk [vmem:[#allocation5 + $0x8] sm:$0xff] %vm3083_vm6, %v3062_v30 }
 0x305   : > { %3134 = vst.msk [vmem:[#allocation5 + $0x8] sm:$0xff] %vm3132_vm7, %v3111_v22 }
 0x306   : > { %2729 = vst.msk [vmem:[#allocation3 + $0x61] sm:$0xff] %vm2576_vm13, %v2693_v24  ;;  %v2822_v25 = vpop.permute.xlu1 %2821 }
 0x307   : > { %v2773_v45 = vpop.permute.xlu0 %2772 }
 0x308   : > { %2793 = vst.msk [vmem:[#allocation5 + $0x20] sm:$0xff] %vm2788_vm0, %v2773_v45 }
 0x309   : > { %2842 = vst.msk [vmem:[#allocation5 + $0x20] sm:$0xff] %vm2837_vm1, %v2822_v25 }
 0x30a   : > { %v3015_v12 = vpop.permute.xlu1 %3014 }
 0x30b   : > { %v2965_v28 = vpop.permute.xlu0 %2964 }
 0x30c   : > { %2987 = vst.msk [vmem:[#allocation5 + $0x10] sm:$0xff] %vm2984_vm4, %v2965_v28  ;;  %v3142_v29 = vld [vmem:[#allocation5 + $0x8] sm:$0xff] }
 0x30d   : > { %v5301_v53 = vld [vmem:[#allocation3 + $0x61] sm:$0xff]  ;;  %3037 = vst.msk [vmem:[#allocation5 + $0x10] sm:$0xff] %vm3034_vm5, %v3015_v12  ;;  %3952 = vmatmul.mubr.msk.f32.vlgmr.msra.gmra.mxu1 %vm3158_vm8, %v3142_v29 }
 0x30e   : > { %v2851_v20 = vld [vmem:[#allocation3 + $0x60] sm:$0xff]  ;;  %2921 = vrot.lane.b32.xlu1 %v5301_v53, %s4056_s21 }
 0x30f   : > { %2746 = vst.msk [vmem:[#allocation5 + $0x30] sm:$0xff] %vm2576_vm13, %v2851_v20  ;;  %2872 = vrot.lane.b32.xlu0 %v2851_v20, %s4054_s28  ;;  %v3923_v34 = vpop.f32.mrf.mxu0  ;;  %v5316_v33 = vld [vmem:[#allocation3 + $0x62] sm:$0xff] }
 0x310   : > { %v2498_v31 = vmul.f32 %v5204_v6, %v3923_v34  ;;  %v3050_v34 = vld [vmem:[#allocation3 + $0x91] sm:$0xff] }
 0x311   : > { %v2427_v32 = vpop.f32.mrf.mxu0 }
 0x312   : > { %3114 = vrot.lane.b32.xlu1 %v5275_v3, %s4060_s29  ;;  %v2537_v36 = vadd.f32 %v5214_v10, %v2498_v31  ;;  %v2497_v18 = vmul.f32 %v5204_v6, %v2427_v32 }
 0x313   : > { %3065 = vrot.lane.b32.xlu0 %v5261_v57, %s4059_s27 }
 0x314   : > { %v2569_v37 = vmax.f32 %v2537_v36, 0.0  ;;  %v2536_v23 = vadd.f32 %v5214_v10, %v2497_v18  ;;  %v3099_v18 = vld [vmem:[#allocation3 + $0x92] sm:$0xff] }
 0x316   : > { %2825 = vrot.lane.b32.xlu1 %v5316_v33, %s4052_s26  ;;  %2602 = vst.msk [vmem:[#allocation6 + $0xc8] sm:$0xff] %vm2576_vm13, %v2569_v37  ;;  %v2568_v38 = vmax.f32 %v2536_v23, 0.0 }
 0x317   : > { %2776 = vrot.lane.b32.xlu0 %v5301_v53, %s4049_s23 }
 0x318   : > { %2601 = vst.msk [vmem:[#allocation6 + $0xc0] sm:$0xff] %vm2576_vm13, %v2568_v38 }
 0x31a   : > { %3018 = vrot.lane.b32.xlu1 %v2851_v20, %s4058_s25 }
 0x31b   : > { %2968 = vrot.lane.b32.xlu0 %v5275_v3, %s4057_s24 }
 0x31f   : > { %v2621_v46 = vld [vmem:[#allocation6 + $0xc0] ss:$2 sm:$0xff]  ;;  %v2637_v40 = vld [vmem:[#allocation6 + $0xc1] ss:$2 sm:$0xff] }
 0x320   : > { %v2678_v58 = vmax.f32 %v2621_v46, %v2637_v40 }
 0x32f   : > { %v3926_v56 = vpop.f32.mrf.mxu0 }
 0x330   : > { %v2500_v41 = vmul.f32 %v5204_v6, %v3926_v56 }
 0x331   : > { %v2437_v42 = vpop.f32.mrf.mxu0 }
 0x332   : > { %v2539_v43 = vadd.f32 %v5214_v10, %v2500_v41  ;;  %v2499_v44 = vmul.f32 %v5204_v6, %v2437_v42 }
 0x334   : > { %v2571_v35 = vmax.f32 %v2539_v43, 0.0  ;;  %v2538_v49 = vadd.f32 %v5214_v10, %v2499_v44 }
 0x336   : > { %2604 = vst.msk [vmem:[#allocation6 + $0xd8] sm:$0xff] %vm2576_vm13, %v2571_v35  ;;  %v2570_v50 = vmax.f32 %v2538_v49, 0.0 }
 0x338   : > { %2603 = vst.msk [vmem:[#allocation6 + $0xd0] sm:$0xff] %vm2576_vm13, %v2570_v50 }
 0x33f   : > { %v2871_v55 = vpop.permute.xlu1 %2870  ;;  %v2653_v52 = vld [vmem:[#allocation6 + $0xd0] ss:$2 sm:$0xff]  ;;  %v2669_v54 = vld [vmem:[#allocation6 + $0xd1] ss:$2 sm:$0xff] }
 0x340   : > { %v2775_v51 = vpop.permute.xlu0 %2774  ;;  %2891 = vst.msk [vmem:[#allocation5 + $0x20] sm:$0xff] %vm2886_vm2, %v2871_v55  ;;  %v2686_v57 = vmax.f32 %v2653_v52, %v2669_v54  ;;  %v5399_v55 = vld [vmem:[%s5600_s5] ss:$0 sm:$0xff] }
 0x341   : > { %2794 = vst.msk [vmem:[#allocation5 + $0x28] sm:$0xff] %vm2788_vm0, %v2775_v51  ;;  %v5406_v52 = vld [vmem:[%s5601_s6] ss:$0 sm:$0xff] }
 0x342   : > { %v2694_v60 = vmax.f32 %v2678_v58, %v2686_v57 }
 0x343   : > { %v3064_v2 = vpop.permute.xlu1 %3063 }
 0x344   : > { %v2967_v39 = vpop.permute.xlu0 %2966  ;;  %3086 = vst.msk [vmem:[#allocation5 + $0x10] sm:$0xff] %vm3083_vm6, %v3064_v2 }
 0x345   : > { %2988 = vst.msk [vmem:[#allocation5 + $0x18] sm:$0xff] %vm2984_vm4, %v2967_v39 }
 0x346   : > { %2730 = vst.msk [vmem:[#allocation3 + $0x71] sm:$0xff] %vm2576_vm13, %v2694_v60 }
 0x347   : > { %v2920_v63 = vpop.permute.xlu1 %2919 }
 0x348   : > { %v2824_v61 = vpop.permute.xlu0 %2823  ;;  %2940 = vst.msk [vmem:[#allocation5 + $0x20] sm:$0xff] %vm2935_vm3, %v2920_v63 }
 0x349   : > { %2843 = vst.msk [vmem:[#allocation5 + $0x28] sm:$0xff] %vm2837_vm1, %v2824_v61 }
 0x34b   : > { %v3113_v62 = vpop.permute.xlu1 %3112 }
 0x34c   : > { %v3017_v3 = vpop.permute.xlu0 %3016  ;;  %3135 = vst.msk [vmem:[#allocation5 + $0x10] sm:$0xff] %vm3132_vm7, %v3113_v62 }
 0x34d   : > { %3038 = vst.msk [vmem:[#allocation5 + $0x18] sm:$0xff] %vm3034_vm5, %v3017_v3  ;;  %v2852_v47 = vld [vmem:[#allocation3 + $0x70] sm:$0xff]  ;;  %v3929_v1 = vpop.f32.mrf.mxu0 }
 0x34e   : > { %v2755_v4 = vld [vmem:[#allocation3 + $0x71] sm:$0xff]  ;;  %2874 = vrot.lane.b32.xlu1 %v2852_v47, %s4054_s28  ;;  %2747 = vst.msk [vmem:[#allocation5 + $0x38] sm:$0xff] %vm2576_vm13, %v2852_v47  ;;  %v2502_v9 = vmul.f32 %v5204_v6, %v3929_v1 }
 0x34f   : > { %2778 = vrot.lane.b32.xlu0 %v2755_v4, %s4049_s23  ;;  %v2447_v5 = vpop.f32.mrf.mxu0  ;;  %v2804_v48 = vld [vmem:[#allocation3 + $0x72] sm:$0xff]  ;;  %s4061_s23 = smov 80  }
 0x350   : > { %v2541_v7 = vadd.f32 %v5214_v10, %v2502_v9  ;;  %v2501_v8 = vmul.f32 %v5204_v6, %v2447_v5 }
 0x352   : > { %3067 = vrot.lane.b32.xlu1 %v5301_v53, %s4059_s27  ;;  %v2573_v13 = vmax.f32 %v2541_v7, 0.0  ;;  %v2540_v14 = vadd.f32 %v5214_v10, %v2501_v8 }
 0x353   : > { %2970 = vrot.lane.b32.xlu0 %v5316_v33, %s4057_s24  ;;  %v3143_v11 = vld [vmem:[#allocation5 + $0x10] sm:$0xff] }
 0x354   : > { %3954 = vmatprep.mubr.msk.f32.mxu1 %vm3158_vm8, %v3143_v11  ;;  %2606 = vst.msk [vmem:[#allocation6 + $0xe8] sm:$0xff] %vm2576_vm13, %v2573_v13  ;;  %v2572_v15 = vmax.f32 %v2540_v14, 0.0 }
 0x356   : > { %2923 = vrot.lane.b32.xlu1 %v2755_v4, %s4056_s21  ;;  %2605 = vst.msk [vmem:[#allocation6 + $0xe0] sm:$0xff] %vm2576_vm13, %v2572_v15 }
 0x357   : > { %2827 = vrot.lane.b32.xlu0 %v2804_v48, %s4052_s26 }
 0x35a   : > { %3116 = vrot.lane.b32.xlu1 %v5316_v33, %s4060_s29 }
 0x35b   : > { %3020 = vrot.lane.b32.xlu0 %v2852_v47, %s4058_s25  ;;  %v3932_v19 = vpop.f32.mrf.mxu0 }
 0x35c   : > { %v2504_v59 = vmul.f32 %v5204_v6, %v3932_v19 }
 0x35d   : > { %v2457_v16 = vpop.f32.mrf.mxu0  ;;  %v2623_v30 = vld [vmem:[#allocation6 + $0xe0] ss:$2 sm:$0xff]  ;;  %v2639_v24 = vld [vmem:[#allocation6 + $0xe1] ss:$2 sm:$0xff] }
 0x35e   : > { %2972 = vrot.lane.b32.xlu1 %v2804_v48, %s4057_s24  ;;  %v2543_v17 = vadd.f32 %v5214_v10, %v2504_v59  ;;  %v2503_v27 = vmul.f32 %v5204_v6, %v2457_v16  ;;  %v2679_v12 = vmax.f32 %v2623_v30, %v2639_v24  ;;  %v3001_v6 = vld [vmem:[#allocation3 + $0x90] sm:$0xff]  ;;  %v3487_v24 = vld [vmem:[%s5602_s7 + $0xf8] sm:$0xff] }
 0x35f   : > { %3835 = vmatprep.subr.mxu1 %v3487_v24  ;;  %v3460_v24 = vld [vmem:[%s5602_s7 + $0x20] sm:$0xff] }
 0x360   : > { %v2575_v26 = vmax.f32 %v2543_v17, 0.0  ;;  %v2542_v21 = vadd.f32 %v5214_v10, %v2503_v27 }
 0x362   : > { %2608 = vst.msk [vmem:[#allocation6 + $0xf8] sm:$0xff] %vm2576_vm13, %v2575_v26  ;;  %v2574_v22 = vmax.f32 %v2542_v21, 0.0 }
 0x364   : > { %2607 = vst.msk [vmem:[#allocation6 + $0xf0] sm:$0xff] %vm2576_vm13, %v2574_v22 }
 0x36b   : > { %v2655_v25 = vld [vmem:[#allocation6 + $0xf0] ss:$2 sm:$0xff]  ;;  %v2671_v45 = vld [vmem:[#allocation6 + $0xf1] ss:$2 sm:$0xff] }
 0x36c   : > { %v2687_v28 = vmax.f32 %v2655_v25, %v2671_v45  ;;  %v3471_v25 = vld [vmem:[%s5602_s7 + $0x78] sm:$0xff]  ;;  %v3486_v45 = vld [vmem:[%s5602_s7 + $0xf0] sm:$0xff] }
 0x36d   : > { %3836 = vmatpush3.msra.mxu1 %v3471_v25 }
 0x36e   : > { %v2695_v29 = vmax.f32 %v2679_v12, %v2687_v28  ;;  %v3470_v12 = vld [vmem:[%s5602_s7 + $0x70] sm:$0xff]  ;;  %v3485_v28 = vld [vmem:[%s5602_s7 + $0xe8] sm:$0xff]  ;;  %3837 = vmatprep.subr.mxu1 %v3486_v45 }
 0x36f   : > { %3838 = vmatpush3.msra.mxu1 %v3470_v12  ;;  %v3475_v12 = vld [vmem:[%s5602_s7 + $0x98] sm:$0xff] }
 0x370   : > { %2731 = vst.msk [vmem:[#allocation3 + $0x81] sm:$0xff] %vm2576_vm13, %v2695_v29  ;;  %v3469_v29 = vld [vmem:[%s5602_s7 + $0x68] sm:$0xff]  ;;  %3839 = vmatprep.subr.mxu1 %v3485_v28  ;;  %vm3443_vm13 = vcmask 654336  }
 0x371   : > { %3840 = vmatpush3.msra.mxu1 %v3469_v29  ;;  %v3459_v29 = vld [vmem:[%s5602_s7 + $0x18] sm:$0xff] }
 0x377   : > { %v2951_v53 = vld [vmem:[#allocation3 + $0x82] sm:$0xff] }
 0x378   : > { %v2853_v20 = vld [vmem:[#allocation3 + $0x80] sm:$0xff]  ;;  %2974 = vrot.lane.b32.xlu1 %v2951_v53, %s4057_s24  ;;  %s4063_s24 = smov 112  }
 0x379   : > { %2876 = vrot.lane.b32.xlu0 %v2853_v20, %s4054_s28  ;;  %v2902_v32 = vld [vmem:[#allocation3 + $0x81] sm:$0xff]  ;;  %s4062_s28 = smov 96  }
 0x37c   : > { %3024 = vrot.lane.b32.xlu1 %v3001_v6, %s4058_s25  ;;  %v3483_v6 = vld [vmem:[%s5602_s7 + $0xd8] sm:$0xff] }
 0x37d   : > { %3069 = vrot.lane.b32.xlu0 %v2755_v4, %s4059_s27 }
 0x380   : > { %v2922_v10 = vpop.permute.xlu1 %2921  ;;  %3073 = vrot.lane.b32.xlu1 %v3050_v34, %s4059_s27  ;;  %v3482_v34 = vld [vmem:[%s5602_s7 + $0xd0] sm:$0xff] }
 0x381   : > { %v2873_v31 = vpop.permute.xlu0 %2872  ;;  %2925 = vrot.lane.b32.xlu0 %v2902_v32, %s4056_s21 }
 0x382   : > { %2892 = vst.msk [vmem:[#allocation5 + $0x28] sm:$0xff] %vm2886_vm2, %v2873_v31 }
 0x383   : > { %2941 = vst.msk [vmem:[#allocation5 + $0x28] sm:$0xff] %vm2935_vm3, %v2922_v10  ;;  %v3467_v10 = vld [vmem:[%s5602_s7 + $0x58] sm:$0xff] }
 0x384   : > { %v3115_v36 = vpop.permute.xlu1 %3114  ;;  %3122 = vrot.lane.b32.xlu1 %v3099_v18, %s4060_s29 }
 0x385   : > { %v3066_v33 = vpop.permute.xlu0 %3065  ;;  %3118 = vrot.lane.b32.xlu0 %v2804_v48, %s4060_s29 }
 0x386   : > { %3087 = vst.msk [vmem:[#allocation5 + $0x18] sm:$0xff] %vm3083_vm6, %v3066_v33 }
 0x387   : > { %3136 = vst.msk [vmem:[#allocation5 + $0x18] sm:$0xff] %vm3132_vm7, %v3115_v36 }
 0x388   : > { %v2826_v37 = vpop.permute.xlu1 %2825 }
 0x389   : > { %v2777_v23 = vpop.permute.xlu0 %2776  ;;  %3022 = vrot.lane.b32.xlu0 %v2853_v20, %s4058_s25  ;;  %v3468_v20 = vld [vmem:[%s5602_s7 + $0x60] sm:$0xff] }
 0x38a   : > { %2795 = vst.msk [vmem:[#allocation5 + $0x30] sm:$0xff] %vm2788_vm0, %v2777_v23 }
 0x38b   : > { %2844 = vst.msk [vmem:[#allocation5 + $0x30] sm:$0xff] %vm2837_vm1, %v2826_v37 }
 0x38c   : > { %v3019_v38 = vpop.permute.xlu1 %3018 }
 0x38d   : > { %v2969_v56 = vpop.permute.xlu0 %2968  ;;  %3071 = vrot.lane.b32.xlu0 %v2902_v32, %s4059_s27 }
 0x38e   : > { %2989 = vst.msk [vmem:[#allocation5 + $0x20] sm:$0xff] %vm2984_vm4, %v2969_v56  ;;  %v3144_v41 = vld [vmem:[#allocation5 + $0x18] sm:$0xff] }
 0x38f   : > { %3039 = vst.msk [vmem:[#allocation5 + $0x20] sm:$0xff] %vm3034_vm5, %v3019_v38  ;;  %3955 = vmatmul.mubr.msk.f32.gmra.mxu1 %vm3158_vm8, %v3144_v41 }
 0x391   : > { %3120 = vrot.lane.b32.xlu0 %v2951_v53, %s4060_s29  ;;  %v3484_v53 = vld [vmem:[%s5602_s7 + $0xe0] sm:$0xff] }
 0x392   : > { %3841 = vmatprep.subr.mxu1 %v3484_v53 }
 0x393   : > { %3842 = vmatpush3.msra.mxu1 %v3468_v20 }
 0x394   : > { %3843 = vmatprep.subr.mxu1 %v3483_v6 }
 0x395   : > { %3844 = vmatpush3.msra.mxu1 %v3467_v10 }
 0x396   : > { %3845 = vmatprep.subr.mxu1 %v3482_v34  ;;  %v3474_v34 = vld [vmem:[%s5602_s7 + $0x90] sm:$0xff] }
 0x3c0   : > { %v2875_v42 = vpop.permute.xlu1 %2874 }
 0x3c1   : > { %v2779_v43 = vpop.permute.xlu0 %2778  ;;  %2893 = vst.msk [vmem:[#allocation5 + $0x30] sm:$0xff] %vm2886_vm2, %v2875_v42 }
 0x3c2   : > { %2796 = vst.msk [vmem:[#allocation5 + $0x38] sm:$0xff] %vm2788_vm0, %v2779_v43  ;;  %vm4064_vm0 = vmmov 0  }
 0x3c4   : > { %v3068_v44 = vpop.permute.xlu1 %3067 }
 0x3c5   : > { %v2971_v35 = vpop.permute.xlu0 %2970  ;;  %3088 = vst.msk [vmem:[#allocation5 + $0x20] sm:$0xff] %vm3083_vm6, %v3068_v44  ;;  %v3466_v44 = vld [vmem:[%s5602_s7 + $0x50] sm:$0xff] }
 0x3c6   : > { %2990 = vst.msk [vmem:[#allocation5 + $0x28] sm:$0xff] %vm2984_vm4, %v2971_v35  ;;  %3846 = vmatpush3.msra.mxu1 %v3466_v44 }
 0x3c8   : > { %v2924_v49 = vpop.permute.xlu1 %2923 }
 0x3c9   : > { %v2828_v50 = vpop.permute.xlu0 %2827  ;;  %2942 = vst.msk [vmem:[#allocation5 + $0x30] sm:$0xff] %vm2935_vm3, %v2924_v49 }
 0x3ca   : > { %2845 = vst.msk [vmem:[#allocation5 + $0x38] sm:$0xff] %vm2837_vm1, %v2828_v50  ;;  %v3481_v50 = vld [vmem:[%s5602_s7 + $0xc8] sm:$0xff] }
 0x3cb   : > { %3847 = vmatprep.subr.mxu1 %v3481_v50 }
 0x3cc   : > { %v3117_v46 = vpop.permute.xlu1 %3116 }
 0x3cd   : > { %v3021_v40 = vpop.permute.xlu0 %3020  ;;  %3137 = vst.msk [vmem:[#allocation5 + $0x20] sm:$0xff] %vm3132_vm7, %v3117_v46  ;;  %v3953_v51 = vpop.f32.mrf.mxu1 }
 0x3ce   : > { %3040 = vst.msk [vmem:[#allocation5 + $0x28] sm:$0xff] %vm3034_vm5, %v3021_v40  ;;  %v3296_v54 = vmul.f32 %v3953_v51, %v5399_v55 }
 0x3cf   : > { %v3249_v58 = vpop.f32.mrf.mxu1 }
 0x3d0   : > { %v2973_v57 = vpop.permute.xlu1 %2972  ;;  %v3311_v2 = vadd.f32 %v5406_v52, %v3296_v54  ;;  %v3295_v39 = vmul.f32 %v5399_v55, %v3249_v58 }
 0x3d1   : > { %2991 = vst.msk [vmem:[#allocation5 + $0x30] sm:$0xff] %vm2984_vm4, %v2973_v57  ;;  %v3465_v57 = vld [vmem:[%s5602_s7 + $0x48] sm:$0xff] }
 0x3d2   : > { %v3319_v60 = vmax.f32 %v3311_v2, 0.0  ;;  %v3310_v63 = vadd.f32 %v5406_v52, %v3295_v39  ;;  %v3480_v2 = vld [vmem:[%s5602_s7 + $0xc0] sm:$0xff]  ;;  %3848 = vmatpush3.msra.mxu1 %v3465_v57 }
 0x3d3   : > { %3849 = vmatprep.subr.mxu1 %v3480_v2 }
 0x3d4   : > { %v3145_v61 = vld [vmem:[#allocation5 + $0x20] sm:$0xff]  ;;  %3328 = vst.msk [vmem:[#allocation7 + $0x8] sm:$0xff] %vm3326_vm9, %v3319_v60  ;;  %v3318_v62 = vmax.f32 %v3310_v63, 0.0 }
 0x3d5   : > { %3957 = vmatprep.mubr.msk.f32.mxu1 %vm3158_vm8, %v3145_v61 }
 0x3d6   : > { %3327 = vst.msk [vmem:[#allocation7] sm:$0xff] %vm3326_vm9, %v3318_v62 }
 0x3db   : > { %v3351_v42 = vld [vmem:[#allocation7 + $0x8] ss:$2 sm:$0xf]  ;;  %v3359_v43 = vld [vmem:[#allocation7 + $0x9] ss:$2 sm:$0xf] }
 0x3dc   : > { %v3370_v58 = vmax.f32 %v3351_v42, %v3359_v43  ;;  %v3456_v42 = vld [vmem:[%s5602_s7] sm:$0xff] }
 0x3dd   : > { %v3335_v56 = vld [vmem:[#allocation7] ss:$2 sm:$0xf]  ;;  %v3343_v41 = vld [vmem:[#allocation7 + $0x1] ss:$2 sm:$0xf] }
 0x3de   : > { %v3366_v49 = vmax.f32 %v3335_v56, %v3343_v41  ;;  %v3472_v56 = vld [vmem:[%s5602_s7 + $0x80] sm:$0xff] }
 0x3ea   : > { %v2975_v3 = vpop.permute.xlu1 %2974 }
 0x3eb   : > { %v2877_v47 = vpop.permute.xlu0 %2876 }
 0x3ec   : > { %2894 = vst.msk [vmem:[#allocation5 + $0x38] sm:$0xff] %vm2886_vm2, %v2877_v47  ;;  %v5490_v47 = vmax.f32 %v3366_v49, %v3370_v58  ;;  %vm3652_vm2 = vcmask 39936  }
 0x3ee   : > { %v3025_v1 = vpop.permute.xlu1 %3024  ;;  %v3387_v25 = vrot.slane %v5490_v47, 3 }
 0x3ef   : > { %v3070_v4 = vpop.permute.xlu0 %3069 }
 0x3f0   : > { %3089 = vst.msk [vmem:[#allocation5 + $0x28] sm:$0xff] %vm3083_vm6, %v3070_v4  ;;  %v3464_v4 = vld [vmem:[%s5602_s7 + $0x40] sm:$0xff] }
 0x3f1   : > { %3850 = vmatpush3.msra.mxu1 %v3464_v4 }
 0x3f2   : > { %v3074_v5 = vpop.permute.xlu1 %3073 }
 0x3f3   : > { %v2926_v9 = vpop.permute.xlu0 %2925 }
 0x3f4   : > { %2943 = vst.msk [vmem:[#allocation5 + $0x38] sm:$0xff] %vm2935_vm3, %v2926_v9 }
 0x3f5   : > { %2992 = vst.msk [vmem:[#allocation5 + $0x38] sm:$0xff] %vm2984_vm4, %v2975_v3  ;;  %vm3654_vm4 = vcmask 73728  }
 0x3f6   : > { %3042 = vst.msk [vmem:[#allocation5 + $0x38] sm:$0xff] %vm3034_vm5, %v3025_v1  ;;  %v3123_v8 = vpop.permute.xlu1 %3122  ;;  %v3479_v1 = vld [vmem:[%s5602_s7 + $0xb8] sm:$0xff] }
 0x3f7   : > { %v3119_v7 = vpop.permute.xlu0 %3118  ;;  %3091 = vst.msk [vmem:[#allocation5 + $0x38] sm:$0xff] %vm3083_vm6, %v3074_v5  ;;  %3851 = vmatprep.subr.mxu1 %v3479_v1 }
 0x3f8   : > { %3138 = vst.msk [vmem:[#allocation5 + $0x28] sm:$0xff] %vm3132_vm7, %v3119_v7  ;;  %3140 = vst.msk [vmem:[#allocation5 + $0x38] sm:$0xff] %vm3132_vm7, %v3123_v8  ;;  %v3478_v7 = vld [vmem:[%s5602_s7 + $0xb0] sm:$0xff] }
 0x3fb   : > { %v3023_v11 = vpop.permute.xlu0 %3022 }
 0x3fc   : > { %3041 = vst.msk [vmem:[#allocation5 + $0x30] sm:$0xff] %vm3034_vm5, %v3023_v11  ;;  %v3462_v11 = vld [vmem:[%s5602_s7 + $0x30] sm:$0xff] }
 0x3ff   : > { %v3072_v48 = vpop.permute.xlu0 %3071  ;;  %v3146_v13 = vld [vmem:[#allocation5 + $0x28] sm:$0xff]  ;;  %v3148_v15 = vld [vmem:[#allocation5 + $0x38] sm:$0xff] }
 0x400   : > { %3090 = vst.msk [vmem:[#allocation5 + $0x30] sm:$0xff] %vm3083_vm6, %v3072_v48  ;;  %3958 = vmatmul.mubr.msk.f32.gmra.mxu1 %vm3158_vm8, %v3146_v13  ;;  %v3383_v13 = vrot.slane %v5490_v47, 2 }
 0x403   : > { %v3121_v14 = vpop.permute.xlu0 %3120 }
 0x404   : > { %3139 = vst.msk [vmem:[#allocation5 + $0x30] sm:$0xff] %vm3132_vm7, %v3121_v14 }
 0x40b   : > { %v3147_v19 = vld [vmem:[#allocation5 + $0x30] sm:$0xff] }
 0x40c   : > { %3960 = vmatprep.mubr.msk.f32.mxu1 %vm3158_vm8, %v3147_v19 }
 0x40d   : > { %3961 = vmatmul.mubr.msk.f32.gmra.mxu1 %vm3158_vm8, %v3148_v15  ;;  %v3379_v15 = vrot.slane %v5490_v47, 1 }
 0x44f   : > { %v3956_v59 = vpop.f32.mrf.mxu1 }
 0x450   : > { %v3298_v16 = vmul.f32 %v3956_v59, %v5399_v55  ;;  %v3461_v59 = vld [vmem:[%s5602_s7 + $0x28] sm:$0xff] }
 0x451   : > { %v3259_v17 = vpop.f32.mrf.mxu1 }
 0x452   : > { %v3313_v27 = vadd.f32 %v5406_v52, %v3298_v16  ;;  %v3297_v26 = vmul.f32 %v5399_v55, %v3259_v17 }
 0x454   : > { %v3321_v21 = vmax.f32 %v3313_v27, 0.0  ;;  %v3312_v22 = vadd.f32 %v5406_v52, %v3297_v26 }
 0x456   : > { %3330 = vst.msk [vmem:[#allocation7 + $0x18] sm:$0xff] %vm3326_vm9, %v3321_v21  ;;  %v3320_v30 = vmax.f32 %v3312_v22, 0.0  ;;  %v3476_v22 = vld [vmem:[%s5602_s7 + $0xa0] sm:$0xff] }
 0x458   : > { %3329 = vst.msk [vmem:[#allocation7 + $0x10] sm:$0xff] %vm3326_vm9, %v3320_v30 }
 0x45d   : > { %v3353_v30 = vld [vmem:[#allocation7 + $0x18] ss:$2 sm:$0xf]  ;;  %v3361_v45 = vld [vmem:[#allocation7 + $0x19] ss:$2 sm:$0xf] }
 0x45e   : > { %v3371_v10 = vmax.f32 %v3353_v30, %v3361_v45 }
 0x45f   : > { %v3337_v16 = vld [vmem:[#allocation7 + $0x10] ss:$2 sm:$0xf]  ;;  %v3345_v21 = vld [vmem:[#allocation7 + $0x11] ss:$2 sm:$0xf] }
 0x460   : > { %v3367_v28 = vmax.f32 %v3337_v16, %v3345_v21 }
 0x4c0   : > { %v3959_v31 = vpop.f32.mrf.mxu1 }
 0x4c1   : > { %v3300_v32 = vmul.f32 %v3959_v31, %v5399_v55  ;;  %v3458_v31 = vld [vmem:[%s5602_s7 + $0x10] sm:$0xff] }
 0x4c2   : > { %v3269_v36 = vpop.f32.mrf.mxu1 }
 0x4c3   : > { %v3315_v18 = vadd.f32 %v5406_v52, %v3300_v32  ;;  %v3299_v33 = vmul.f32 %v5399_v55, %v3269_v36 }
 0x4c5   : > { %v3323_v37 = vmax.f32 %v3315_v18, 0.0  ;;  %v3314_v23 = vadd.f32 %v5406_v52, %v3299_v33 }
 0x4c7   : > { %3332 = vst.msk [vmem:[#allocation7 + $0x28] sm:$0xff] %vm3326_vm9, %v3323_v37  ;;  %v3322_v38 = vmax.f32 %v3314_v23, 0.0  ;;  %v3375_v37 = vmax.f32 %v3367_v28, %v3371_v10  ;;  %v3473_v23 = vld [vmem:[%s5602_s7 + $0x88] sm:$0xff]  ;;  %v3563_v28 = vld [vmem:[%s5604_s9 + $0x18] sm:$0xff]  ;;  %v3488_v10 = vld [vmem:[%s5603_s8] sm:$0x1] }
 0x4c9   : > { %3331 = vst.msk [vmem:[#allocation7 + $0x20] sm:$0xff] %vm3326_vm9, %v3322_v38  ;;  %v3457_v38 = vld [vmem:[%s5602_s7 + $0x8] sm:$0xff]  ;;  %v3395_v44 = vrot.slane %v3375_v37, 1 }
 0x4cd   : > { %v3962_v35 = vpop.f32.mrf.mxu1 }
 0x4ce   : > { %v3302_v46 = vmul.f32 %v3962_v35, %v5399_v55  ;;  %v3355_v40 = vld [vmem:[#allocation7 + $0x28] ss:$2 sm:$0xf]  ;;  %v3363_v51 = vld [vmem:[#allocation7 + $0x29] ss:$2 sm:$0xf] }
 0x4cf   : > { %v3279_v54 = vpop.f32.mrf.mxu1  ;;  %v3372_v3 = vmax.f32 %v3355_v40, %v3363_v51 }
 0x4d0   : > { %v3317_v39 = vadd.f32 %v5406_v52, %v3302_v46  ;;  %v3301_v60 = vmul.f32 %v5399_v55, %v3279_v54  ;;  %v3339_v63 = vld [vmem:[#allocation7 + $0x20] ss:$2 sm:$0xf]  ;;  %v3347_v61 = vld [vmem:[#allocation7 + $0x21] ss:$2 sm:$0xf] }
 0x4d1   : > { %v3368_v62 = vmax.f32 %v3339_v63, %v3347_v61  ;;  %v3463_v55 = vld [vmem:[%s5602_s7 + $0x38] sm:$0xff]  ;;  %v3399_v46 = vrot.slane %v3375_v37, 2  ;;  %v3403_v54 = vrot.slane %v3375_v37, 3 }
 0x4d2   : > { %v3325_v9 = vmax.f32 %v3317_v39, 0.0  ;;  %v3316_v5 = vadd.f32 %v5406_v52, %v3301_v60  ;;  %3852 = vmatpush3.msra.mxu1 %v3463_v55  ;;  %v3477_v52 = vld [vmem:[%s5602_s7 + $0xa8] sm:$0xff] }
 0x4d3   : > { %v5505_v8 = vmax.f32 %v3368_v62, %v3372_v3  ;;  %3853 = vmatprep.subr.mxu1 %v3478_v7 }
 0x4d4   : > { %3334 = vst.msk [vmem:[#allocation7 + $0x38] sm:$0xff] %vm3326_vm9, %v3325_v9  ;;  %v3324_v48 = vmax.f32 %v3316_v5, 0.0  ;;  %3854 = vmatpush3.msra.mxu1 %v3462_v11 }
 0x4d5   : > { %v3412_v14 = vrot.slane %v5505_v8, 2  ;;  %v3408_v19 = vrot.slane %v5505_v8, 1  ;;  %v3416_v26 = vrot.slane %v5505_v8, 3  ;;  %3855 = vmatprep.subr.mxu1 %v3477_v52 }
 0x4d6   : > { %3333 = vst.msk [vmem:[#allocation7 + $0x30] sm:$0xff] %vm3326_vm9, %v3324_v48  ;;  %3856 = vmatpush3.msra.mxu1 %v3461_v59 }
 0x4d7   : > { %v4004_v17 = vpack.i.bf16 %v3383_v13, %v3412_v14  ;;  %v3999_v27 = vpack.i.bf16 %v3379_v15, %v3408_v19  ;;  %3857 = vmatprep.subr.mxu1 %v3476_v22  ;;  %v4009_v53 = vpack.i.bf16 %v3387_v25, %v3416_v26 }
 0x4d8   : > { %3858 = vmatpush3.msra.mxu1 %v3460_v24 }
 0x4d9   : > { %4005 = vrot.lane.b32.xlu1 %v4004_v17, %s4056_s21  ;;  %4000 = vrot.lane.b32.xlu0 %v3999_v27, %s4052_s26 }
 0x4da   : > { %3859 = vmatprep.subr.mxu1 %v3475_v12 }
 0x4db   : > { %v3357_v20 = vld [vmem:[#allocation7 + $0x38] ss:$2 sm:$0xf]  ;;  %v3365_v6 = vld [vmem:[#allocation7 + $0x39] ss:$2 sm:$0xf]  ;;  %3860 = vmatpush3.msra.mxu1 %v3459_v29 }
 0x4dc   : > { %v3373_v33 = vmax.f32 %v3357_v20, %v3365_v6  ;;  %3861 = vmatprep.subr.mxu1 %v3474_v34  ;;  %v3562_v29 = vld [vmem:[%s5604_s9 + $0x10] sm:$0xff]  ;;  %v3560_v20 = vld [vmem:[%s5604_s9] sm:$0xff] }
 0x4dd   : > { %4010 = vrot.lane.b32.xlu0 %v4009_v53, %s4058_s25  ;;  %v3341_v32 = vld [vmem:[#allocation7 + $0x30] ss:$2 sm:$0xf]  ;;  %v3349_v36 = vld [vmem:[#allocation7 + $0x31] ss:$2 sm:$0xf]  ;;  %3862 = vmatpush3.msra.mxu1 %v3458_v31 }
 0x4de   : > { %v3369_v18 = vmax.f32 %v3341_v32, %v3349_v36  ;;  %3863 = vmatprep.subr.mxu1 %v3473_v23  ;;  %v3561_v53 = vld [vmem:[%s5604_s9 + $0x8] sm:$0xff] }
 0x4df   : > { %3864 = vmatpush3.msra.mxu1 %v3457_v38 }
 0x4e0   : > { %v3377_v41 = vmax.f32 %v3369_v18, %v3373_v33  ;;  %3865 = vmatprep.subr.mxu1 %v3472_v56  ;;  %v3564_v18 = vld [vmem:[%s5605_s10] sm:$0x1] }
 0x4e1   : > { %3866 = vmatpush3.msra.mxu1 %v3456_v42 }
 0x4e2   : > { %v4014_v43 = vpack.i.bf16 %v3375_v37, %v3377_v41  ;;  %v3424_v35 = vrot.slane %v3377_v41, 1  ;;  %v3428_v49 = vrot.slane %v3377_v41, 2  ;;  %v3432_v40 = vrot.slane %v3377_v41, 3  ;;  %3963 = vmatprep.subr.mxu1 %v4048_v0 }
 0x4e4   : > { %4015 = vrot.lane.b32.xlu1 %v4014_v43, %s4060_s29  ;;  %v4019_v50 = vpack.i.bf16 %v3395_v44, %v3424_v35  ;;  %v4024_v51 = vpack.i.bf16 %v3399_v46, %v3428_v49  ;;  %v4029_v58 = vpack.i.bf16 %v3403_v54, %v3432_v40 }
 0x4e6   : > { %4020 = vrot.lane.b32.xlu0 %v4019_v50, %s4061_s23  ;;  %s382_s23 = scalar_lea.vmem %s5606_s11, %s5608_s18 }
 0x4e8   : > { %4025 = vrot.lane.b32.xlu1 %v4024_v51, %s4062_s28 }
 0x4ea   : > { %4030 = vrot.lane.b32.xlu0 %v4029_v58, %s4063_s24 }
 0x54b   : > { %v4001_v57 = vpop.permute.xlu0 %4000  ;;  %v4006_v2 = vpop.permute.xlu1 %4005 }
 0x54c   : > { %v4003_v39 = vunpack.i.h.bf16 %v4001_v57  ;;  %v4002_v60 = vunpack.i.l.bf16 %v4001_v57  ;;  %v4008_v61 = vunpack.i.h.bf16 %v4006_v2  ;;  %v4007_v62 = vunpack.i.l.bf16 %v4006_v2 }
 0x54e   : > { %v3436_v3 = vsel %vm3326_vm9, %v5490_v47, %v4003_v39  ;;  %v3449_v4 = vsel %vm3326_vm9, %v5505_v8, %v4002_v60 }
 0x54f   : > { %v4011_v63 = vpop.permute.xlu0 %4010  ;;  %v3438_v55 = vsel %vm3437_vm10, %v3436_v3, %v4008_v61  ;;  %v3450_v7 = vsel %vm3437_vm10, %v3449_v4, %v4007_v62 }
 0x550   : > { %v4013_v1 = vunpack.i.h.bf16 %v4011_v63  ;;  %v4012_v9 = vunpack.i.l.bf16 %v4011_v63 }
 0x552   : > { %v3440_v52 = vsel %vm3439_vm11, %v3438_v55, %v4013_v1  ;;  %v3451_v13 = vsel %vm3439_vm11, %v3450_v7, %v4012_v9 }
 0x556   : > { %v4016_v5 = vpop.permute.xlu1 %4015 }
 0x557   : > { %v4018_v11 = vunpack.i.h.bf16 %v4016_v5  ;;  %v4017_v48 = vunpack.i.l.bf16 %v4016_v5 }
 0x558   : > { %v4021_v14 = vpop.permute.xlu0 %4020 }
 0x559   : > { %v3442_v15 = vsel %vm3441_vm12, %v3440_v52, %v4018_v11  ;;  %v3452_v47 = vsel %vm3441_vm12, %v3451_v13, %v4017_v48  ;;  %v4023_v19 = vunpack.i.h.bf16 %v4021_v14  ;;  %v4022_v59 = vunpack.i.l.bf16 %v4021_v14 }
 0x55a   : > { %v4026_v8 = vpop.permute.xlu1 %4025 }
 0x55b   : > { %v3444_v16 = vsel %vm3443_vm13, %v3442_v15, %v4023_v19  ;;  %v4028_v17 = vunpack.i.h.bf16 %v4026_v8  ;;  %v4027_v27 = vunpack.i.l.bf16 %v4026_v8  ;;  %v3453_v26 = vsel %vm3443_vm13, %v3452_v47, %v4022_v59 }
 0x55c   : > { %v4031_v21 = vpop.permute.xlu0 %4030 }
 0x55d   : > { %v3446_v22 = vsel %vm3445_vm14, %v3444_v16, %v4028_v17  ;;  %v4033_v30 = vunpack.i.h.bf16 %v4031_v21  ;;  %v4032_v24 = vunpack.i.l.bf16 %v4031_v21  ;;  %v3454_v25 = vsel %vm3445_vm14, %v3453_v26, %v4027_v27 }
 0x55f   : > { %v3455_v45 = vsel %vm3447_vm15, %v3454_v25, %v4032_v24  ;;  %v3448_v12 = vsel %vm3447_vm15, %v3446_v22, %v4033_v30 }
 0x560   : > { %3553 = vmatprep.mubr.f32.mxu1 %v3455_v45 }
 0x561   : > { %3554 = vmatmul.mubr.f32.vlgmr.msra.gmra.mxu1 %v3448_v12 }
 0x562   : > { %3964 = vmatpush3.msra.mxu1 %v3563_v28  ;;  %3971 = vmatprep.mubr.msk.f32.mxu1 %vm4064_vm0, %v4048_v0 }
 0x563   : > { %3965 = vmatprep.subr.mxu1 %v4048_v0 }
 0x564   : > { %3966 = vmatpush3.msra.mxu1 %v3562_v29 }
 0x565   : > { %3967 = vmatprep.subr.mxu1 %v4048_v0 }
 0x566   : > { %3968 = vmatpush3.msra.mxu1 %v3561_v53 }
 0x567   : > { %3969 = vmatprep.subr.mxu1 %v4048_v0 }
 0x568   : > { %3970 = vmatpush3.msra.mxu1 %v3560_v20 }
 0x621   : > { %v3867_v6 = vpop.f32.mrf.mxu1 }
 0x623   : > { %v3868_v34 = vpop.f32.mrf.mxu1 }
 0x624   : > { %v3869_v31 = vadd.f32 %v3868_v34, %v3867_v6 }
 0x626   : > { %v3556_v32 = vadd.f32 %v3869_v31, %v3488_v10 }
 0x628   : > { %v3559_v36 = vmax.f32 %v3556_v32, 0.0 }
 0x62a   : > { %3972 = vmatmul.mubr.msk.f32.vlgmr.msra.gmra.mxu1 %vm3437_vm10, %v3559_v36 }
 0x6ea   : > { %v3634_v33 = vpop.f32.mrf.mxu1 }
 0x6eb   : > { %v3635_v37 = vadd.f32 %v3634_v33, %v3564_v18 }
 0x6ec   : > { %v3973_v0 = vpop.f32.mrf.mxu1 }
 0x6ed   : > { %v3639_v23 = vmin.f32 %v3635_v37, 20.0  ;;  %vm3638_vm3 = vcmp.gt.f32.partialorder %v3635_v37, 20.0 }
 0x6ef   : > { %v3640_v38 = vmul.f32 1.442695, %v3639_v23 }
 0x6f1   : > { %4034 = vpow2.f32 %v3640_v38 }
 0x6fe   : > { %v4035_v56 = vpop.eup %4034 }
 0x6ff   : > { %v3642_v41 = vadd.f32 1.0, %v4035_v56  ;;  %v3645_v42 = vmul.f32 -0.5, %v4035_v56  ;;  %v3648_v44 = vand.u32 2147483647, %v4035_v56 }
 0x701   : > { %4036 = vlog2.f32 %v3642_v41  ;;  %v3646_v43 = vadd.f32 1.0, %v3645_v42  ;;  %vm3649_vm1 = vcmp.lt.f32.partialorder %v3648_v44, 0.0004427343 }
 0x703   : > { %v3647_v50 = vmul.f32 %v4035_v56, %v3646_v43 }
 0x70e   : > { %v4037_v35 = vpop.eup %4036 }
 0x70f   : > { %v3644_v49 = vmul.f32 0.6931472, %v4037_v35 }
 0x711   : > { %v3650_v46 = vsel %vm3649_vm1, %v3647_v50, %v3644_v49 }
 0x712   : > { %v3651_v40 = vsel %vm3638_vm3, %v3635_v37, %v3650_v46 }
 0x713   : > { %v3653_v51 = vsel %vm3652_vm2, %v3635_v37, %v3651_v40 }
 0x714   : > { %3655 = vst.msk [vmem:[%s382_s23] sm:$0x1] %vm3654_vm4, %v3653_v51 }
 0x715 PF: > { %s21_s17 = sadd.s32 1, %s4046_s17  }
 0x716   : > { %p18_p4 = scmp.ge.s32.totalorder %s21_s17, 4  }
 0x718   :  { %20 = sbr.rel (!%p18_p4) target bundleno = 1 (0x1), region = 146 }

</bundles_post_ra>
